<compile_context>
chip_gen: v6e
topology: v6e:2x2x1
jax: 0.10.0
libtpu: 0.0.40
codegen_flags: <defaults>
</compile_context>

<pallas_src>
import functools

import jax
import jax.numpy as jnp
import numpy as np
from jax.experimental import pallas as pl
from jax.experimental.pallas import tpu as pltpu

EPS = 1e-5  # nn.GroupNorm default


# ----------------------------- host-side constants ---------------------------


def _log2i(n):
    assert n >= 1 and (n & (n - 1)) == 0, f"{n} must be a power of two"
    return n.bit_length() - 1


def _conv3x3_masks(H, W):
    """(9, H*W) f32: per-tap validity mask of the zero-padded 3x3 conv (tap-major ky,kx)."""
    p = np.arange(H * W)
    y, x = p // W, p % W
    rows = []
    for ky in range(3):
        for kx in range(3):
            dy, dx = ky - 1, kx - 1
            valid = (y + dy >= 0) & (y + dy < H) & (x + dx >= 0) & (x + dx < W)
            rows.append(valid.astype(np.float32))
    return np.stack(rows)


def _group_matrix(C, groups):
    """(C, C) f32: A[i, j] = 1 iff channels i, j are in the same GroupNorm group."""
    cg = C // groups
    idx = np.arange(C) // cg
    return (idx[:, None] == idx[None, :]).astype(np.float32)


def _downsample_schedule(H, W):
    """Roll/select schedule that compacts lanes {2*(qy*W + qx)} of a (., H*W) array into the
    first (H//2)*(W//2) lanes.  Returns (shifts tuple, (n_steps, H*W) f32 masks)."""
    HW = H * W
    lane = np.arange(HW)
    shifts, masks = [], []
    # Stage 1: keep even lanes (x-downsample) -- classic log-step even compaction.
    for k in range(_log2i(HW // 2)):
        shifts.append(1 << k)
        masks.append((((lane >> k) & 1) == 1) & (((lane >> (k + 1)) & 1) == 0))
    # Stage 2: keep even chunks of W//2 lanes (y-downsample) -- same algorithm per chunk.
    ch = lane // (W // 2)
    for k in range(_log2i(H // 2)):
        shifts.append((W // 2) * (1 << k))
        masks.append((((ch >> k) & 1) == 1) & (((ch >> (k + 1)) & 1) == 0))
    # Verify the schedule by host-side simulation (trace time only).
    v = lane.copy()
    for s, m in zip(shifts, masks):
        v = np.where(m, np.roll(v, -s), v)
    qy, qx = np.meshgrid(np.arange(H // 2), np.arange(W // 2), indexing="ij")
    want = (2 * qy * W + 2 * qx).reshape(-1)
    assert np.array_equal(v[: want.size], want), "downsample compaction schedule is wrong"
    return tuple(shifts), np.stack(masks).astype(np.float32)


# ----------------------------- in-kernel helpers -----------------------------


def _silu(x):
    return x * jax.nn.sigmoid(x)


def _group_norm_silu(x, gamma, beta, gmat, groups):
    # x: (C, HW) f32; gamma/beta: (C, 1); gmat: (C, C) group-mix matrix (resident operand).
    C, HW = x.shape
    inv_n = 1.0 / float((C // groups) * HW)
    gsum = jnp.dot(gmat, x, preferred_element_type=jnp.float32)        # (C, HW) per-lane group sums
    mean = jnp.sum(gsum, axis=1, keepdims=True) * inv_n                # (C, 1) group mean per channel
    xm = x - mean
    gsq = jnp.dot(gmat, xm * xm, preferred_element_type=jnp.float32)   # (C, HW)
    var = jnp.sum(gsq, axis=1, keepdims=True) * inv_n                  # (C, 1) two-pass variance (>= 0)
    y = xm * jax.lax.rsqrt(var + EPS) * gamma + beta
    return _silu(y)


def _conv3x3(x, w9_ref, bmask, H, W):
    # x: (Cin, HW) f32; w9_ref: (9, Cout, Cin) ref; bmask: (9, HW) f32 boundary masks (value).
    # Zero-padded 3x3 conv as 9 accumulated per-tap dots; taps via lane rolls + resident masks.
    HW = H * W
    acc = None
    for ky in range(3):
        for kx in range(3):
            t = ky * 3 + kx
            d = (ky - 1) * W + (kx - 1)
            if d == 0:
                tap = x
            else:
                tap = pltpu.roll(x, shift=(-d) % HW, axis=1) * bmask[t:t + 1, :]
            c = jnp.dot(w9_ref[t], tap, preferred_element_type=jnp.float32)
            acc = c if acc is None else acc + c
    return acc


def _downsample2x2(h, dw_ref, db, cmask, shifts, H, W):
    # 2x2/stride-2 conv (padding 0).  Taps are pre-rolled so every output position reads the
    # same lanes 2*(qy*W+qx); those lanes are then compacted with the precomputed roll schedule.
    HW = H * W
    g = None
    for ky in range(2):
        for kx in range(2):
            t = ky * 2 + kx
            off = ky * W + kx
            v = jnp.dot(dw_ref[t], h, preferred_element_type=jnp.float32)
            if off:
                v = pltpu.roll(v, shift=(HW - off) % HW, axis=1)
            g = v if g is None else g + v
    for i, s in enumerate(shifts):
        rolled = pltpu.roll(g, shift=(HW - s) % HW, axis=1)
        g = jnp.where(cmask[i:i + 1, :] > 0.5, rolled, g)
    HW2 = (H // 2) * (W // 2)
    return g[:, :HW2] + db


# ----------------------------- Pallas kernel ---------------------------------


def _resnet_block_kernel(*refs, groups, H, W, shifts, has_skip, fuse_down):
    (x_ref, cond_ref, g1w_ref, g1b_ref, w1_ref, b1_ref,
     g2w_ref, g2b_ref, w2_ref, b2_ref, gm1_ref, gm2_ref, bm_ref) = refs[:13]
    pos = 13
    sw_ref = sb_ref = None
    if has_skip:
        sw_ref, sb_ref = refs[pos:pos + 2]
        pos += 2
    dw_ref = db_ref = cm_ref = None
    if fuse_down:
        dw_ref, db_ref, cm_ref = refs[pos:pos + 3]
        pos += 3
    o_skip_ref = refs[pos]
    o_down_ref = refs[pos + 1] if fuse_down else None

    x = x_ref[0].astype(jnp.float32)                                  # (Cin, HW)
    bm = bm_ref[...]                                                  # (9, HW) shared by both convs

    h = _group_norm_silu(x, g1w_ref[...], g1b_ref[...], gm1_ref[...], groups)
    h = _conv3x3(h, w1_ref, bm, H, W) + b1_ref[...]
    h = h + cond_ref[0]                                               # (Cout, 1) precomputed projection
    h = _group_norm_silu(h, g2w_ref[...], g2b_ref[...], gm2_ref[...], groups)
    h = _conv3x3(h, w2_ref, bm, H, W) + b2_ref[...]

    if has_skip:
        res = jnp.dot(sw_ref[...], x, preferred_element_type=jnp.float32) + sb_ref[...]
    else:
        res = x                                                       # identity skip (Cin == Cout)
    out = h + res
    o_skip_ref[0] = out.astype(o_skip_ref.dtype)

    if fuse_down:
        d = _downsample2x2(out, dw_ref, db_ref[...], cm_ref[...], shifts, H, W)
        o_down_ref[0] = d.astype(o_down_ref.dtype)


# ----------------------------- kernel wrapper --------------------------------


def _res_spec(shape):
    zeros = (0,) * len(shape)
    return pl.BlockSpec(shape, lambda n, _z=zeros: _z)


def resnet_block(x, cond_proj, p, groups, H, W, down=None):
    # x: (N, Cin, H*W); cond_proj: (N, Cout, 1); down: None or (down_w (2,2,Cout,Cout), down_b (Cout,))
    N, cin, HW = x.shape
    assert HW == H * W
    assert (H & (H - 1)) == 0 and (W & (W - 1)) == 0, "power-of-two spatial dims expected"
    cout = p["conv1_w"].shape[-1]
    has_skip = "skip_w" in p
    if not has_skip:
        assert cin == cout, "identity residual requires Cin == Cout"
    fuse_down = down is not None

    # HWIO (3,3,cin,cout) -> (9, cout, cin), tap-major (ky,kx).
    w1 = jnp.asarray(p["conv1_w"]).transpose((0, 1, 3, 2)).reshape(9, cout, cin)
    w2 = jnp.asarray(p["conv2_w"]).transpose((0, 1, 3, 2)).reshape(9, cout, cout)

    bmask = jnp.asarray(_conv3x3_masks(H, W))                           # (9, HW)
    gm1 = jnp.asarray(_group_matrix(cin, groups))                       # (cin, cin)
    gm2 = jnp.asarray(_group_matrix(cout, groups))                      # (cout, cout)

    args = [x, cond_proj,
            p["gn1_w"].reshape(cin, 1), p["gn1_b"].reshape(cin, 1),
            w1, p["conv1_b"].reshape(cout, 1),
            p["gn2_w"].reshape(cout, 1), p["gn2_b"].reshape(cout, 1),
            w2, p["conv2_b"].reshape(cout, 1),
            gm1, gm2, bmask]
    in_specs = [
        pl.BlockSpec((1, cin, HW), lambda n: (n, 0, 0)),
        pl.BlockSpec((1, cout, 1), lambda n: (n, 0, 0)),
        _res_spec((cin, 1)), _res_spec((cin, 1)),
        _res_spec((9, cout, cin)), _res_spec((cout, 1)),
        _res_spec((cout, 1)), _res_spec((cout, 1)),
        _res_spec((9, cout, cout)), _res_spec((cout, 1)),
        _res_spec((cin, cin)), _res_spec((cout, cout)), _res_spec((9, HW)),
    ]
    if has_skip:
        args += [p["skip_w"].T, p["skip_b"].reshape(cout, 1)]           # (cout, cin), (cout, 1)
        in_specs += [_res_spec((cout, cin)), _res_spec((cout, 1))]

    shifts = ()
    if fuse_down:
        down_w, down_b = down
        dw = jnp.asarray(down_w).transpose((0, 1, 3, 2)).reshape(4, cout, cout)
        shifts, cmask = _downsample_schedule(H, W)
        cmask = jnp.asarray(cmask)
        args += [dw, down_b.reshape(cout, 1), cmask]
        in_specs += [_res_spec((4, cout, cout)), _res_spec((cout, 1)),
                     _res_spec(tuple(cmask.shape))]

    HW2 = (H // 2) * (W // 2)
    skip_shape = jax.ShapeDtypeStruct((N, cout, HW), x.dtype)
    skip_spec = pl.BlockSpec((1, cout, HW), lambda n: (n, 0, 0))
    if fuse_down:
        out_shape = (skip_shape, jax.ShapeDtypeStruct((N, cout, HW2), x.dtype))
        out_specs = (skip_spec, pl.BlockSpec((1, cout, HW2), lambda n: (n, 0, 0)))
    else:
        out_shape = skip_shape
        out_specs = skip_spec

    kern = functools.partial(_resnet_block_kernel, groups=groups, H=H, W=W,
                             shifts=shifts, has_skip=has_skip, fuse_down=fuse_down)
    return pl.pallas_call(
        kern,
        out_shape=out_shape,
        grid=(N,),
        in_specs=in_specs,
        out_specs=out_specs,
        compiler_params=pltpu.CompilerParams(
            dimension_semantics=("parallel",),
            vmem_limit_bytes=32 * 1024 * 1024),
    )(*args)


# ----------------------------- module forward --------------------------------


def resnet_down_apply(params, x_nchw, conditionings, groups, no_down=False):
    N, C, H, W = x_nchw.shape
    x = x_nchw.reshape(N, C, H * W)                 # contiguity-preserving, free
    blocks = params["resnet_blocks"]
    out_down = None
    for i, p in enumerate(blocks):
        cout = p["conv1_w"].shape[-1]
        # Conditioning projection: tiny dense matmul, handled by XLA in the wrapper.
        cond_proj = (jnp.dot(jax.nn.silu(conditionings), p["cond_w"])
                     + p["cond_b"]).reshape(N, cout, 1)
        is_last = i == len(blocks) - 1
        if is_last and not no_down:
            x, out_down = resnet_block(x, cond_proj, p, groups, H, W,
                                       down=(params["down_w"], params["down_b"]))
        else:
            x = resnet_block(x, cond_proj, p, groups, H, W)
    cout = x.shape[1]
    x_skip = x.reshape(N, cout, H, W)
    if no_down:
        return x_skip, None
    return out_down.reshape(N, cout, H // 2, W // 2), x_skip


# ----------------------------- pure-JAX reference ----------------------------


def _ref_conv(x, w_hwio, b, stride, pad):
    y = jax.lax.conv_general_dilated(x, w_hwio, (stride, stride), pad,
                                     dimension_numbers=("NHWC", "HWIO", "NHWC"))
    return y + b


def _ref_gn_silu(x, gamma, beta, groups):
    N, H, W, C = x.shape
    xg = x.reshape(N, H, W, groups, C // groups)
    mean = xg.mean(axis=(1, 2, 4), keepdims=True)
    var = ((xg - mean) ** 2).mean(axis=(1, 2, 4), keepdims=True)
    y = ((xg - mean) / jnp.sqrt(var + EPS)).reshape(N, H, W, C)
    y = y * gamma + beta
    return y * jax.nn.sigmoid(y)


def _ref_resnet_block(p, x, cond, groups):
    h = _ref_gn_silu(x, p["gn1_w"], p["gn1_b"], groups)
    h = _ref_conv(h, p["conv1_w"], p["conv1_b"], 1, ((1, 1), (1, 1)))
    ce = jnp.dot(jax.nn.silu(cond), p["cond_w"]) + p["cond_b"]
    h = h + ce[:, None, None, :]
    h = _ref_gn_silu(h, p["gn2_w"], p["gn2_b"], groups)
    if "skip_w" in p:
        res = _ref_conv(x, p["skip_w"][None, None], p["skip_b"], 1, ((0, 0), (0, 0)))
    else:
        res = x
    return _ref_conv(h, p["conv2_w"], p["conv2_b"], 1, ((1, 1), (1, 1))) + res


def _ref_resnet_down(params, x_nchw, cond, groups, no_down=False):
    x = jnp.transpose(x_nchw, (0, 2, 3, 1))
    for p in params["resnet_blocks"]:
        x = _ref_resnet_block(p, x, cond, groups)
    if no_down:
        return jnp.transpose(x, (0, 3, 1, 2)), None
    x_skip = x
    x = _ref_conv(x, params["down_w"], params["down_b"], 2, ((0, 0), (0, 0)))
    return jnp.transpose(x, (0, 3, 1, 2)), jnp.transpose(x_skip, (0, 3, 1, 2))


# ----------------------------- param init ------------------------------------


def init_resnet_block(key, cin, cout, cond_dim):
    ks = jax.random.split(key, 10)
    p = {
        "gn1_w": 1.0 + 0.1 * jax.random.normal(ks[0], (cin,), jnp.float32),
        "gn1_b": 0.1 * jax.random.normal(ks[1], (cin,), jnp.float32),
        "conv1_w": 0.1 * jax.random.normal(ks[2], (3, 3, cin, cout), jnp.float32),
        "conv1_b": 0.05 * jax.random.normal(ks[3], (cout,), jnp.float32),
        "cond_w": 0.1 * jax.random.normal(ks[4], (cond_dim, cout), jnp.float32),
        "cond_b": 0.05 * jax.random.normal(ks[5], (cout,), jnp.float32),
        "gn2_w": 1.0 + 0.1 * jax.random.normal(ks[6], (cout,), jnp.float32),
        "gn2_b": 0.1 * jax.random.normal(ks[7], (cout,), jnp.float32),
        "conv2_w": 0.1 * jax.random.normal(ks[8], (3, 3, cout, cout), jnp.float32),
        "conv2_b": 0.05 * jax.random.normal(ks[9], (cout,), jnp.float32),
    }
    if cin != cout:
        k2 = jax.random.split(ks[9], 2)
        p["skip_w"] = 0.1 * jax.random.normal(k2[0], (cin, cout), jnp.float32)
        p["skip_b"] = 0.05 * jax.random.normal(k2[1], (cout,), jnp.float32)
    return p


# ----------------------------- main -------------------------------------------


if __name__ == "__main__":
    key = jax.random.PRNGKey(0)
    N, C_IN, H, W = 2, 4, 16, 16
    C_OUT, COND_DIM, GROUPS = 8, 32, 2

    ks = jax.random.split(key, 6)
    x_nchw = jax.random.normal(ks[0], (N, C_IN, H, W), jnp.float32)      # PyTorch NCHW input
    cond = jax.random.normal(ks[1], (N, COND_DIM), jnp.float32)

    params = {
        "resnet_blocks": [
            init_resnet_block(ks[2], C_IN, C_OUT, COND_DIM),
            init_resnet_block(ks[3], C_OUT, C_OUT, COND_DIM),
        ],
        # ResNetDown.down = conv(ch_out, ch_out, kernel_size=2, stride=2, padding=0)
        "down_w": 0.1 * jax.random.normal(ks[4], (2, 2, C_OUT, C_OUT), jnp.float32),
        "down_b": 0.05 * jax.random.normal(ks[5], (C_OUT,), jnp.float32),
    }

    fwd = jax.jit(functools.partial(resnet_down_apply, groups=GROUPS))
    out, skip = fwd(params, x_nchw, cond)
    jax.block_until_ready((out, skip))

    ref_out, ref_skip = _ref_resnet_down(params, x_nchw, cond, GROUPS)
    np.testing.assert_allclose(np.asarray(out), np.asarray(ref_out), rtol=2e-4, atol=2e-4)
    np.testing.assert_allclose(np.asarray(skip), np.asarray(ref_skip), rtol=2e-4, atol=2e-4)
    assert out.shape == (N, C_OUT, H // 2, W // 2) and skip.shape == (N, C_OUT, H, W)

    print("KERNEL_OK")
</pallas_src>

<mosaic_0001>
module attributes {stable_mosaic.version = 11 : i64} {
  func.func @_resnet_block_kernel(%arg0: i32, %arg1: memref<1x4x256xf32, #tpu.memory_space<vmem>>, %arg2: memref<1x8x1xf32, #tpu.memory_space<vmem>>, %arg3: memref<4x1xf32, #tpu.memory_space<vmem>>, %arg4: memref<4x1xf32, #tpu.memory_space<vmem>>, %arg5: memref<9x8x4xf32, #tpu.memory_space<vmem>>, %arg6: memref<8x1xf32, #tpu.memory_space<vmem>>, %arg7: memref<8x1xf32, #tpu.memory_space<vmem>>, %arg8: memref<8x1xf32, #tpu.memory_space<vmem>>, %arg9: memref<9x8x8xf32, #tpu.memory_space<vmem>>, %arg10: memref<8x1xf32, #tpu.memory_space<vmem>>, %arg11: memref<4x4xf32, #tpu.memory_space<vmem>>, %arg12: memref<8x8xf32, #tpu.memory_space<vmem>>, %arg13: memref<9x256xf32, #tpu.memory_space<vmem>>, %arg14: memref<8x4xf32, #tpu.memory_space<vmem>>, %arg15: memref<8x1xf32, #tpu.memory_space<vmem>>, %arg16: memref<1x8x256xf32, #tpu.memory_space<vmem>>) attributes {dimension_semantics = [#tpu.dimension_semantics<parallel>], iteration_bounds = array<i64: 2>, scalar_prefetch = 0 : i64, scratch_operands = 0 : i64, tpu.core_type = #tpu.core_type<tc>, window_params = [{transform_indices = @transform_0, window_bounds = array<i64: 1, 4, 256>}, {transform_indices = @transform_1, window_bounds = array<i64: 1, 8, 1>}, {pipeline_mode = #tpu.pipeline_mode<synchronous>, transform_indices = @transform_2, window_bounds = array<i64: 4, 1>}, {pipeline_mode = #tpu.pipeline_mode<synchronous>, transform_indices = @transform_3, window_bounds = array<i64: 4, 1>}, {pipeline_mode = #tpu.pipeline_mode<synchronous>, transform_indices = @transform_4, window_bounds = array<i64: 9, 8, 4>}, {pipeline_mode = #tpu.pipeline_mode<synchronous>, transform_indices = @transform_5, window_bounds = array<i64: 8, 1>}, {pipeline_mode = #tpu.pipeline_mode<synchronous>, transform_indices = @transform_6, window_bounds = array<i64: 8, 1>}, {pipeline_mode = #tpu.pipeline_mode<synchronous>, transform_indices = @transform_7, window_bounds = array<i64: 8, 1>}, {pipeline_mode = #tpu.pipeline_mode<synchronous>, transform_indices = @transform_8, window_bounds = array<i64: 9, 8, 8>}, {pipeline_mode = #tpu.pipeline_mode<synchronous>, transform_indices = @transform_9, window_bounds = array<i64: 8, 1>}, {pipeline_mode = #tpu.pipeline_mode<synchronous>, transform_indices = @transform_10, window_bounds = array<i64: 4, 4>}, {pipeline_mode = #tpu.pipeline_mode<synchronous>, transform_indices = @transform_11, window_bounds = array<i64: 8, 8>}, {pipeline_mode = #tpu.pipeline_mode<synchronous>, transform_indices = @transform_12, window_bounds = array<i64: 9, 256>}, {pipeline_mode = #tpu.pipeline_mode<synchronous>, transform_indices = @transform_13, window_bounds = array<i64: 8, 4>}, {pipeline_mode = #tpu.pipeline_mode<synchronous>, transform_indices = @transform_14, window_bounds = array<i64: 8, 1>}, {transform_indices = @transform_15, window_bounds = array<i64: 1, 8, 256>}]} {
    %c0 = arith.constant 0 : index
    %c0_0 = arith.constant 0 : index
    %c0_1 = arith.constant 0 : index
    %0 = vector.load %arg1[%c0, %c0_0, %c0_1] : memref<1x4x256xf32, #tpu.memory_space<vmem>>, vector<1x4x256xf32>
    %1 = vector.shape_cast %0 : vector<1x4x256xf32> to vector<4x256xf32>
    %c0_2 = arith.constant 0 : index
    %c0_3 = arith.constant 0 : index
    %2 = vector.load %arg13[%c0_2, %c0_3] : memref<9x256xf32, #tpu.memory_space<vmem>>, vector<9x256xf32>
    %c0_4 = arith.constant 0 : index
    %c0_5 = arith.constant 0 : index
    %3 = vector.load %arg3[%c0_4, %c0_5] : memref<4x1xf32, #tpu.memory_space<vmem>>, vector<4x1xf32>
    %c0_6 = arith.constant 0 : index
    %c0_7 = arith.constant 0 : index
    %4 = vector.load %arg4[%c0_6, %c0_7] : memref<4x1xf32, #tpu.memory_space<vmem>>, vector<4x1xf32>
    %c0_8 = arith.constant 0 : index
    %c0_9 = arith.constant 0 : index
    %5 = vector.load %arg11[%c0_8, %c0_9] : memref<4x4xf32, #tpu.memory_space<vmem>>, vector<4x4xf32>
    %cst = arith.constant dense<0.000000e+00> : vector<4x256xf32>
    %6 = tpu.matmul %5, %1, %cst {dimension_numbers = #tpu.dot_dimension_numbers<[1], [0], [0], [1], [0, 0, 1, 1], [], []>} : vector<4x4xf32>, vector<4x256xf32>, vector<4x256xf32> -> vector<4x256xf32>
    %cst_10 = arith.constant dense<0.000000e+00> : vector<4xf32>
    %7 = vector.multi_reduction <add>, %6, %cst_10 [1] : vector<4x256xf32> to vector<4xf32>
    %8 = vector.shape_cast %7 : vector<4xf32> to vector<4x1xf32>
    %cst_11 = arith.constant 0.001953125 : f32
    %9 = vector.broadcast %cst_11 : f32 to vector<4x1xf32>
    %10 = arith.mulf %8, %9 : vector<4x1xf32>
    %11 = vector.broadcast %10 : vector<4x1xf32> to vector<4x256xf32>
    %12 = arith.subf %1, %11 : vector<4x256xf32>
    %13 = arith.mulf %12, %12 : vector<4x256xf32>
    %cst_12 = arith.constant dense<0.000000e+00> : vector<4x256xf32>
    %14 = tpu.matmul %5, %13, %cst_12 {dimension_numbers = #tpu.dot_dimension_numbers<[1], [0], [0], [1], [0, 0, 1, 1], [], []>} : vector<4x4xf32>, vector<4x256xf32>, vector<4x256xf32> -> vector<4x256xf32>
    %cst_13 = arith.constant dense<0.000000e+00> : vector<4xf32>
    %15 = vector.multi_reduction <add>, %14, %cst_13 [1] : vector<4x256xf32> to vector<4xf32>
    %16 = vector.shape_cast %15 : vector<4xf32> to vector<4x1xf32>
    %cst_14 = arith.constant 0.001953125 : f32
    %17 = vector.broadcast %cst_14 : f32 to vector<4x1xf32>
    %18 = arith.mulf %16, %17 : vector<4x1xf32>
    %cst_15 = arith.constant 9.99999974E-6 : f32
    %19 = vector.broadcast %cst_15 : f32 to vector<4x1xf32>
    %20 = arith.addf %18, %19 : vector<4x1xf32>
    %21 = math.rsqrt %20 : vector<4x1xf32>
    %22 = vector.broadcast %21 : vector<4x1xf32> to vector<4x256xf32>
    %23 = arith.mulf %12, %22 : vector<4x256xf32>
    %24 = vector.broadcast %3 : vector<4x1xf32> to vector<4x256xf32>
    %25 = arith.mulf %23, %24 : vector<4x256xf32>
    %26 = vector.broadcast %4 : vector<4x1xf32> to vector<4x256xf32>
    %27 = arith.addf %25, %26 : vector<4x256xf32>
    %28 = arith.negf %27 : vector<4x256xf32>
    %29 = math.exp %28 : vector<4x256xf32>
    %cst_16 = arith.constant 1.000000e+00 : f32
    %30 = vector.broadcast %cst_16 : f32 to vector<4x256xf32>
    %31 = arith.addf %30, %29 : vector<4x256xf32>
    %32 = arith.divf %30, %31 : vector<4x256xf32>
    %33 = arith.mulf %27, %32 : vector<4x256xf32>
    %c17_i32 = arith.constant 17 : i32
    %34 = tpu.dynamic_rotate %33 by %c17_i32 dim 1 : vector<4x256xf32>, i32 -> vector<4x256xf32>
    %35 = vector.extract_strided_slice %2 {offsets = [0, 0], sizes = [1, 256], strides = [1, 1]} : vector<9x256xf32> to vector<1x256xf32>
    %36 = vector.broadcast %35 : vector<1x256xf32> to vector<4x256xf32>
    %37 = arith.mulf %34, %36 : vector<4x256xf32>
    %c0_17 = arith.constant 0 : index
    %c0_18 = arith.constant 0 : index
    %c0_19 = arith.constant 0 : index
    %38 = vector.load %arg5[%c0_17, %c0_18, %c0_19] : memref<9x8x4xf32, #tpu.memory_space<vmem>>, vector<1x8x4xf32>
    %39 = vector.shape_cast %38 : vector<1x8x4xf32> to vector<8x4xf32>
    %cst_20 = arith.constant dense<0.000000e+00> : vector<8x256xf32>
    %40 = tpu.matmul %39, %37, %cst_20 {dimension_numbers = #tpu.dot_dimension_numbers<[1], [0], [0], [1], [0, 0, 1, 1], [], []>} : vector<8x4xf32>, vector<4x256xf32>, vector<8x256xf32> -> vector<8x256xf32>
    %c16_i32 = arith.constant 16 : i32
    %41 = tpu.dynamic_rotate %33 by %c16_i32 dim 1 : vector<4x256xf32>, i32 -> vector<4x256xf32>
    %42 = vector.extract_strided_slice %2 {offsets = [1, 0], sizes = [1, 256], strides = [1, 1]} : vector<9x256xf32> to vector<1x256xf32>
    %43 = vector.broadcast %42 : vector<1x256xf32> to vector<4x256xf32>
    %44 = arith.mulf %41, %43 : vector<4x256xf32>
    %c1 = arith.constant 1 : index
    %c0_21 = arith.constant 0 : index
    %c0_22 = arith.constant 0 : index
    %45 = vector.load %arg5[%c1, %c0_21, %c0_22] : memref<9x8x4xf32, #tpu.memory_space<vmem>>, vector<1x8x4xf32>
    %46 = vector.shape_cast %45 : vector<1x8x4xf32> to vector<8x4xf32>
    %cst_23 = arith.constant dense<0.000000e+00> : vector<8x256xf32>
    %47 = tpu.matmul %46, %44, %cst_23 {dimension_numbers = #tpu.dot_dimension_numbers<[1], [0], [0], [1], [0, 0, 1, 1], [], []>} : vector<8x4xf32>, vector<4x256xf32>, vector<8x256xf32> -> vector<8x256xf32>
    %48 = arith.addf %40, %47 : vector<8x256xf32>
    %c15_i32 = arith.constant 15 : i32
    %49 = tpu.dynamic_rotate %33 by %c15_i32 dim 1 : vector<4x256xf32>, i32 -> vector<4x256xf32>
    %50 = vector.extract_strided_slice %2 {offsets = [2, 0], sizes = [1, 256], strides = [1, 1]} : vector<9x256xf32> to vector<1x256xf32>
    %51 = vector.broadcast %50 : vector<1x256xf32> to vector<4x256xf32>
    %52 = arith.mulf %49, %51 : vector<4x256xf32>
    %c2 = arith.constant 2 : index
    %c0_24 = arith.constant 0 : index
    %c0_25 = arith.constant 0 : index
    %53 = vector.load %arg5[%c2, %c0_24, %c0_25] : memref<9x8x4xf32, #tpu.memory_space<vmem>>, vector<1x8x4xf32>
    %54 = vector.shape_cast %53 : vector<1x8x4xf32> to vector<8x4xf32>
    %cst_26 = arith.constant dense<0.000000e+00> : vector<8x256xf32>
    %55 = tpu.matmul %54, %52, %cst_26 {dimension_numbers = #tpu.dot_dimension_numbers<[1], [0], [0], [1], [0, 0, 1, 1], [], []>} : vector<8x4xf32>, vector<4x256xf32>, vector<8x256xf32> -> vector<8x256xf32>
    %56 = arith.addf %48, %55 : vector<8x256xf32>
    %c1_i32 = arith.constant 1 : i32
    %57 = tpu.dynamic_rotate %33 by %c1_i32 dim 1 : vector<4x256xf32>, i32 -> vector<4x256xf32>
    %58 = vector.extract_strided_slice %2 {offsets = [3, 0], sizes = [1, 256], strides = [1, 1]} : vector<9x256xf32> to vector<1x256xf32>
    %59 = vector.broadcast %58 : vector<1x256xf32> to vector<4x256xf32>
    %60 = arith.mulf %57, %59 : vector<4x256xf32>
    %c3 = arith.constant 3 : index
    %c0_27 = arith.constant 0 : index
    %c0_28 = arith.constant 0 : index
    %61 = vector.load %arg5[%c3, %c0_27, %c0_28] : memref<9x8x4xf32, #tpu.memory_space<vmem>>, vector<1x8x4xf32>
    %62 = vector.shape_cast %61 : vector<1x8x4xf32> to vector<8x4xf32>
    %cst_29 = arith.constant dense<0.000000e+00> : vector<8x256xf32>
    %63 = tpu.matmul %62, %60, %cst_29 {dimension_numbers = #tpu.dot_dimension_numbers<[1], [0], [0], [1], [0, 0, 1, 1], [], []>} : vector<8x4xf32>, vector<4x256xf32>, vector<8x256xf32> -> vector<8x256xf32>
    %64 = arith.addf %56, %63 : vector<8x256xf32>
    %c4 = arith.constant 4 : index
    %c0_30 = arith.constant 0 : index
    %c0_31 = arith.constant 0 : index
    %65 = vector.load %arg5[%c4, %c0_30, %c0_31] : memref<9x8x4xf32, #tpu.memory_space<vmem>>, vector<1x8x4xf32>
    %66 = vector.shape_cast %65 : vector<1x8x4xf32> to vector<8x4xf32>
    %cst_32 = arith.constant dense<0.000000e+00> : vector<8x256xf32>
    %67 = tpu.matmul %66, %33, %cst_32 {dimension_numbers = #tpu.dot_dimension_numbers<[1], [0], [0], [1], [0, 0, 1, 1], [], []>} : vector<8x4xf32>, vector<4x256xf32>, vector<8x256xf32> -> vector<8x256xf32>
    %68 = arith.addf %64, %67 : vector<8x256xf32>
    %c255_i32 = arith.constant 255 : i32
    %69 = tpu.dynamic_rotate %33 by %c255_i32 dim 1 : vector<4x256xf32>, i32 -> vector<4x256xf32>
    %70 = vector.extract_strided_slice %2 {offsets = [5, 0], sizes = [1, 256], strides = [1, 1]} : vector<9x256xf32> to vector<1x256xf32>
    %71 = vector.broadcast %70 : vector<1x256xf32> to vector<4x256xf32>
    %72 = arith.mulf %69, %71 : vector<4x256xf32>
    %c5 = arith.constant 5 : index
    %c0_33 = arith.constant 0 : index
    %c0_34 = arith.constant 0 : index
    %73 = vector.load %arg5[%c5, %c0_33, %c0_34] : memref<9x8x4xf32, #tpu.memory_space<vmem>>, vector<1x8x4xf32>
    %74 = vector.shape_cast %73 : vector<1x8x4xf32> to vector<8x4xf32>
    %cst_35 = arith.constant dense<0.000000e+00> : vector<8x256xf32>
    %75 = tpu.matmul %74, %72, %cst_35 {dimension_numbers = #tpu.dot_dimension_numbers<[1], [0], [0], [1], [0, 0, 1, 1], [], []>} : vector<8x4xf32>, vector<4x256xf32>, vector<8x256xf32> -> vector<8x256xf32>
    %76 = arith.addf %68, %75 : vector<8x256xf32>
    %c241_i32 = arith.constant 241 : i32
    %77 = tpu.dynamic_rotate %33 by %c241_i32 dim 1 : vector<4x256xf32>, i32 -> vector<4x256xf32>
    %78 = vector.extract_strided_slice %2 {offsets = [6, 0], sizes = [1, 256], strides = [1, 1]} : vector<9x256xf32> to vector<1x256xf32>
    %79 = vector.broadcast %78 : vector<1x256xf32> to vector<4x256xf32>
    %80 = arith.mulf %77, %79 : vector<4x256xf32>
    %c6 = arith.constant 6 : index
    %c0_36 = arith.constant 0 : index
    %c0_37 = arith.constant 0 : index
    %81 = vector.load %arg5[%c6, %c0_36, %c0_37] : memref<9x8x4xf32, #tpu.memory_space<vmem>>, vector<1x8x4xf32>
    %82 = vector.shape_cast %81 : vector<1x8x4xf32> to vector<8x4xf32>
    %cst_38 = arith.constant dense<0.000000e+00> : vector<8x256xf32>
    %83 = tpu.matmul %82, %80, %cst_38 {dimension_numbers = #tpu.dot_dimension_numbers<[1], [0], [0], [1], [0, 0, 1, 1], [], []>} : vector<8x4xf32>, vector<4x256xf32>, vector<8x256xf32> -> vector<8x256xf32>
    %84 = arith.addf %76, %83 : vector<8x256xf32>
    %c240_i32 = arith.constant 240 : i32
    %85 = tpu.dynamic_rotate %33 by %c240_i32 dim 1 : vector<4x256xf32>, i32 -> vector<4x256xf32>
    %86 = vector.extract_strided_slice %2 {offsets = [7, 0], sizes = [1, 256], strides = [1, 1]} : vector<9x256xf32> to vector<1x256xf32>
    %87 = vector.broadcast %86 : vector<1x256xf32> to vector<4x256xf32>
    %88 = arith.mulf %85, %87 : vector<4x256xf32>
    %c7 = arith.constant 7 : index
    %c0_39 = arith.constant 0 : index
    %c0_40 = arith.constant 0 : index
    %89 = vector.load %arg5[%c7, %c0_39, %c0_40] : memref<9x8x4xf32, #tpu.memory_space<vmem>>, vector<1x8x4xf32>
    %90 = vector.shape_cast %89 : vector<1x8x4xf32> to vector<8x4xf32>
    %cst_41 = arith.constant dense<0.000000e+00> : vector<8x256xf32>
    %91 = tpu.matmul %90, %88, %cst_41 {dimension_numbers = #tpu.dot_dimension_numbers<[1], [0], [0], [1], [0, 0, 1, 1], [], []>} : vector<8x4xf32>, vector<4x256xf32>, vector<8x256xf32> -> vector<8x256xf32>
    %92 = arith.addf %84, %91 : vector<8x256xf32>
    %c239_i32 = arith.constant 239 : i32
    %93 = tpu.dynamic_rotate %33 by %c239_i32 dim 1 : vector<4x256xf32>, i32 -> vector<4x256xf32>
    %94 = vector.extract_strided_slice %2 {offsets = [8, 0], sizes = [1, 256], strides = [1, 1]} : vector<9x256xf32> to vector<1x256xf32>
    %95 = vector.broadcast %94 : vector<1x256xf32> to vector<4x256xf32>
    %96 = arith.mulf %93, %95 : vector<4x256xf32>
    %c8 = arith.constant 8 : index
    %c0_42 = arith.constant 0 : index
    %c0_43 = arith.constant 0 : index
    %97 = vector.load %arg5[%c8, %c0_42, %c0_43] : memref<9x8x4xf32, #tpu.memory_space<vmem>>, vector<1x8x4xf32>
    %98 = vector.shape_cast %97 : vector<1x8x4xf32> to vector<8x4xf32>
    %cst_44 = arith.constant dense<0.000000e+00> : vector<8x256xf32>
    %99 = tpu.matmul %98, %96, %cst_44 {dimension_numbers = #tpu.dot_dimension_numbers<[1], [0], [0], [1], [0, 0, 1, 1], [], []>} : vector<8x4xf32>, vector<4x256xf32>, vector<8x256xf32> -> vector<8x256xf32>
    %100 = arith.addf %92, %99 : vector<8x256xf32>
    %c0_45 = arith.constant 0 : index
    %c0_46 = arith.constant 0 : index
    %101 = vector.load %arg6[%c0_45, %c0_46] : memref<8x1xf32, #tpu.memory_space<vmem>>, vector<8x1xf32>
    %102 = vector.broadcast %101 : vector<8x1xf32> to vector<8x256xf32>
    %103 = arith.addf %100, %102 : vector<8x256xf32>
    %c0_47 = arith.constant 0 : index
    %c0_48 = arith.constant 0 : index
    %c0_49 = arith.constant 0 : index
    %104 = vector.load %arg2[%c0_47, %c0_48, %c0_49] : memref<1x8x1xf32, #tpu.memory_space<vmem>>, vector<1x8x1xf32>
    %105 = vector.shape_cast %104 : vector<1x8x1xf32> to vector<8x1xf32>
    %106 = vector.broadcast %105 : vector<8x1xf32> to vector<8x256xf32>
    %107 = arith.addf %103, %106 : vector<8x256xf32>
    %c0_50 = arith.constant 0 : index
    %c0_51 = arith.constant 0 : index
    %108 = vector.load %arg7[%c0_50, %c0_51] : memref<8x1xf32, #tpu.memory_space<vmem>>, vector<8x1xf32>
    %c0_52 = arith.constant 0 : index
    %c0_53 = arith.constant 0 : index
    %109 = vector.load %arg8[%c0_52, %c0_53] : memref<8x1xf32, #tpu.memory_space<vmem>>, vector<8x1xf32>
    %c0_54 = arith.constant 0 : index
    %c0_55 = arith.constant 0 : index
    %110 = vector.load %arg12[%c0_54, %c0_55] : memref<8x8xf32, #tpu.memory_space<vmem>>, vector<8x8xf32>
    %cst_56 = arith.constant dense<0.000000e+00> : vector<8x256xf32>
    %111 = tpu.matmul %110, %107, %cst_56 {dimension_numbers = #tpu.dot_dimension_numbers<[1], [0], [0], [1], [0, 0, 1, 1], [], []>} : vector<8x8xf32>, vector<8x256xf32>, vector<8x256xf32> -> vector<8x256xf32>
    %cst_57 = arith.constant dense<0.000000e+00> : vector<8xf32>
    %112 = vector.multi_reduction <add>, %111, %cst_57 [1] : vector<8x256xf32> to vector<8xf32>
    %113 = vector.shape_cast %112 : vector<8xf32> to vector<8x1xf32>
    %cst_58 = arith.constant 9.765625E-4 : f32
    %114 = vector.broadcast %cst_58 : f32 to vector<8x1xf32>
    %115 = arith.mulf %113, %114 : vector<8x1xf32>
    %116 = vector.broadcast %115 : vector<8x1xf32> to vector<8x256xf32>
    %117 = arith.subf %107, %116 : vector<8x256xf32>
    %118 = arith.mulf %117, %117 : vector<8x256xf32>
    %cst_59 = arith.constant dense<0.000000e+00> : vector<8x256xf32>
    %119 = tpu.matmul %110, %118, %cst_59 {dimension_numbers = #tpu.dot_dimension_numbers<[1], [0], [0], [1], [0, 0, 1, 1], [], []>} : vector<8x8xf32>, vector<8x256xf32>, vector<8x256xf32> -> vector<8x256xf32>
    %cst_60 = arith.constant dense<0.000000e+00> : vector<8xf32>
    %120 = vector.multi_reduction <add>, %119, %cst_60 [1] : vector<8x256xf32> to vector<8xf32>
    %121 = vector.shape_cast %120 : vector<8xf32> to vector<8x1xf32>
    %cst_61 = arith.constant 9.765625E-4 : f32
    %122 = vector.broadcast %cst_61 : f32 to vector<8x1xf32>
    %123 = arith.mulf %121, %122 : vector<8x1xf32>
    %cst_62 = arith.constant 9.99999974E-6 : f32
    %124 = vector.broadcast %cst_62 : f32 to vector<8x1xf32>
    %125 = arith.addf %123, %124 : vector<8x1xf32>
    %126 = math.rsqrt %125 : vector<8x1xf32>
    %127 = vector.broadcast %126 : vector<8x1xf32> to vector<8x256xf32>
    %128 = arith.mulf %117, %127 : vector<8x256xf32>
    %129 = vector.broadcast %108 : vector<8x1xf32> to vector<8x256xf32>
    %130 = arith.mulf %128, %129 : vector<8x256xf32>
    %131 = vector.broadcast %109 : vector<8x1xf32> to vector<8x256xf32>
    %132 = arith.addf %130, %131 : vector<8x256xf32>
    %133 = arith.negf %132 : vector<8x256xf32>
    %134 = math.exp %133 : vector<8x256xf32>
    %cst_63 = arith.constant 1.000000e+00 : f32
    %135 = vector.broadcast %cst_63 : f32 to vector<8x256xf32>
    %136 = arith.addf %135, %134 : vector<8x256xf32>
    %137 = arith.divf %135, %136 : vector<8x256xf32>
    %138 = arith.mulf %132, %137 : vector<8x256xf32>
    %c17_i32_64 = arith.constant 17 : i32
    %139 = tpu.dynamic_rotate %138 by %c17_i32_64 dim 1 : vector<8x256xf32>, i32 -> vector<8x256xf32>
    %140 = vector.extract_strided_slice %2 {offsets = [0, 0], sizes = [1, 256], strides = [1, 1]} : vector<9x256xf32> to vector<1x256xf32>
    %141 = vector.broadcast %140 : vector<1x256xf32> to vector<8x256xf32>
    %142 = arith.mulf %139, %141 : vector<8x256xf32>
    %c0_65 = arith.constant 0 : index
    %c0_66 = arith.constant 0 : index
    %c0_67 = arith.constant 0 : index
    %143 = vector.load %arg9[%c0_65, %c0_66, %c0_67] : memref<9x8x8xf32, #tpu.memory_space<vmem>>, vector<1x8x8xf32>
    %144 = vector.shape_cast %143 : vector<1x8x8xf32> to vector<8x8xf32>
    %cst_68 = arith.constant dense<0.000000e+00> : vector<8x256xf32>
    %145 = tpu.matmul %144, %142, %cst_68 {dimension_numbers = #tpu.dot_dimension_numbers<[1], [0], [0], [1], [0, 0, 1, 1], [], []>} : vector<8x8xf32>, vector<8x256xf32>, vector<8x256xf32> -> vector<8x256xf32>
    %c16_i32_69 = arith.constant 16 : i32
    %146 = tpu.dynamic_rotate %138 by %c16_i32_69 dim 1 : vector<8x256xf32>, i32 -> vector<8x256xf32>
    %147 = vector.extract_strided_slice %2 {offsets = [1, 0], sizes = [1, 256], strides = [1, 1]} : vector<9x256xf32> to vector<1x256xf32>
    %148 = vector.broadcast %147 : vector<1x256xf32> to vector<8x256xf32>
    %149 = arith.mulf %146, %148 : vector<8x256xf32>
    %c1_70 = arith.constant 1 : index
    %c0_71 = arith.constant 0 : index
    %c0_72 = arith.constant 0 : index
    %150 = vector.load %arg9[%c1_70, %c0_71, %c0_72] : memref<9x8x8xf32, #tpu.memory_space<vmem>>, vector<1x8x8xf32>
    %151 = vector.shape_cast %150 : vector<1x8x8xf32> to vector<8x8xf32>
    %cst_73 = arith.constant dense<0.000000e+00> : vector<8x256xf32>
    %152 = tpu.matmul %151, %149, %cst_73 {dimension_numbers = #tpu.dot_dimension_numbers<[1], [0], [0], [1], [0, 0, 1, 1], [], []>} : vector<8x8xf32>, vector<8x256xf32>, vector<8x256xf32> -> vector<8x256xf32>
    %153 = arith.addf %145, %152 : vector<8x256xf32>
    %c15_i32_74 = arith.constant 15 : i32
    %154 = tpu.dynamic_rotate %138 by %c15_i32_74 dim 1 : vector<8x256xf32>, i32 -> vector<8x256xf32>
    %155 = vector.extract_strided_slice %2 {offsets = [2, 0], sizes = [1, 256], strides = [1, 1]} : vector<9x256xf32> to vector<1x256xf32>
    %156 = vector.broadcast %155 : vector<1x256xf32> to vector<8x256xf32>
    %157 = arith.mulf %154, %156 : vector<8x256xf32>
    %c2_75 = arith.constant 2 : index
    %c0_76 = arith.constant 0 : index
    %c0_77 = arith.constant 0 : index
    %158 = vector.load %arg9[%c2_75, %c0_76, %c0_77] : memref<9x8x8xf32, #tpu.memory_space<vmem>>, vector<1x8x8xf32>
    %159 = vector.shape_cast %158 : vector<1x8x8xf32> to vector<8x8xf32>
    %cst_78 = arith.constant dense<0.000000e+00> : vector<8x256xf32>
    %160 = tpu.matmul %159, %157, %cst_78 {dimension_numbers = #tpu.dot_dimension_numbers<[1], [0], [0], [1], [0, 0, 1, 1], [], []>} : vector<8x8xf32>, vector<8x256xf32>, vector<8x256xf32> -> vector<8x256xf32>
    %161 = arith.addf %153, %160 : vector<8x256xf32>
    %c1_i32_79 = arith.constant 1 : i32
    %162 = tpu.dynamic_rotate %138 by %c1_i32_79 dim 1 : vector<8x256xf32>, i32 -> vector<8x256xf32>
    %163 = vector.extract_strided_slice %2 {offsets = [3, 0], sizes = [1, 256], strides = [1, 1]} : vector<9x256xf32> to vector<1x256xf32>
    %164 = vector.broadcast %163 : vector<1x256xf32> to vector<8x256xf32>
    %165 = arith.mulf %162, %164 : vector<8x256xf32>
    %c3_80 = arith.constant 3 : index
    %c0_81 = arith.constant 0 : index
    %c0_82 = arith.constant 0 : index
    %166 = vector.load %arg9[%c3_80, %c0_81, %c0_82] : memref<9x8x8xf32, #tpu.memory_space<vmem>>, vector<1x8x8xf32>
    %167 = vector.shape_cast %166 : vector<1x8x8xf32> to vector<8x8xf32>
    %cst_83 = arith.constant dense<0.000000e+00> : vector<8x256xf32>
    %168 = tpu.matmul %167, %165, %cst_83 {dimension_numbers = #tpu.dot_dimension_numbers<[1], [0], [0], [1], [0, 0, 1, 1], [], []>} : vector<8x8xf32>, vector<8x256xf32>, vector<8x256xf32> -> vector<8x256xf32>
    %169 = arith.addf %161, %168 : vector<8x256xf32>
    %c4_84 = arith.constant 4 : index
    %c0_85 = arith.constant 0 : index
    %c0_86 = arith.constant 0 : index
    %170 = vector.load %arg9[%c4_84, %c0_85, %c0_86] : memref<9x8x8xf32, #tpu.memory_space<vmem>>, vector<1x8x8xf32>
    %171 = vector.shape_cast %170 : vector<1x8x8xf32> to vector<8x8xf32>
    %cst_87 = arith.constant dense<0.000000e+00> : vector<8x256xf32>
    %172 = tpu.matmul %171, %138, %cst_87 {dimension_numbers = #tpu.dot_dimension_numbers<[1], [0], [0], [1], [0, 0, 1, 1], [], []>} : vector<8x8xf32>, vector<8x256xf32>, vector<8x256xf32> -> vector<8x256xf32>
    %173 = arith.addf %169, %172 : vector<8x256xf32>
    %c255_i32_88 = arith.constant 255 : i32
    %174 = tpu.dynamic_rotate %138 by %c255_i32_88 dim 1 : vector<8x256xf32>, i32 -> vector<8x256xf32>
    %175 = vector.extract_strided_slice %2 {offsets = [5, 0], sizes = [1, 256], strides = [1, 1]} : vector<9x256xf32> to vector<1x256xf32>
    %176 = vector.broadcast %175 : vector<1x256xf32> to vector<8x256xf32>
    %177 = arith.mulf %174, %176 : vector<8x256xf32>
    %c5_89 = arith.constant 5 : index
    %c0_90 = arith.constant 0 : index
    %c0_91 = arith.constant 0 : index
    %178 = vector.load %arg9[%c5_89, %c0_90, %c0_91] : memref<9x8x8xf32, #tpu.memory_space<vmem>>, vector<1x8x8xf32>
    %179 = vector.shape_cast %178 : vector<1x8x8xf32> to vector<8x8xf32>
    %cst_92 = arith.constant dense<0.000000e+00> : vector<8x256xf32>
    %180 = tpu.matmul %179, %177, %cst_92 {dimension_numbers = #tpu.dot_dimension_numbers<[1], [0], [0], [1], [0, 0, 1, 1], [], []>} : vector<8x8xf32>, vector<8x256xf32>, vector<8x256xf32> -> vector<8x256xf32>
    %181 = arith.addf %173, %180 : vector<8x256xf32>
    %c241_i32_93 = arith.constant 241 : i32
    %182 = tpu.dynamic_rotate %138 by %c241_i32_93 dim 1 : vector<8x256xf32>, i32 -> vector<8x256xf32>
    %183 = vector.extract_strided_slice %2 {offsets = [6, 0], sizes = [1, 256], strides = [1, 1]} : vector<9x256xf32> to vector<1x256xf32>
    %184 = vector.broadcast %183 : vector<1x256xf32> to vector<8x256xf32>
    %185 = arith.mulf %182, %184 : vector<8x256xf32>
    %c6_94 = arith.constant 6 : index
    %c0_95 = arith.constant 0 : index
    %c0_96 = arith.constant 0 : index
    %186 = vector.load %arg9[%c6_94, %c0_95, %c0_96] : memref<9x8x8xf32, #tpu.memory_space<vmem>>, vector<1x8x8xf32>
    %187 = vector.shape_cast %186 : vector<1x8x8xf32> to vector<8x8xf32>
    %cst_97 = arith.constant dense<0.000000e+00> : vector<8x256xf32>
    %188 = tpu.matmul %187, %185, %cst_97 {dimension_numbers = #tpu.dot_dimension_numbers<[1], [0], [0], [1], [0, 0, 1, 1], [], []>} : vector<8x8xf32>, vector<8x256xf32>, vector<8x256xf32> -> vector<8x256xf32>
    %189 = arith.addf %181, %188 : vector<8x256xf32>
    %c240_i32_98 = arith.constant 240 : i32
    %190 = tpu.dynamic_rotate %138 by %c240_i32_98 dim 1 : vector<8x256xf32>, i32 -> vector<8x256xf32>
    %191 = vector.extract_strided_slice %2 {offsets = [7, 0], sizes = [1, 256], strides = [1, 1]} : vector<9x256xf32> to vector<1x256xf32>
    %192 = vector.broadcast %191 : vector<1x256xf32> to vector<8x256xf32>
    %193 = arith.mulf %190, %192 : vector<8x256xf32>
    %c7_99 = arith.constant 7 : index
    %c0_100 = arith.constant 0 : index
    %c0_101 = arith.constant 0 : index
    %194 = vector.load %arg9[%c7_99, %c0_100, %c0_101] : memref<9x8x8xf32, #tpu.memory_space<vmem>>, vector<1x8x8xf32>
    %195 = vector.shape_cast %194 : vector<1x8x8xf32> to vector<8x8xf32>
    %cst_102 = arith.constant dense<0.000000e+00> : vector<8x256xf32>
    %196 = tpu.matmul %195, %193, %cst_102 {dimension_numbers = #tpu.dot_dimension_numbers<[1], [0], [0], [1], [0, 0, 1, 1], [], []>} : vector<8x8xf32>, vector<8x256xf32>, vector<8x256xf32> -> vector<8x256xf32>
    %197 = arith.addf %189, %196 : vector<8x256xf32>
    %c239_i32_103 = arith.constant 239 : i32
    %198 = tpu.dynamic_rotate %138 by %c239_i32_103 dim 1 : vector<8x256xf32>, i32 -> vector<8x256xf32>
    %199 = vector.extract_strided_slice %2 {offsets = [8, 0], sizes = [1, 256], strides = [1, 1]} : vector<9x256xf32> to vector<1x256xf32>
    %200 = vector.broadcast %199 : vector<1x256xf32> to vector<8x256xf32>
    %201 = arith.mulf %198, %200 : vector<8x256xf32>
    %c8_104 = arith.constant 8 : index
    %c0_105 = arith.constant 0 : index
    %c0_106 = arith.constant 0 : index
    %202 = vector.load %arg9[%c8_104, %c0_105, %c0_106] : memref<9x8x8xf32, #tpu.memory_space<vmem>>, vector<1x8x8xf32>
    %203 = vector.shape_cast %202 : vector<1x8x8xf32> to vector<8x8xf32>
    %cst_107 = arith.constant dense<0.000000e+00> : vector<8x256xf32>
    %204 = tpu.matmul %203, %201, %cst_107 {dimension_numbers = #tpu.dot_dimension_numbers<[1], [0], [0], [1], [0, 0, 1, 1], [], []>} : vector<8x8xf32>, vector<8x256xf32>, vector<8x256xf32> -> vector<8x256xf32>
    %205 = arith.addf %197, %204 : vector<8x256xf32>
    %c0_108 = arith.constant 0 : index
    %c0_109 = arith.constant 0 : index
    %206 = vector.load %arg10[%c0_108, %c0_109] : memref<8x1xf32, #tpu.memory_space<vmem>>, vector<8x1xf32>
    %207 = vector.broadcast %206 : vector<8x1xf32> to vector<8x256xf32>
    %208 = arith.addf %205, %207 : vector<8x256xf32>
    %c0_110 = arith.constant 0 : index
    %c0_111 = arith.constant 0 : index
    %209 = vector.load %arg14[%c0_110, %c0_111] : memref<8x4xf32, #tpu.memory_space<vmem>>, vector<8x4xf32>
    %cst_112 = arith.constant dense<0.000000e+00> : vector<8x256xf32>
    %210 = tpu.matmul %209, %1, %cst_112 {dimension_numbers = #tpu.dot_dimension_numbers<[1], [0], [0], [1], [0, 0, 1, 1], [], []>} : vector<8x4xf32>, vector<4x256xf32>, vector<8x256xf32> -> vector<8x256xf32>
    %c0_113 = arith.constant 0 : index
    %c0_114 = arith.constant 0 : index
    %211 = vector.load %arg15[%c0_113, %c0_114] : memref<8x1xf32, #tpu.memory_space<vmem>>, vector<8x1xf32>
    %212 = vector.broadcast %211 : vector<8x1xf32> to vector<8x256xf32>
    %213 = arith.addf %210, %212 : vector<8x256xf32>
    %214 = arith.addf %208, %213 : vector<8x256xf32>
    %c0_115 = arith.constant 0 : index
    %c0_116 = arith.constant 0 : index
    %c0_117 = arith.constant 0 : index
    %215 = vector.load %arg16[%c0_115, %c0_116, %c0_117] : memref<1x8x256xf32, #tpu.memory_space<vmem>>, vector<1x8x256xf32>
    %216 = vector.shape_cast %215 : vector<1x8x256xf32> to vector<8x256xf32>
    %217 = vector.shape_cast %214 : vector<8x256xf32> to vector<1x8x256xf32>
    tpu.vector_store %arg16[%c0_115, %c0_116, %c0_117], %217 {strides = array<i32>} : memref<1x8x256xf32, #tpu.memory_space<vmem>>, vector<1x8x256xf32>,
    return
  }
  func.func @transform_0(%arg0: i32) -> (i32, i32, i32) {
    %c0_i32 = arith.constant 0 : i32
    %c0_i32_0 = arith.constant 0 : i32
    %c0_i32_1 = arith.constant 0 : i32
    return %arg0, %c0_i32, %c0_i32_0 : i32, i32, i32
  }
  func.func @transform_1(%arg0: i32) -> (i32, i32, i32) {
    %c0_i32 = arith.constant 0 : i32
    %c0_i32_0 = arith.constant 0 : i32
    %c0_i32_1 = arith.constant 0 : i32
    return %arg0, %c0_i32, %c0_i32_0 : i32, i32, i32
  }
  func.func @transform_2(%arg0: i32) -> (i32, i32) {
    %c0_i32 = arith.constant 0 : i32
    %c0_i32_0 = arith.constant 0 : i32
    %c0_i32_1 = arith.constant 0 : i32
    return %c0_i32, %c0_i32_0 : i32, i32
  }
  func.func @transform_3(%arg0: i32) -> (i32, i32) {
    %c0_i32 = arith.constant 0 : i32
    %c0_i32_0 = arith.constant 0 : i32
    %c0_i32_1 = arith.constant 0 : i32
    return %c0_i32, %c0_i32_0 : i32, i32
  }
  func.func @transform_4(%arg0: i32) -> (i32, i32, i32) {
    %c0_i32 = arith.constant 0 : i32
    %c0_i32_0 = arith.constant 0 : i32
    %c0_i32_1 = arith.constant 0 : i32
    %c0_i32_2 = arith.constant 0 : i32
    return %c0_i32, %c0_i32_0, %c0_i32_1 : i32, i32, i32
  }
  func.func @transform_5(%arg0: i32) -> (i32, i32) {
    %c0_i32 = arith.constant 0 : i32
    %c0_i32_0 = arith.constant 0 : i32
    %c0_i32_1 = arith.constant 0 : i32
    return %c0_i32, %c0_i32_0 : i32, i32
  }
  func.func @transform_6(%arg0: i32) -> (i32, i32) {
    %c0_i32 = arith.constant 0 : i32
    %c0_i32_0 = arith.constant 0 : i32
    %c0_i32_1 = arith.constant 0 : i32
    return %c0_i32, %c0_i32_0 : i32, i32
  }
  func.func @transform_7(%arg0: i32) -> (i32, i32) {
    %c0_i32 = arith.constant 0 : i32
    %c0_i32_0 = arith.constant 0 : i32
    %c0_i32_1 = arith.constant 0 : i32
    return %c0_i32, %c0_i32_0 : i32, i32
  }
  func.func @transform_8(%arg0: i32) -> (i32, i32, i32) {
    %c0_i32 = arith.constant 0 : i32
    %c0_i32_0 = arith.constant 0 : i32
    %c0_i32_1 = arith.constant 0 : i32
    %c0_i32_2 = arith.constant 0 : i32
    return %c0_i32, %c0_i32_0, %c0_i32_1 : i32, i32, i32
  }
  func.func @transform_9(%arg0: i32) -> (i32, i32) {
    %c0_i32 = arith.constant 0 : i32
    %c0_i32_0 = arith.constant 0 : i32
    %c0_i32_1 = arith.constant 0 : i32
    return %c0_i32, %c0_i32_0 : i32, i32
  }
  func.func @transform_10(%arg0: i32) -> (i32, i32) {
    %c0_i32 = arith.constant 0 : i32
    %c0_i32_0 = arith.constant 0 : i32
    %c0_i32_1 = arith.constant 0 : i32
    return %c0_i32, %c0_i32_0 : i32, i32
  }
  func.func @transform_11(%arg0: i32) -> (i32, i32) {
    %c0_i32 = arith.constant 0 : i32
    %c0_i32_0 = arith.constant 0 : i32
    %c0_i32_1 = arith.constant 0 : i32
    return %c0_i32, %c0_i32_0 : i32, i32
  }
  func.func @transform_12(%arg0: i32) -> (i32, i32) {
    %c0_i32 = arith.constant 0 : i32
    %c0_i32_0 = arith.constant 0 : i32
    %c0_i32_1 = arith.constant 0 : i32
    return %c0_i32, %c0_i32_0 : i32, i32
  }
  func.func @transform_13(%arg0: i32) -> (i32, i32) {
    %c0_i32 = arith.constant 0 : i32
    %c0_i32_0 = arith.constant 0 : i32
    %c0_i32_1 = arith.constant 0 : i32
    return %c0_i32, %c0_i32_0 : i32, i32
  }
  func.func @transform_14(%arg0: i32) -> (i32, i32) {
    %c0_i32 = arith.constant 0 : i32
    %c0_i32_0 = arith.constant 0 : i32
    %c0_i32_1 = arith.constant 0 : i32
    return %c0_i32, %c0_i32_0 : i32, i32
  }
  func.func @transform_15(%arg0: i32) -> (i32, i32, i32) {
    %c0_i32 = arith.constant 0 : i32
    %c0_i32_0 = arith.constant 0 : i32
    %c0_i32_1 = arith.constant 0 : i32
    return %arg0, %c0_i32, %c0_i32_0 : i32, i32, i32
  }
}

module attributes {stable_mosaic.version = 11 : i64} {
  func.func @_resnet_block_kernel(%arg0: i32, %arg1: memref<1x8x256xf32, #tpu.memory_space<vmem>>, %arg2: memref<1x8x1xf32, #tpu.memory_space<vmem>>, %arg3: memref<8x1xf32, #tpu.memory_space<vmem>>, %arg4: memref<8x1xf32, #tpu.memory_space<vmem>>, %arg5: memref<9x8x8xf32, #tpu.memory_space<vmem>>, %arg6: memref<8x1xf32, #tpu.memory_space<vmem>>, %arg7: memref<8x1xf32, #tpu.memory_space<vmem>>, %arg8: memref<8x1xf32, #tpu.memory_space<vmem>>, %arg9: memref<9x8x8xf32, #tpu.memory_space<vmem>>, %arg10: memref<8x1xf32, #tpu.memory_space<vmem>>, %arg11: memref<8x8xf32, #tpu.memory_space<vmem>>, %arg12: memref<8x8xf32, #tpu.memory_space<vmem>>, %arg13: memref<9x256xf32, #tpu.memory_space<vmem>>, %arg14: memref<4x8x8xf32, #tpu.memory_space<vmem>>, %arg15: memref<8x1xf32, #tpu.memory_space<vmem>>, %arg16: memref<10x256xf32, #tpu.memory_space<vmem>>, %arg17: memref<1x8x256xf32, #tpu.memory_space<vmem>>, %arg18: memref<1x8x64xf32, #tpu.memory_space<vmem>>) attributes {dimension_semantics = [#tpu.dimension_semantics<parallel>], iteration_bounds = array<i64: 2>, scalar_prefetch = 0 : i64, scratch_operands = 0 : i64, tpu.core_type = #tpu.core_type<tc>, window_params = [{transform_indices = @transform_0, window_bounds = array<i64: 1, 8, 256>}, {transform_indices = @transform_1, window_bounds = array<i64: 1, 8, 1>}, {pipeline_mode = #tpu.pipeline_mode<synchronous>, transform_indices = @transform_2, window_bounds = array<i64: 8, 1>}, {pipeline_mode = #tpu.pipeline_mode<synchronous>, transform_indices = @transform_3, window_bounds = array<i64: 8, 1>}, {pipeline_mode = #tpu.pipeline_mode<synchronous>, transform_indices = @transform_4, window_bounds = array<i64: 9, 8, 8>}, {pipeline_mode = #tpu.pipeline_mode<synchronous>, transform_indices = @transform_5, window_bounds = array<i64: 8, 1>}, {pipeline_mode = #tpu.pipeline_mode<synchronous>, transform_indices = @transform_6, window_bounds = array<i64: 8, 1>}, {pipeline_mode = #tpu.pipeline_mode<synchronous>, transform_indices = @transform_7, window_bounds = array<i64: 8, 1>}, {pipeline_mode = #tpu.pipeline_mode<synchronous>, transform_indices = @transform_8, window_bounds = array<i64: 9, 8, 8>}, {pipeline_mode = #tpu.pipeline_mode<synchronous>, transform_indices = @transform_9, window_bounds = array<i64: 8, 1>}, {pipeline_mode = #tpu.pipeline_mode<synchronous>, transform_indices = @transform_10, window_bounds = array<i64: 8, 8>}, {pipeline_mode = #tpu.pipeline_mode<synchronous>, transform_indices = @transform_11, window_bounds = array<i64: 8, 8>}, {pipeline_mode = #tpu.pipeline_mode<synchronous>, transform_indices = @transform_12, window_bounds = array<i64: 9, 256>}, {pipeline_mode = #tpu.pipeline_mode<synchronous>, transform_indices = @transform_13, window_bounds = array<i64: 4, 8, 8>}, {pipeline_mode = #tpu.pipeline_mode<synchronous>, transform_indices = @transform_14, window_bounds = array<i64: 8, 1>}, {pipeline_mode = #tpu.pipeline_mode<synchronous>, transform_indices = @transform_15, window_bounds = array<i64: 10, 256>}, {transform_indices = @transform_16, window_bounds = array<i64: 1, 8, 256>}, {transform_indices = @transform_17, window_bounds = array<i64: 1, 8, 64>}]} {
    %c0 = arith.constant 0 : index
    %c0_0 = arith.constant 0 : index
    %c0_1 = arith.constant 0 : index
    %0 = vector.load %arg1[%c0, %c0_0, %c0_1] : memref<1x8x256xf32, #tpu.memory_space<vmem>>, vector<1x8x256xf32>
    %1 = vector.shape_cast %0 : vector<1x8x256xf32> to vector<8x256xf32>
    %c0_2 = arith.constant 0 : index
    %c0_3 = arith.constant 0 : index
    %2 = vector.load %arg13[%c0_2, %c0_3] : memref<9x256xf32, #tpu.memory_space<vmem>>, vector<9x256xf32>
    %c0_4 = arith.constant 0 : index
    %c0_5 = arith.constant 0 : index
    %3 = vector.load %arg3[%c0_4, %c0_5] : memref<8x1xf32, #tpu.memory_space<vmem>>, vector<8x1xf32>
    %c0_6 = arith.constant 0 : index
    %c0_7 = arith.constant 0 : index
    %4 = vector.load %arg4[%c0_6, %c0_7] : memref<8x1xf32, #tpu.memory_space<vmem>>, vector<8x1xf32>
    %c0_8 = arith.constant 0 : index
    %c0_9 = arith.constant 0 : index
    %5 = vector.load %arg11[%c0_8, %c0_9] : memref<8x8xf32, #tpu.memory_space<vmem>>, vector<8x8xf32>
    %cst = arith.constant dense<0.000000e+00> : vector<8x256xf32>
    %6 = tpu.matmul %5, %1, %cst {dimension_numbers = #tpu.dot_dimension_numbers<[1], [0], [0], [1], [0, 0, 1, 1], [], []>} : vector<8x8xf32>, vector<8x256xf32>, vector<8x256xf32> -> vector<8x256xf32>
    %cst_10 = arith.constant dense<0.000000e+00> : vector<8xf32>
    %7 = vector.multi_reduction <add>, %6, %cst_10 [1] : vector<8x256xf32> to vector<8xf32>
    %8 = vector.shape_cast %7 : vector<8xf32> to vector<8x1xf32>
    %cst_11 = arith.constant 9.765625E-4 : f32
    %9 = vector.broadcast %cst_11 : f32 to vector<8x1xf32>
    %10 = arith.mulf %8, %9 : vector<8x1xf32>
    %11 = vector.broadcast %10 : vector<8x1xf32> to vector<8x256xf32>
    %12 = arith.subf %1, %11 : vector<8x256xf32>
    %13 = arith.mulf %12, %12 : vector<8x256xf32>
    %cst_12 = arith.constant dense<0.000000e+00> : vector<8x256xf32>
    %14 = tpu.matmul %5, %13, %cst_12 {dimension_numbers = #tpu.dot_dimension_numbers<[1], [0], [0], [1], [0, 0, 1, 1], [], []>} : vector<8x8xf32>, vector<8x256xf32>, vector<8x256xf32> -> vector<8x256xf32>
    %cst_13 = arith.constant dense<0.000000e+00> : vector<8xf32>
    %15 = vector.multi_reduction <add>, %14, %cst_13 [1] : vector<8x256xf32> to vector<8xf32>
    %16 = vector.shape_cast %15 : vector<8xf32> to vector<8x1xf32>
    %cst_14 = arith.constant 9.765625E-4 : f32
    %17 = vector.broadcast %cst_14 : f32 to vector<8x1xf32>
    %18 = arith.mulf %16, %17 : vector<8x1xf32>
    %cst_15 = arith.constant 9.99999974E-6 : f32
    %19 = vector.broadcast %cst_15 : f32 to vector<8x1xf32>
    %20 = arith.addf %18, %19 : vector<8x1xf32>
    %21 = math.rsqrt %20 : vector<8x1xf32>
    %22 = vector.broadcast %21 : vector<8x1xf32> to vector<8x256xf32>
    %23 = arith.mulf %12, %22 : vector<8x256xf32>
    %24 = vector.broadcast %3 : vector<8x1xf32> to vector<8x256xf32>
    %25 = arith.mulf %23, %24 : vector<8x256xf32>
    %26 = vector.broadcast %4 : vector<8x1xf32> to vector<8x256xf32>
    %27 = arith.addf %25, %26 : vector<8x256xf32>
    %28 = arith.negf %27 : vector<8x256xf32>
    %29 = math.exp %28 : vector<8x256xf32>
    %cst_16 = arith.constant 1.000000e+00 : f32
    %30 = vector.broadcast %cst_16 : f32 to vector<8x256xf32>
    %31 = arith.addf %30, %29 : vector<8x256xf32>
    %32 = arith.divf %30, %31 : vector<8x256xf32>
    %33 = arith.mulf %27, %32 : vector<8x256xf32>
    %c17_i32 = arith.constant 17 : i32
    %34 = tpu.dynamic_rotate %33 by %c17_i32 dim 1 : vector<8x256xf32>, i32 -> vector<8x256xf32>
    %35 = vector.extract_strided_slice %2 {offsets = [0, 0], sizes = [1, 256], strides = [1, 1]} : vector<9x256xf32> to vector<1x256xf32>
    %36 = vector.broadcast %35 : vector<1x256xf32> to vector<8x256xf32>
    %37 = arith.mulf %34, %36 : vector<8x256xf32>
    %c0_17 = arith.constant 0 : index
    %c0_18 = arith.constant 0 : index
    %c0_19 = arith.constant 0 : index
    %38 = vector.load %arg5[%c0_17, %c0_18, %c0_19] : memref<9x8x8xf32, #tpu.memory_space<vmem>>, vector<1x8x8xf32>
    %39 = vector.shape_cast %38 : vector<1x8x8xf32> to vector<8x8xf32>
    %cst_20 = arith.constant dense<0.000000e+00> : vector<8x256xf32>
    %40 = tpu.matmul %39, %37, %cst_20 {dimension_numbers = #tpu.dot_dimension_numbers<[1], [0], [0], [1], [0, 0, 1, 1], [], []>} : vector<8x8xf32>, vector<8x256xf32>, vector<8x256xf32> -> vector<8x256xf32>
    %c16_i32 = arith.constant 16 : i32
    %41 = tpu.dynamic_rotate %33 by %c16_i32 dim 1 : vector<8x256xf32>, i32 -> vector<8x256xf32>
    %42 = vector.extract_strided_slice %2 {offsets = [1, 0], sizes = [1, 256], strides = [1, 1]} : vector<9x256xf32> to vector<1x256xf32>
    %43 = vector.broadcast %42 : vector<1x256xf32> to vector<8x256xf32>
    %44 = arith.mulf %41, %43 : vector<8x256xf32>
    %c1 = arith.constant 1 : index
    %c0_21 = arith.constant 0 : index
    %c0_22 = arith.constant 0 : index
    %45 = vector.load %arg5[%c1, %c0_21, %c0_22] : memref<9x8x8xf32, #tpu.memory_space<vmem>>, vector<1x8x8xf32>
    %46 = vector.shape_cast %45 : vector<1x8x8xf32> to vector<8x8xf32>
    %cst_23 = arith.constant dense<0.000000e+00> : vector<8x256xf32>
    %47 = tpu.matmul %46, %44, %cst_23 {dimension_numbers = #tpu.dot_dimension_numbers<[1], [0], [0], [1], [0, 0, 1, 1], [], []>} : vector<8x8xf32>, vector<8x256xf32>, vector<8x256xf32> -> vector<8x256xf32>
    %48 = arith.addf %40, %47 : vector<8x256xf32>
    %c15_i32 = arith.constant 15 : i32
    %49 = tpu.dynamic_rotate %33 by %c15_i32 dim 1 : vector<8x256xf32>, i32 -> vector<8x256xf32>
    %50 = vector.extract_strided_slice %2 {offsets = [2, 0], sizes = [1, 256], strides = [1, 1]} : vector<9x256xf32> to vector<1x256xf32>
    %51 = vector.broadcast %50 : vector<1x256xf32> to vector<8x256xf32>
    %52 = arith.mulf %49, %51 : vector<8x256xf32>
    %c2 = arith.constant 2 : index
    %c0_24 = arith.constant 0 : index
    %c0_25 = arith.constant 0 : index
    %53 = vector.load %arg5[%c2, %c0_24, %c0_25] : memref<9x8x8xf32, #tpu.memory_space<vmem>>, vector<1x8x8xf32>
    %54 = vector.shape_cast %53 : vector<1x8x8xf32> to vector<8x8xf32>
    %cst_26 = arith.constant dense<0.000000e+00> : vector<8x256xf32>
    %55 = tpu.matmul %54, %52, %cst_26 {dimension_numbers = #tpu.dot_dimension_numbers<[1], [0], [0], [1], [0, 0, 1, 1], [], []>} : vector<8x8xf32>, vector<8x256xf32>, vector<8x256xf32> -> vector<8x256xf32>
    %56 = arith.addf %48, %55 : vector<8x256xf32>
    %c1_i32 = arith.constant 1 : i32
    %57 = tpu.dynamic_rotate %33 by %c1_i32 dim 1 : vector<8x256xf32>, i32 -> vector<8x256xf32>
    %58 = vector.extract_strided_slice %2 {offsets = [3, 0], sizes = [1, 256], strides = [1, 1]} : vector<9x256xf32> to vector<1x256xf32>
    %59 = vector.broadcast %58 : vector<1x256xf32> to vector<8x256xf32>
    %60 = arith.mulf %57, %59 : vector<8x256xf32>
    %c3 = arith.constant 3 : index
    %c0_27 = arith.constant 0 : index
    %c0_28 = arith.constant 0 : index
    %61 = vector.load %arg5[%c3, %c0_27, %c0_28] : memref<9x8x8xf32, #tpu.memory_space<vmem>>, vector<1x8x8xf32>
    %62 = vector.shape_cast %61 : vector<1x8x8xf32> to vector<8x8xf32>
    %cst_29 = arith.constant dense<0.000000e+00> : vector<8x256xf32>
    %63 = tpu.matmul %62, %60, %cst_29 {dimension_numbers = #tpu.dot_dimension_numbers<[1], [0], [0], [1], [0, 0, 1, 1], [], []>} : vector<8x8xf32>, vector<8x256xf32>, vector<8x256xf32> -> vector<8x256xf32>
    %64 = arith.addf %56, %63 : vector<8x256xf32>
    %c4 = arith.constant 4 : index
    %c0_30 = arith.constant 0 : index
    %c0_31 = arith.constant 0 : index
    %65 = vector.load %arg5[%c4, %c0_30, %c0_31] : memref<9x8x8xf32, #tpu.memory_space<vmem>>, vector<1x8x8xf32>
    %66 = vector.shape_cast %65 : vector<1x8x8xf32> to vector<8x8xf32>
    %cst_32 = arith.constant dense<0.000000e+00> : vector<8x256xf32>
    %67 = tpu.matmul %66, %33, %cst_32 {dimension_numbers = #tpu.dot_dimension_numbers<[1], [0], [0], [1], [0, 0, 1, 1], [], []>} : vector<8x8xf32>, vector<8x256xf32>, vector<8x256xf32> -> vector<8x256xf32>
    %68 = arith.addf %64, %67 : vector<8x256xf32>
    %c255_i32 = arith.constant 255 : i32
    %69 = tpu.dynamic_rotate %33 by %c255_i32 dim 1 : vector<8x256xf32>, i32 -> vector<8x256xf32>
    %70 = vector.extract_strided_slice %2 {offsets = [5, 0], sizes = [1, 256], strides = [1, 1]} : vector<9x256xf32> to vector<1x256xf32>
    %71 = vector.broadcast %70 : vector<1x256xf32> to vector<8x256xf32>
    %72 = arith.mulf %69, %71 : vector<8x256xf32>
    %c5 = arith.constant 5 : index
    %c0_33 = arith.constant 0 : index
    %c0_34 = arith.constant 0 : index
    %73 = vector.load %arg5[%c5, %c0_33, %c0_34] : memref<9x8x8xf32, #tpu.memory_space<vmem>>, vector<1x8x8xf32>
    %74 = vector.shape_cast %73 : vector<1x8x8xf32> to vector<8x8xf32>
    %cst_35 = arith.constant dense<0.000000e+00> : vector<8x256xf32>
    %75 = tpu.matmul %74, %72, %cst_35 {dimension_numbers = #tpu.dot_dimension_numbers<[1], [0], [0], [1], [0, 0, 1, 1], [], []>} : vector<8x8xf32>, vector<8x256xf32>, vector<8x256xf32> -> vector<8x256xf32>
    %76 = arith.addf %68, %75 : vector<8x256xf32>
    %c241_i32 = arith.constant 241 : i32
    %77 = tpu.dynamic_rotate %33 by %c241_i32 dim 1 : vector<8x256xf32>, i32 -> vector<8x256xf32>
    %78 = vector.extract_strided_slice %2 {offsets = [6, 0], sizes = [1, 256], strides = [1, 1]} : vector<9x256xf32> to vector<1x256xf32>
    %79 = vector.broadcast %78 : vector<1x256xf32> to vector<8x256xf32>
    %80 = arith.mulf %77, %79 : vector<8x256xf32>
    %c6 = arith.constant 6 : index
    %c0_36 = arith.constant 0 : index
    %c0_37 = arith.constant 0 : index
    %81 = vector.load %arg5[%c6, %c0_36, %c0_37] : memref<9x8x8xf32, #tpu.memory_space<vmem>>, vector<1x8x8xf32>
    %82 = vector.shape_cast %81 : vector<1x8x8xf32> to vector<8x8xf32>
    %cst_38 = arith.constant dense<0.000000e+00> : vector<8x256xf32>
    %83 = tpu.matmul %82, %80, %cst_38 {dimension_numbers = #tpu.dot_dimension_numbers<[1], [0], [0], [1], [0, 0, 1, 1], [], []>} : vector<8x8xf32>, vector<8x256xf32>, vector<8x256xf32> -> vector<8x256xf32>
    %84 = arith.addf %76, %83 : vector<8x256xf32>
    %c240_i32 = arith.constant 240 : i32
    %85 = tpu.dynamic_rotate %33 by %c240_i32 dim 1 : vector<8x256xf32>, i32 -> vector<8x256xf32>
    %86 = vector.extract_strided_slice %2 {offsets = [7, 0], sizes = [1, 256], strides = [1, 1]} : vector<9x256xf32> to vector<1x256xf32>
    %87 = vector.broadcast %86 : vector<1x256xf32> to vector<8x256xf32>
    %88 = arith.mulf %85, %87 : vector<8x256xf32>
    %c7 = arith.constant 7 : index
    %c0_39 = arith.constant 0 : index
    %c0_40 = arith.constant 0 : index
    %89 = vector.load %arg5[%c7, %c0_39, %c0_40] : memref<9x8x8xf32, #tpu.memory_space<vmem>>, vector<1x8x8xf32>
    %90 = vector.shape_cast %89 : vector<1x8x8xf32> to vector<8x8xf32>
    %cst_41 = arith.constant dense<0.000000e+00> : vector<8x256xf32>
    %91 = tpu.matmul %90, %88, %cst_41 {dimension_numbers = #tpu.dot_dimension_numbers<[1], [0], [0], [1], [0, 0, 1, 1], [], []>} : vector<8x8xf32>, vector<8x256xf32>, vector<8x256xf32> -> vector<8x256xf32>
    %92 = arith.addf %84, %91 : vector<8x256xf32>
    %c239_i32 = arith.constant 239 : i32
    %93 = tpu.dynamic_rotate %33 by %c239_i32 dim 1 : vector<8x256xf32>, i32 -> vector<8x256xf32>
    %94 = vector.extract_strided_slice %2 {offsets = [8, 0], sizes = [1, 256], strides = [1, 1]} : vector<9x256xf32> to vector<1x256xf32>
    %95 = vector.broadcast %94 : vector<1x256xf32> to vector<8x256xf32>
    %96 = arith.mulf %93, %95 : vector<8x256xf32>
    %c8 = arith.constant 8 : index
    %c0_42 = arith.constant 0 : index
    %c0_43 = arith.constant 0 : index
    %97 = vector.load %arg5[%c8, %c0_42, %c0_43] : memref<9x8x8xf32, #tpu.memory_space<vmem>>, vector<1x8x8xf32>
    %98 = vector.shape_cast %97 : vector<1x8x8xf32> to vector<8x8xf32>
    %cst_44 = arith.constant dense<0.000000e+00> : vector<8x256xf32>
    %99 = tpu.matmul %98, %96, %cst_44 {dimension_numbers = #tpu.dot_dimension_numbers<[1], [0], [0], [1], [0, 0, 1, 1], [], []>} : vector<8x8xf32>, vector<8x256xf32>, vector<8x256xf32> -> vector<8x256xf32>
    %100 = arith.addf %92, %99 : vector<8x256xf32>
    %c0_45 = arith.constant 0 : index
    %c0_46 = arith.constant 0 : index
    %101 = vector.load %arg6[%c0_45, %c0_46] : memref<8x1xf32, #tpu.memory_space<vmem>>, vector<8x1xf32>
    %102 = vector.broadcast %101 : vector<8x1xf32> to vector<8x256xf32>
    %103 = arith.addf %100, %102 : vector<8x256xf32>
    %c0_47 = arith.constant 0 : index
    %c0_48 = arith.constant 0 : index
    %c0_49 = arith.constant 0 : index
    %104 = vector.load %arg2[%c0_47, %c0_48, %c0_49] : memref<1x8x1xf32, #tpu.memory_space<vmem>>, vector<1x8x1xf32>
    %105 = vector.shape_cast %104 : vector<1x8x1xf32> to vector<8x1xf32>
    %106 = vector.broadcast %105 : vector<8x1xf32> to vector<8x256xf32>
    %107 = arith.addf %103, %106 : vector<8x256xf32>
    %c0_50 = arith.constant 0 : index
    %c0_51 = arith.constant 0 : index
    %108 = vector.load %arg7[%c0_50, %c0_51] : memref<8x1xf32, #tpu.memory_space<vmem>>, vector<8x1xf32>
    %c0_52 = arith.constant 0 : index
    %c0_53 = arith.constant 0 : index
    %109 = vector.load %arg8[%c0_52, %c0_53] : memref<8x1xf32, #tpu.memory_space<vmem>>, vector<8x1xf32>
    %c0_54 = arith.constant 0 : index
    %c0_55 = arith.constant 0 : index
    %110 = vector.load %arg12[%c0_54, %c0_55] : memref<8x8xf32, #tpu.memory_space<vmem>>, vector<8x8xf32>
    %cst_56 = arith.constant dense<0.000000e+00> : vector<8x256xf32>
    %111 = tpu.matmul %110, %107, %cst_56 {dimension_numbers = #tpu.dot_dimension_numbers<[1], [0], [0], [1], [0, 0, 1, 1], [], []>} : vector<8x8xf32>, vector<8x256xf32>, vector<8x256xf32> -> vector<8x256xf32>
    %cst_57 = arith.constant dense<0.000000e+00> : vector<8xf32>
    %112 = vector.multi_reduction <add>, %111, %cst_57 [1] : vector<8x256xf32> to vector<8xf32>
    %113 = vector.shape_cast %112 : vector<8xf32> to vector<8x1xf32>
    %cst_58 = arith.constant 9.765625E-4 : f32
    %114 = vector.broadcast %cst_58 : f32 to vector<8x1xf32>
    %115 = arith.mulf %113, %114 : vector<8x1xf32>
    %116 = vector.broadcast %115 : vector<8x1xf32> to vector<8x256xf32>
    %117 = arith.subf %107, %116 : vector<8x256xf32>
    %118 = arith.mulf %117, %117 : vector<8x256xf32>
    %cst_59 = arith.constant dense<0.000000e+00> : vector<8x256xf32>
    %119 = tpu.matmul %110, %118, %cst_59 {dimension_numbers = #tpu.dot_dimension_numbers<[1], [0], [0], [1], [0, 0, 1, 1], [], []>} : vector<8x8xf32>, vector<8x256xf32>, vector<8x256xf32> -> vector<8x256xf32>
    %cst_60 = arith.constant dense<0.000000e+00> : vector<8xf32>
    %120 = vector.multi_reduction <add>, %119, %cst_60 [1] : vector<8x256xf32> to vector<8xf32>
    %121 = vector.shape_cast %120 : vector<8xf32> to vector<8x1xf32>
    %cst_61 = arith.constant 9.765625E-4 : f32
    %122 = vector.broadcast %cst_61 : f32 to vector<8x1xf32>
    %123 = arith.mulf %121, %122 : vector<8x1xf32>
    %cst_62 = arith.constant 9.99999974E-6 : f32
    %124 = vector.broadcast %cst_62 : f32 to vector<8x1xf32>
    %125 = arith.addf %123, %124 : vector<8x1xf32>
    %126 = math.rsqrt %125 : vector<8x1xf32>
    %127 = vector.broadcast %126 : vector<8x1xf32> to vector<8x256xf32>
    %128 = arith.mulf %117, %127 : vector<8x256xf32>
    %129 = vector.broadcast %108 : vector<8x1xf32> to vector<8x256xf32>
    %130 = arith.mulf %128, %129 : vector<8x256xf32>
    %131 = vector.broadcast %109 : vector<8x1xf32> to vector<8x256xf32>
    %132 = arith.addf %130, %131 : vector<8x256xf32>
    %133 = arith.negf %132 : vector<8x256xf32>
    %134 = math.exp %133 : vector<8x256xf32>
    %cst_63 = arith.constant 1.000000e+00 : f32
    %135 = vector.broadcast %cst_63 : f32 to vector<8x256xf32>
    %136 = arith.addf %135, %134 : vector<8x256xf32>
    %137 = arith.divf %135, %136 : vector<8x256xf32>
    %138 = arith.mulf %132, %137 : vector<8x256xf32>
    %c17_i32_64 = arith.constant 17 : i32
    %139 = tpu.dynamic_rotate %138 by %c17_i32_64 dim 1 : vector<8x256xf32>, i32 -> vector<8x256xf32>
    %140 = vector.extract_strided_slice %2 {offsets = [0, 0], sizes = [1, 256], strides = [1, 1]} : vector<9x256xf32> to vector<1x256xf32>
    %141 = vector.broadcast %140 : vector<1x256xf32> to vector<8x256xf32>
    %142 = arith.mulf %139, %141 : vector<8x256xf32>
    %c0_65 = arith.constant 0 : index
    %c0_66 = arith.constant 0 : index
    %c0_67 = arith.constant 0 : index
    %143 = vector.load %arg9[%c0_65, %c0_66, %c0_67] : memref<9x8x8xf32, #tpu.memory_space<vmem>>, vector<1x8x8xf32>
    %144 = vector.shape_cast %143 : vector<1x8x8xf32> to vector<8x8xf32>
    %cst_68 = arith.constant dense<0.000000e+00> : vector<8x256xf32>
    %145 = tpu.matmul %144, %142, %cst_68 {dimension_numbers = #tpu.dot_dimension_numbers<[1], [0], [0], [1], [0, 0, 1, 1], [], []>} : vector<8x8xf32>, vector<8x256xf32>, vector<8x256xf32> -> vector<8x256xf32>
    %c16_i32_69 = arith.constant 16 : i32
    %146 = tpu.dynamic_rotate %138 by %c16_i32_69 dim 1 : vector<8x256xf32>, i32 -> vector<8x256xf32>
    %147 = vector.extract_strided_slice %2 {offsets = [1, 0], sizes = [1, 256], strides = [1, 1]} : vector<9x256xf32> to vector<1x256xf32>
    %148 = vector.broadcast %147 : vector<1x256xf32> to vector<8x256xf32>
    %149 = arith.mulf %146, %148 : vector<8x256xf32>
    %c1_70 = arith.constant 1 : index
    %c0_71 = arith.constant 0 : index
    %c0_72 = arith.constant 0 : index
    %150 = vector.load %arg9[%c1_70, %c0_71, %c0_72] : memref<9x8x8xf32, #tpu.memory_space<vmem>>, vector<1x8x8xf32>
    %151 = vector.shape_cast %150 : vector<1x8x8xf32> to vector<8x8xf32>
    %cst_73 = arith.constant dense<0.000000e+00> : vector<8x256xf32>
    %152 = tpu.matmul %151, %149, %cst_73 {dimension_numbers = #tpu.dot_dimension_numbers<[1], [0], [0], [1], [0, 0, 1, 1], [], []>} : vector<8x8xf32>, vector<8x256xf32>, vector<8x256xf32> -> vector<8x256xf32>
    %153 = arith.addf %145, %152 : vector<8x256xf32>
    %c15_i32_74 = arith.constant 15 : i32
    %154 = tpu.dynamic_rotate %138 by %c15_i32_74 dim 1 : vector<8x256xf32>, i32 -> vector<8x256xf32>
    %155 = vector.extract_strided_slice %2 {offsets = [2, 0], sizes = [1, 256], strides = [1, 1]} : vector<9x256xf32> to vector<1x256xf32>
    %156 = vector.broadcast %155 : vector<1x256xf32> to vector<8x256xf32>
    %157 = arith.mulf %154, %156 : vector<8x256xf32>
    %c2_75 = arith.constant 2 : index
    %c0_76 = arith.constant 0 : index
    %c0_77 = arith.constant 0 : index
    %158 = vector.load %arg9[%c2_75, %c0_76, %c0_77] : memref<9x8x8xf32, #tpu.memory_space<vmem>>, vector<1x8x8xf32>
    %159 = vector.shape_cast %158 : vector<1x8x8xf32> to vector<8x8xf32>
    %cst_78 = arith.constant dense<0.000000e+00> : vector<8x256xf32>
    %160 = tpu.matmul %159, %157, %cst_78 {dimension_numbers = #tpu.dot_dimension_numbers<[1], [0], [0], [1], [0, 0, 1, 1], [], []>} : vector<8x8xf32>, vector<8x256xf32>, vector<8x256xf32> -> vector<8x256xf32>
    %161 = arith.addf %153, %160 : vector<8x256xf32>
    %c1_i32_79 = arith.constant 1 : i32
    %162 = tpu.dynamic_rotate %138 by %c1_i32_79 dim 1 : vector<8x256xf32>, i32 -> vector<8x256xf32>
    %163 = vector.extract_strided_slice %2 {offsets = [3, 0], sizes = [1, 256], strides = [1, 1]} : vector<9x256xf32> to vector<1x256xf32>
    %164 = vector.broadcast %163 : vector<1x256xf32> to vector<8x256xf32>
    %165 = arith.mulf %162, %164 : vector<8x256xf32>
    %c3_80 = arith.constant 3 : index
    %c0_81 = arith.constant 0 : index
    %c0_82 = arith.constant 0 : index
    %166 = vector.load %arg9[%c3_80, %c0_81, %c0_82] : memref<9x8x8xf32, #tpu.memory_space<vmem>>, vector<1x8x8xf32>
    %167 = vector.shape_cast %166 : vector<1x8x8xf32> to vector<8x8xf32>
    %cst_83 = arith.constant dense<0.000000e+00> : vector<8x256xf32>
    %168 = tpu.matmul %167, %165, %cst_83 {dimension_numbers = #tpu.dot_dimension_numbers<[1], [0], [0], [1], [0, 0, 1, 1], [], []>} : vector<8x8xf32>, vector<8x256xf32>, vector<8x256xf32> -> vector<8x256xf32>
    %169 = arith.addf %161, %168 : vector<8x256xf32>
    %c4_84 = arith.constant 4 : index
    %c0_85 = arith.constant 0 : index
    %c0_86 = arith.constant 0 : index
    %170 = vector.load %arg9[%c4_84, %c0_85, %c0_86] : memref<9x8x8xf32, #tpu.memory_space<vmem>>, vector<1x8x8xf32>
    %171 = vector.shape_cast %170 : vector<1x8x8xf32> to vector<8x8xf32>
    %cst_87 = arith.constant dense<0.000000e+00> : vector<8x256xf32>
    %172 = tpu.matmul %171, %138, %cst_87 {dimension_numbers = #tpu.dot_dimension_numbers<[1], [0], [0], [1], [0, 0, 1, 1], [], []>} : vector<8x8xf32>, vector<8x256xf32>, vector<8x256xf32> -> vector<8x256xf32>
    %173 = arith.addf %169, %172 : vector<8x256xf32>
    %c255_i32_88 = arith.constant 255 : i32
    %174 = tpu.dynamic_rotate %138 by %c255_i32_88 dim 1 : vector<8x256xf32>, i32 -> vector<8x256xf32>
    %175 = vector.extract_strided_slice %2 {offsets = [5, 0], sizes = [1, 256], strides = [1, 1]} : vector<9x256xf32> to vector<1x256xf32>
    %176 = vector.broadcast %175 : vector<1x256xf32> to vector<8x256xf32>
    %177 = arith.mulf %174, %176 : vector<8x256xf32>
    %c5_89 = arith.constant 5 : index
    %c0_90 = arith.constant 0 : index
    %c0_91 = arith.constant 0 : index
    %178 = vector.load %arg9[%c5_89, %c0_90, %c0_91] : memref<9x8x8xf32, #tpu.memory_space<vmem>>, vector<1x8x8xf32>
    %179 = vector.shape_cast %178 : vector<1x8x8xf32> to vector<8x8xf32>
    %cst_92 = arith.constant dense<0.000000e+00> : vector<8x256xf32>
    %180 = tpu.matmul %179, %177, %cst_92 {dimension_numbers = #tpu.dot_dimension_numbers<[1], [0], [0], [1], [0, 0, 1, 1], [], []>} : vector<8x8xf32>, vector<8x256xf32>, vector<8x256xf32> -> vector<8x256xf32>
    %181 = arith.addf %173, %180 : vector<8x256xf32>
    %c241_i32_93 = arith.constant 241 : i32
    %182 = tpu.dynamic_rotate %138 by %c241_i32_93 dim 1 : vector<8x256xf32>, i32 -> vector<8x256xf32>
    %183 = vector.extract_strided_slice %2 {offsets = [6, 0], sizes = [1, 256], strides = [1, 1]} : vector<9x256xf32> to vector<1x256xf32>
    %184 = vector.broadcast %183 : vector<1x256xf32> to vector<8x256xf32>
    %185 = arith.mulf %182, %184 : vector<8x256xf32>
    %c6_94 = arith.constant 6 : index
    %c0_95 = arith.constant 0 : index
    %c0_96 = arith.constant 0 : index
    %186 = vector.load %arg9[%c6_94, %c0_95, %c0_96] : memref<9x8x8xf32, #tpu.memory_space<vmem>>, vector<1x8x8xf32>
    %187 = vector.shape_cast %186 : vector<1x8x8xf32> to vector<8x8xf32>
    %cst_97 = arith.constant dense<0.000000e+00> : vector<8x256xf32>
    %188 = tpu.matmul %187, %185, %cst_97 {dimension_numbers = #tpu.dot_dimension_numbers<[1], [0], [0], [1], [0, 0, 1, 1], [], []>} : vector<8x8xf32>, vector<8x256xf32>, vector<8x256xf32> -> vector<8x256xf32>
    %189 = arith.addf %181, %188 : vector<8x256xf32>
    %c240_i32_98 = arith.constant 240 : i32
    %190 = tpu.dynamic_rotate %138 by %c240_i32_98 dim 1 : vector<8x256xf32>, i32 -> vector<8x256xf32>
    %191 = vector.extract_strided_slice %2 {offsets = [7, 0], sizes = [1, 256], strides = [1, 1]} : vector<9x256xf32> to vector<1x256xf32>
    %192 = vector.broadcast %191 : vector<1x256xf32> to vector<8x256xf32>
    %193 = arith.mulf %190, %192 : vector<8x256xf32>
    %c7_99 = arith.constant 7 : index
    %c0_100 = arith.constant 0 : index
    %c0_101 = arith.constant 0 : index
    %194 = vector.load %arg9[%c7_99, %c0_100, %c0_101] : memref<9x8x8xf32, #tpu.memory_space<vmem>>, vector<1x8x8xf32>
    %195 = vector.shape_cast %194 : vector<1x8x8xf32> to vector<8x8xf32>
    %cst_102 = arith.constant dense<0.000000e+00> : vector<8x256xf32>
    %196 = tpu.matmul %195, %193, %cst_102 {dimension_numbers = #tpu.dot_dimension_numbers<[1], [0], [0], [1], [0, 0, 1, 1], [], []>} : vector<8x8xf32>, vector<8x256xf32>, vector<8x256xf32> -> vector<8x256xf32>
    %197 = arith.addf %189, %196 : vector<8x256xf32>
    %c239_i32_103 = arith.constant 239 : i32
    %198 = tpu.dynamic_rotate %138 by %c239_i32_103 dim 1 : vector<8x256xf32>, i32 -> vector<8x256xf32>
    %199 = vector.extract_strided_slice %2 {offsets = [8, 0], sizes = [1, 256], strides = [1, 1]} : vector<9x256xf32> to vector<1x256xf32>
    %200 = vector.broadcast %199 : vector<1x256xf32> to vector<8x256xf32>
    %201 = arith.mulf %198, %200 : vector<8x256xf32>
    %c8_104 = arith.constant 8 : index
    %c0_105 = arith.constant 0 : index
    %c0_106 = arith.constant 0 : index
    %202 = vector.load %arg9[%c8_104, %c0_105, %c0_106] : memref<9x8x8xf32, #tpu.memory_space<vmem>>, vector<1x8x8xf32>
    %203 = vector.shape_cast %202 : vector<1x8x8xf32> to vector<8x8xf32>
    %cst_107 = arith.constant dense<0.000000e+00> : vector<8x256xf32>
    %204 = tpu.matmul %203, %201, %cst_107 {dimension_numbers = #tpu.dot_dimension_numbers<[1], [0], [0], [1], [0, 0, 1, 1], [], []>} : vector<8x8xf32>, vector<8x256xf32>, vector<8x256xf32> -> vector<8x256xf32>
    %205 = arith.addf %197, %204 : vector<8x256xf32>
    %c0_108 = arith.constant 0 : index
    %c0_109 = arith.constant 0 : index
    %206 = vector.load %arg10[%c0_108, %c0_109] : memref<8x1xf32, #tpu.memory_space<vmem>>, vector<8x1xf32>
    %207 = vector.broadcast %206 : vector<8x1xf32> to vector<8x256xf32>
    %208 = arith.addf %205, %207 : vector<8x256xf32>
    %209 = arith.addf %208, %1 : vector<8x256xf32>
    %c0_110 = arith.constant 0 : index
    %c0_111 = arith.constant 0 : index
    %c0_112 = arith.constant 0 : index
    %210 = vector.load %arg17[%c0_110, %c0_111, %c0_112] : memref<1x8x256xf32, #tpu.memory_space<vmem>>, vector<1x8x256xf32>
    %211 = vector.shape_cast %210 : vector<1x8x256xf32> to vector<8x256xf32>
    %212 = vector.shape_cast %209 : vector<8x256xf32> to vector<1x8x256xf32>
    tpu.vector_store %arg17[%c0_110, %c0_111, %c0_112], %212 {strides = array<i32>} : memref<1x8x256xf32, #tpu.memory_space<vmem>>, vector<1x8x256xf32>,
    %c0_113 = arith.constant 0 : index
    %c0_114 = arith.constant 0 : index
    %213 = vector.load %arg15[%c0_113, %c0_114] : memref<8x1xf32, #tpu.memory_space<vmem>>, vector<8x1xf32>
    %c0_115 = arith.constant 0 : index
    %c0_116 = arith.constant 0 : index
    %214 = vector.load %arg16[%c0_115, %c0_116] : memref<10x256xf32, #tpu.memory_space<vmem>>, vector<10x256xf32>
    %c0_117 = arith.constant 0 : index
    %c0_118 = arith.constant 0 : index
    %c0_119 = arith.constant 0 : index
    %215 = vector.load %arg14[%c0_117, %c0_118, %c0_119] : memref<4x8x8xf32, #tpu.memory_space<vmem>>, vector<1x8x8xf32>
    %216 = vector.shape_cast %215 : vector<1x8x8xf32> to vector<8x8xf32>
    %cst_120 = arith.constant dense<0.000000e+00> : vector<8x256xf32>
    %217 = tpu.matmul %216, %209, %cst_120 {dimension_numbers = #tpu.dot_dimension_numbers<[1], [0], [0], [1], [0, 0, 1, 1], [], []>} : vector<8x8xf32>, vector<8x256xf32>, vector<8x256xf32> -> vector<8x256xf32>
    %c1_121 = arith.constant 1 : index
    %c0_122 = arith.constant 0 : index
    %c0_123 = arith.constant 0 : index
    %218 = vector.load %arg14[%c1_121, %c0_122, %c0_123] : memref<4x8x8xf32, #tpu.memory_space<vmem>>, vector<1x8x8xf32>
    %219 = vector.shape_cast %218 : vector<1x8x8xf32> to vector<8x8xf32>
    %cst_124 = arith.constant dense<0.000000e+00> : vector<8x256xf32>
    %220 = tpu.matmul %219, %209, %cst_124 {dimension_numbers = #tpu.dot_dimension_numbers<[1], [0], [0], [1], [0, 0, 1, 1], [], []>} : vector<8x8xf32>, vector<8x256xf32>, vector<8x256xf32> -> vector<8x256xf32>
    %c255_i32_125 = arith.constant 255 : i32
    %221 = tpu.dynamic_rotate %220 by %c255_i32_125 dim 1 : vector<8x256xf32>, i32 -> vector<8x256xf32>
    %222 = arith.addf %217, %221 : vector<8x256xf32>
    %c2_126 = arith.constant 2 : index
    %c0_127 = arith.constant 0 : index
    %c0_128 = arith.constant 0 : index
    %223 = vector.load %arg14[%c2_126, %c0_127, %c0_128] : memref<4x8x8xf32, #tpu.memory_space<vmem>>, vector<1x8x8xf32>
    %224 = vector.shape_cast %223 : vector<1x8x8xf32> to vector<8x8xf32>
    %cst_129 = arith.constant dense<0.000000e+00> : vector<8x256xf32>
    %225 = tpu.matmul %224, %209, %cst_129 {dimension_numbers = #tpu.dot_dimension_numbers<[1], [0], [0], [1], [0, 0, 1, 1], [], []>} : vector<8x8xf32>, vector<8x256xf32>, vector<8x256xf32> -> vector<8x256xf32>
    %c240_i32_130 = arith.constant 240 : i32
    %226 = tpu.dynamic_rotate %225 by %c240_i32_130 dim 1 : vector<8x256xf32>, i32 -> vector<8x256xf32>
    %227 = arith.addf %222, %226 : vector<8x256xf32>
    %c3_131 = arith.constant 3 : index
    %c0_132 = arith.constant 0 : index
    %c0_133 = arith.constant 0 : index
    %228 = vector.load %arg14[%c3_131, %c0_132, %c0_133] : memref<4x8x8xf32, #tpu.memory_space<vmem>>, vector<1x8x8xf32>
    %229 = vector.shape_cast %228 : vector<1x8x8xf32> to vector<8x8xf32>
    %cst_134 = arith.constant dense<0.000000e+00> : vector<8x256xf32>
    %230 = tpu.matmul %229, %209, %cst_134 {dimension_numbers = #tpu.dot_dimension_numbers<[1], [0], [0], [1], [0, 0, 1, 1], [], []>} : vector<8x8xf32>, vector<8x256xf32>, vector<8x256xf32> -> vector<8x256xf32>
    %c239_i32_135 = arith.constant 239 : i32
    %231 = tpu.dynamic_rotate %230 by %c239_i32_135 dim 1 : vector<8x256xf32>, i32 -> vector<8x256xf32>
    %232 = arith.addf %227, %231 : vector<8x256xf32>
    %c255_i32_136 = arith.constant 255 : i32
    %233 = tpu.dynamic_rotate %232 by %c255_i32_136 dim 1 : vector<8x256xf32>, i32 -> vector<8x256xf32>
    %234 = vector.extract_strided_slice %214 {offsets = [0, 0], sizes = [1, 256], strides = [1, 1]} : vector<10x256xf32> to vector<1x256xf32>
    %cst_137 = arith.constant 5.000000e-01 : f32
    %235 = vector.broadcast %cst_137 : f32 to vector<1x256xf32>
    %236 = arith.cmpf ogt, %234, %235 : vector<1x256xf32>
    %237 = vector.shape_cast %236 : vector<1x256xi1> to vector<1x256xi1>
    %238 = vector.broadcast %237 : vector<1x256xi1> to vector<8x256xi1>
    %239 = arith.select %238, %233, %232 : vector<8x256xi1>, vector<8x256xf32>
    %c254_i32 = arith.constant 254 : i32
    %240 = tpu.dynamic_rotate %239 by %c254_i32 dim 1 : vector<8x256xf32>, i32 -> vector<8x256xf32>
    %241 = vector.extract_strided_slice %214 {offsets = [1, 0], sizes = [1, 256], strides = [1, 1]} : vector<10x256xf32> to vector<1x256xf32>
    %cst_138 = arith.constant 5.000000e-01 : f32
    %242 = vector.broadcast %cst_138 : f32 to vector<1x256xf32>
    %243 = arith.cmpf ogt, %241, %242 : vector<1x256xf32>
    %244 = vector.shape_cast %243 : vector<1x256xi1> to vector<1x256xi1>
    %245 = vector.broadcast %244 : vector<1x256xi1> to vector<8x256xi1>
    %246 = arith.select %245, %240, %239 : vector<8x256xi1>, vector<8x256xf32>
    %c252_i32 = arith.constant 252 : i32
    %247 = tpu.dynamic_rotate %246 by %c252_i32 dim 1 : vector<8x256xf32>, i32 -> vector<8x256xf32>
    %248 = vector.extract_strided_slice %214 {offsets = [2, 0], sizes = [1, 256], strides = [1, 1]} : vector<10x256xf32> to vector<1x256xf32>
    %cst_139 = arith.constant 5.000000e-01 : f32
    %249 = vector.broadcast %cst_139 : f32 to vector<1x256xf32>
    %250 = arith.cmpf ogt, %248, %249 : vector<1x256xf32>
    %251 = vector.shape_cast %250 : vector<1x256xi1> to vector<1x256xi1>
    %252 = vector.broadcast %251 : vector<1x256xi1> to vector<8x256xi1>
    %253 = arith.select %252, %247, %246 : vector<8x256xi1>, vector<8x256xf32>
    %c248_i32 = arith.constant 248 : i32
    %254 = tpu.dynamic_rotate %253 by %c248_i32 dim 1 : vector<8x256xf32>, i32 -> vector<8x256xf32>
    %255 = vector.extract_strided_slice %214 {offsets = [3, 0], sizes = [1, 256], strides = [1, 1]} : vector<10x256xf32> to vector<1x256xf32>
    %cst_140 = arith.constant 5.000000e-01 : f32
    %256 = vector.broadcast %cst_140 : f32 to vector<1x256xf32>
    %257 = arith.cmpf ogt, %255, %256 : vector<1x256xf32>
    %258 = vector.shape_cast %257 : vector<1x256xi1> to vector<1x256xi1>
    %259 = vector.broadcast %258 : vector<1x256xi1> to vector<8x256xi1>
    %260 = arith.select %259, %254, %253 : vector<8x256xi1>, vector<8x256xf32>
    %c240_i32_141 = arith.constant 240 : i32
    %261 = tpu.dynamic_rotate %260 by %c240_i32_141 dim 1 : vector<8x256xf32>, i32 -> vector<8x256xf32>
    %262 = vector.extract_strided_slice %214 {offsets = [4, 0], sizes = [1, 256], strides = [1, 1]} : vector<10x256xf32> to vector<1x256xf32>
    %cst_142 = arith.constant 5.000000e-01 : f32
    %263 = vector.broadcast %cst_142 : f32 to vector<1x256xf32>
    %264 = arith.cmpf ogt, %262, %263 : vector<1x256xf32>
    %265 = vector.shape_cast %264 : vector<1x256xi1> to vector<1x256xi1>
    %266 = vector.broadcast %265 : vector<1x256xi1> to vector<8x256xi1>
    %267 = arith.select %266, %261, %260 : vector<8x256xi1>, vector<8x256xf32>
    %c224_i32 = arith.constant 224 : i32
    %268 = tpu.dynamic_rotate %267 by %c224_i32 dim 1 : vector<8x256xf32>, i32 -> vector<8x256xf32>
    %269 = vector.extract_strided_slice %214 {offsets = [5, 0], sizes = [1, 256], strides = [1, 1]} : vector<10x256xf32> to vector<1x256xf32>
    %cst_143 = arith.constant 5.000000e-01 : f32
    %270 = vector.broadcast %cst_143 : f32 to vector<1x256xf32>
    %271 = arith.cmpf ogt, %269, %270 : vector<1x256xf32>
    %272 = vector.shape_cast %271 : vector<1x256xi1> to vector<1x256xi1>
    %273 = vector.broadcast %272 : vector<1x256xi1> to vector<8x256xi1>
    %274 = arith.select %273, %268, %267 : vector<8x256xi1>, vector<8x256xf32>
    %c192_i32 = arith.constant 192 : i32
    %275 = tpu.dynamic_rotate %274 by %c192_i32 dim 1 : vector<8x256xf32>, i32 -> vector<8x256xf32>
    %276 = vector.extract_strided_slice %214 {offsets = [6, 0], sizes = [1, 256], strides = [1, 1]} : vector<10x256xf32> to vector<1x256xf32>
    %cst_144 = arith.constant 5.000000e-01 : f32
    %277 = vector.broadcast %cst_144 : f32 to vector<1x256xf32>
    %278 = arith.cmpf ogt, %276, %277 : vector<1x256xf32>
    %279 = vector.shape_cast %278 : vector<1x256xi1> to vector<1x256xi1>
    %280 = vector.broadcast %279 : vector<1x256xi1> to vector<8x256xi1>
    %281 = arith.select %280, %275, %274 : vector<8x256xi1>, vector<8x256xf32>
    %c248_i32_145 = arith.constant 248 : i32
    %282 = tpu.dynamic_rotate %281 by %c248_i32_145 dim 1 : vector<8x256xf32>, i32 -> vector<8x256xf32>
    %283 = vector.extract_strided_slice %214 {offsets = [7, 0], sizes = [1, 256], strides = [1, 1]} : vector<10x256xf32> to vector<1x256xf32>
    %cst_146 = arith.constant 5.000000e-01 : f32
    %284 = vector.broadcast %cst_146 : f32 to vector<1x256xf32>
    %285 = arith.cmpf ogt, %283, %284 : vector<1x256xf32>
    %286 = vector.shape_cast %285 : vector<1x256xi1> to vector<1x256xi1>
    %287 = vector.broadcast %286 : vector<1x256xi1> to vector<8x256xi1>
    %288 = arith.select %287, %282, %281 : vector<8x256xi1>, vector<8x256xf32>
    %c240_i32_147 = arith.constant 240 : i32
    %289 = tpu.dynamic_rotate %288 by %c240_i32_147 dim 1 : vector<8x256xf32>, i32 -> vector<8x256xf32>
    %290 = vector.extract_strided_slice %214 {offsets = [8, 0], sizes = [1, 256], strides = [1, 1]} : vector<10x256xf32> to vector<1x256xf32>
    %cst_148 = arith.constant 5.000000e-01 : f32
    %291 = vector.broadcast %cst_148 : f32 to vector<1x256xf32>
    %292 = arith.cmpf ogt, %290, %291 : vector<1x256xf32>
    %293 = vector.shape_cast %292 : vector<1x256xi1> to vector<1x256xi1>
    %294 = vector.broadcast %293 : vector<1x256xi1> to vector<8x256xi1>
    %295 = arith.select %294, %289, %288 : vector<8x256xi1>, vector<8x256xf32>
    %c224_i32_149 = arith.constant 224 : i32
    %296 = tpu.dynamic_rotate %295 by %c224_i32_149 dim 1 : vector<8x256xf32>, i32 -> vector<8x256xf32>
    %297 = vector.extract_strided_slice %214 {offsets = [9, 0], sizes = [1, 256], strides = [1, 1]} : vector<10x256xf32> to vector<1x256xf32>
    %cst_150 = arith.constant 5.000000e-01 : f32
    %298 = vector.broadcast %cst_150 : f32 to vector<1x256xf32>
    %299 = arith.cmpf ogt, %297, %298 : vector<1x256xf32>
    %300 = vector.shape_cast %299 : vector<1x256xi1> to vector<1x256xi1>
    %301 = vector.broadcast %300 : vector<1x256xi1> to vector<8x256xi1>
    %302 = arith.select %301, %296, %295 : vector<8x256xi1>, vector<8x256xf32>
    %303 = vector.extract_strided_slice %302 {offsets = [0, 0], sizes = [8, 64], strides = [1, 1]} : vector<8x256xf32> to vector<8x64xf32>
    %304 = vector.broadcast %213 : vector<8x1xf32> to vector<8x64xf32>
    %305 = arith.addf %303, %304 : vector<8x64xf32>
    %c0_151 = arith.constant 0 : index
    %c0_152 = arith.constant 0 : index
    %c0_153 = arith.constant 0 : index
    %306 = vector.load %arg18[%c0_151, %c0_152, %c0_153] : memref<1x8x64xf32, #tpu.memory_space<vmem>>, vector<1x8x64xf32>
    %307 = vector.shape_cast %306 : vector<1x8x64xf32> to vector<8x64xf32>
    %308 = vector.shape_cast %305 : vector<8x64xf32> to vector<1x8x64xf32>
    tpu.vector_store %arg18[%c0_151, %c0_152, %c0_153], %308 {strides = array<i32>} : memref<1x8x64xf32, #tpu.memory_space<vmem>>, vector<1x8x64xf32>,
    return
  }
  func.func @transform_0(%arg0: i32) -> (i32, i32, i32) {
    %c0_i32 = arith.constant 0 : i32
    %c0_i32_0 = arith.constant 0 : i32
    %c0_i32_1 = arith.constant 0 : i32
    return %arg0, %c0_i32, %c0_i32_0 : i32, i32, i32
  }
  func.func @transform_1(%arg0: i32) -> (i32, i32, i32) {
    %c0_i32 = arith.constant 0 : i32
    %c0_i32_0 = arith.constant 0 : i32
    %c0_i32_1 = arith.constant 0 : i32
    return %arg0, %c0_i32, %c0_i32_0 : i32, i32, i32
  }
  func.func @transform_2(%arg0: i32) -> (i32, i32) {
    %c0_i32 = arith.constant 0 : i32
    %c0_i32_0 = arith.constant 0 : i32
    %c0_i32_1 = arith.constant 0 : i32
    return %c0_i32, %c0_i32_0 : i32, i32
  }
  func.func @transform_3(%arg0: i32) -> (i32, i32) {
    %c0_i32 = arith.constant 0 : i32
    %c0_i32_0 = arith.constant 0 : i32
    %c0_i32_1 = arith.constant 0 : i32
    return %c0_i32, %c0_i32_0 : i32, i32
  }
  func.func @transform_4(%arg0: i32) -> (i32, i32, i32) {
    %c0_i32 = arith.constant 0 : i32
    %c0_i32_0 = arith.constant 0 : i32
    %c0_i32_1 = arith.constant 0 : i32
    %c0_i32_2 = arith.constant 0 : i32
    return %c0_i32, %c0_i32_0, %c0_i32_1 : i32, i32, i32
  }
  func.func @transform_5(%arg0: i32) -> (i32, i32) {
    %c0_i32 = arith.constant 0 : i32
    %c0_i32_0 = arith.constant 0 : i32
    %c0_i32_1 = arith.constant 0 : i32
    return %c0_i32, %c0_i32_0 : i32, i32
  }
  func.func @transform_6(%arg0: i32) -> (i32, i32) {
    %c0_i32 = arith.constant 0 : i32
    %c0_i32_0 = arith.constant 0 : i32
    %c0_i32_1 = arith.constant 0 : i32
    return %c0_i32, %c0_i32_0 : i32, i32
  }
  func.func @transform_7(%arg0: i32) -> (i32, i32) {
    %c0_i32 = arith.constant 0 : i32
    %c0_i32_0 = arith.constant 0 : i32
    %c0_i32_1 = arith.constant 0 : i32
    return %c0_i32, %c0_i32_0 : i32, i32
  }
  func.func @transform_8(%arg0: i32) -> (i32, i32, i32) {
    %c0_i32 = arith.constant 0 : i32
    %c0_i32_0 = arith.constant 0 : i32
    %c0_i32_1 = arith.constant 0 : i32
    %c0_i32_2 = arith.constant 0 : i32
    return %c0_i32, %c0_i32_0, %c0_i32_1 : i32, i32, i32
  }
  func.func @transform_9(%arg0: i32) -> (i32, i32) {
    %c0_i32 = arith.constant 0 : i32
    %c0_i32_0 = arith.constant 0 : i32
    %c0_i32_1 = arith.constant 0 : i32
    return %c0_i32, %c0_i32_0 : i32, i32
  }
  func.func @transform_10(%arg0: i32) -> (i32, i32) {
    %c0_i32 = arith.constant 0 : i32
    %c0_i32_0 = arith.constant 0 : i32
    %c0_i32_1 = arith.constant 0 : i32
    return %c0_i32, %c0_i32_0 : i32, i32
  }
  func.func @transform_11(%arg0: i32) -> (i32, i32) {
    %c0_i32 = arith.constant 0 : i32
    %c0_i32_0 = arith.constant 0 : i32
    %c0_i32_1 = arith.constant 0 : i32
    return %c0_i32, %c0_i32_0 : i32, i32
  }
  func.func @transform_12(%arg0: i32) -> (i32, i32) {
    %c0_i32 = arith.constant 0 : i32
    %c0_i32_0 = arith.constant 0 : i32
    %c0_i32_1 = arith.constant 0 : i32
    return %c0_i32, %c0_i32_0 : i32, i32
  }
  func.func @transform_13(%arg0: i32) -> (i32, i32, i32) {
    %c0_i32 = arith.constant 0 : i32
    %c0_i32_0 = arith.constant 0 : i32
    %c0_i32_1 = arith.constant 0 : i32
    %c0_i32_2 = arith.constant 0 : i32
    return %c0_i32, %c0_i32_0, %c0_i32_1 : i32, i32, i32
  }
  func.func @transform_14(%arg0: i32) -> (i32, i32) {
    %c0_i32 = arith.constant 0 : i32
    %c0_i32_0 = arith.constant 0 : i32
    %c0_i32_1 = arith.constant 0 : i32
    return %c0_i32, %c0_i32_0 : i32, i32
  }
  func.func @transform_15(%arg0: i32) -> (i32, i32) {
    %c0_i32 = arith.constant 0 : i32
    %c0_i32_0 = arith.constant 0 : i32
    %c0_i32_1 = arith.constant 0 : i32
    return %c0_i32, %c0_i32_0 : i32, i32
  }
  func.func @transform_16(%arg0: i32) -> (i32, i32, i32) {
    %c0_i32 = arith.constant 0 : i32
    %c0_i32_0 = arith.constant 0 : i32
    %c0_i32_1 = arith.constant 0 : i32
    return %arg0, %c0_i32, %c0_i32_0 : i32, i32, i32
  }
  func.func @transform_17(%arg0: i32) -> (i32, i32, i32) {
    %c0_i32 = arith.constant 0 : i32
    %c0_i32_0 = arith.constant 0 : i32
    %c0_i32_1 = arith.constant 0 : i32
    return %arg0, %c0_i32, %c0_i32_0 : i32, i32, i32
  }
}

</mosaic_0001>

<bundles_post_ra>
// kernel: resnet_down_apply.2
= control target key start
LH: loop header
LB: loop body
LE: loop exit
PB: predicated region body
PF: predicated region fallthrough
CT: control target
= control target key end

     0   :  { %s2986_s18 = smov 0   ;;  %s3430_s0 = inlined_call_operand.vmem [shape: f32[2,4,256], index: 0, kind: input, shape index: {}]   ;;  %s3431_s1 = inlined_call_operand.vmem [shape: f32[2,8,1], index: 1, kind: input, shape index: {}]   ;;  %s3432_s2 = inlined_call_operand.vmem [shape: f32[4,1], index: 2, kind: input, shape index: {}]   ;;  %s3433_s3 = inlined_call_operand.vmem [shape: f32[4,1], index: 3, kind: input, shape index: {}]   ;;  %s3434_s4 = inlined_call_operand.vmem [shape: f32[9,8,4], index: 4, kind: input, shape index: {}]   ;;  %s3435_s5 = inlined_call_operand.vmem [shape: f32[8,1], index: 5, kind: input, shape index: {}]   ;;  %s3436_s6 = inlined_call_operand.vmem [shape: f32[8,1], index: 6, kind: input, shape index: {}]   ;;  %s3437_s7 = inlined_call_operand.vmem [shape: f32[8,1], index: 7, kind: input, shape index: {}]   ;;  %s3438_s8 = inlined_call_operand.vmem [shape: f32[9,8,8], index: 8, kind: input, shape index: {}]   ;;  %s3439_s9 = inlined_call_operand.vmem [shape: f32[8,1], index: 9, kind: input, shape index: {}]   ;;  %s3440_s10 = inlined_call_operand.vmem [shape: f32[4,4], index: 10, kind: input, shape index: {}]   ;;  %s3441_s11 = inlined_call_operand.vmem [shape: f32[8,8], index: 11, kind: input, shape index: {}]   ;;  %s3442_s12 = inlined_call_operand.vmem [shape: f32[9,256], index: 12, kind: input, shape index: {}]   ;;  %s3443_s13 = inlined_call_operand.vmem [shape: f32[8,4], index: 13, kind: input, shape index: {}]   ;;  %s3444_s14 = inlined_call_operand.vmem [shape: f32[8,1], index: 14, kind: input, shape index: {}]   ;;  %s3445_s15 = inlined_call_operand.vmem [shape: f32[2,8,256], index: 15, kind: output, shape index: {}]  }
   0x1 LB: > { %s2767_s19 = sadd.s32 4294967295, %s2893_s18   ;;  %p2771_p0 = scmp.ge.s32.totalorder %s2893_s18, 1  ;;  %s2893_s18 = sphi %s2986_s18, %s25_s18  }
   0x2   : > { %p446_p1 = scmp.lt.s32.totalorder %s2893_s18, 3 }
   0x4   : > { %p447_p2 = pnand %p2771_p0, %p446_p1 }
   0x5   : > { %p498_p3 = scmp.lt.s32.totalorder (!%p447_p2), %s2767_s19, 1  ;;  %s2898_s30 = smov (!%p447_p2), 17  }
   0x6   : > { %450 = sbr.rel (%p447_p2) target bundleno = 2212 (0x8a4), region = 80  ;;  %s2899_s16 = smov (!%p447_p2), 16  }
   0x7   : > { %s2900_s17 = smov (!%p447_p2), 15   ;;  %s2901_s21 = smov (!%p447_p2), 1  }
   0x8   : > { %s3446_s22 = smov (!%p447_p2), 127   ;;  %s3450_s24 = smov (!%p447_p2), 112  }
   0x9   : > { %s3448_s25 = smov (!%p447_p2), 111  }
   0xb   : > { %v2895_v0 = vmov 0.0   ;;  %s3456_s19 = smov (!%p498_p3, %s2767_s19), 1  ;;  %vm526_vm0 = vcmask 1043456   ;;  %v519_v3 = vld [vmem:[%s3440_s10] sm:$0xf]  ;;  %vm522_vm1 = vcmask 31744   ;;  %v612_v11 = vlaneseq }
   0xc   : > { %595 = vmatprep.mubr.f32.mxu0 %v2895_v0  ;;  %689 = vmatprep.mubr.f32.mxu1 %v2895_v0  ;;  %s2847_s20 = sshll.u32 %s3456_s19, 3  ;;  %v2896_v9 = vmov 839922192   ;;  %v517_v21 = vld [vmem:[%s3432_s2] sm:$0xf]  ;;  %v2897_v22 = vmov 0  }
   0xd   : > { %s502_s23 = scalar_lea.vmem %s3430_s0, %s2847_s20  ;;  %v610_v10 = vunpack.c.l.s4 %v2896_v9  ;;  %v3022_v13 = vshrl.u32 %v612_v11, 7  ;;  %2868 = vset.pattern.permute.xlu1 %v2897_v22  ;;  %2869 = vset.pattern.permute.xlu0 %v2897_v22  ;;  %v518_v23 = vld [vmem:[%s3433_s3] sm:$0xf]  ;;  %s506_s28 = scalar_lea.vmem %s3431_s1, %s2847_s20  ;;  %v3086_v55 = vand.u32 127, %v612_v11  ;;  %v3096_v58 = vld [vmem:[%s3442_s12 + $0x8] sm:$0xff]  ;;  %vm1656_vm10 = vcmask 64512  }
   0xe   : > { %v3004_v1 = vld [vmem:[%s502_s23] sm:$0xff]  ;;  %716 = vperm.xlu1 %2868, %v517_v21   ;;  %s2903_s23 = smov 113  }
   0xf   : > { %v3008_v2 = vcombine.high %v3004_v1, %v3004_v1  ;;  %v611_v12 = vunpack.c.0.s8 %v610_v10  ;;  %v1645_v47 = vld [vmem:[%s506_s28] sm:$0xff]  ;;  %v779_v53 = vsub.s32 1, %v3022_v13  ;;  %vm774_vm2 = vcmp.lt.s32.totalorder %v3086_v55, 16 }
  0x10   : > { %v1637_v48 = vld [vmem:[%s3435_s5] sm:$0xff]  ;;  %v761_v61 = vsub.s32 0, %v3022_v13  ;;  %v1059_v62 = vsub.s32 3, %v3022_v13  ;;  %vm1054_vm3 = vcmp.lt.s32.totalorder %v3086_v55, 1  ;;  %v1242_v63 = vsub.s32 5, %v3022_v13 }
  0x11   : > { %2777 = vmatprep.subr.msk.mxu0 %vm526_vm0, %v3008_v2  ;;  %v614_v14 = vsub.s32 %v611_v12, %v3022_v13  ;;  %v3091_v57 = vld [vmem:[%s3442_s12] sm:$0xff]  ;;  %v3103_v60 = vrot.slane %v3096_v58, %v779_v53  ;;  %vm756_vm4 = vcmp.lt.s32.totalorder %v3086_v55, 17  ;;  %vm1237_vm5 = vcmp.lt.s32.totalorder %v3086_v55, 127 }
  0x12   : > { %2778 = vmatpush1.msk.msra.mxu0 %vm526_vm0, %v3004_v1  ;;  %729 = vperm.xlu1 %2868, %v518_v23   ;;  %v3100_v59 = vrot.slane %v3091_v57, %v779_v53  ;;  %v3118_v10 = vrot.slane %v3091_v57, %v761_v61  ;;  %v3121_v11 = vrot.slane %v3096_v58, %v761_v61  ;;  %vm953_vm6 = vcmp.lt.s32.totalorder %v3086_v55, 15 }
  0x13   : > { %2779 = vmatmul.mubr.msk.f32.vlgmr.msra.gmra.mxu0 %vm522_vm1, %v519_v3  ;;  %v3124_v12 = vrot.slane %v3091_v57, %v1059_v62  ;;  %vm1338_vm7 = vcmp.lt.s32.totalorder %v3086_v55, 113  ;;  %vm1439_vm8 = vcmp.lt.s32.totalorder %v3086_v55, 112  ;;  %vm1540_vm9 = vcmp.lt.s32.totalorder %v3086_v55, 111  ;;  %v2840_v55 = vld [vmem:[%s3438_s8 + $0x40] sm:$0xff] }
  0x14   : > { %862 = vmatprep.mubr.f32.mxu0 %v2895_v0 }
  0x89   : > { %v717_v32 = vpop.permute.xlu1 %716 }
  0x8a   : > { %v724_v37 = vrot.slane %v717_v32, %v614_v14 }
  0x8d   : > { %v730_v35 = vpop.permute.xlu1 %729 }
  0x8e   : > { %v737_v39 = vrot.slane %v730_v35, %v614_v14 }
  0xd3   : > { %v597_v4 = vpop.f32.mrf.mxu0 }
  0xd4   : > { %v602_v6 = vsel %vm526_vm0, %v597_v4, 0.0 }
  0xd5   : > { %v599_v5 = vpop.f32.mrf.mxu0 }
  0xd6   : > { %v603_v7 = vsel %vm526_vm0, %v599_v5, 0.0 }
  0xd7   : > { %v604_v8 = vadd.f32 %v603_v7, %v602_v6  ;;  %v958_v6 = vsub.s32 2, %v3022_v13 }
  0xd9   : > { %605 = vadd.xlane.f32.xlu0 %v604_v8  ;;  %v3147_v22 = vrot.slane %v3091_v57, %v958_v6 }
 0x162   : > { %v606_v15 = vpop.xlane.xlu0 %605 }
 0x163   : > { %v607_v16 = vmul.f32 0.001953125, %v606_v15  ;;  %v2784_v15 = vld [vmem:[%s3434_s4 + $0x8] sm:$0xff] }
 0x165   : > { %v615_v17 = vrot.slane %v607_v16, %v614_v14  ;;  %v3134_v16 = vrot.slane %v3096_v58, %v1242_v63 }
 0x167   : > { %v617_v18 = vsub.f32 %v3004_v1, %v615_v17 }
 0x169   : > { %v618_v19 = vmul.f32 %v617_v18, %v617_v18 }
 0x16b   : > { %v620_v20 = vcombine.high %v618_v19, %v618_v19 }
 0x16d   : > { %2780 = vmatprep.subr.msk.mxu1 %vm526_vm0, %v620_v20 }
 0x16e   : > { %2781 = vmatpush1.msk.msra.mxu1 %vm526_vm0, %v618_v19 }
 0x16f   : > { %2782 = vmatmul.mubr.msk.f32.vlgmr.msra.gmra.mxu1 %vm522_vm1, %v519_v3 }
 0x170   : > { %942 = vmatprep.mubr.f32.mxu1 %v2895_v0 }
 0x22f   : > { %v691_v24 = vpop.f32.mrf.mxu1 }
 0x230   : > { %v696_v26 = vsel %vm526_vm0, %v691_v24, 0.0 }
 0x231   : > { %v693_v25 = vpop.f32.mrf.mxu1 }
 0x232   : > { %v697_v27 = vsel %vm526_vm0, %v693_v25, 0.0 }
 0x233   : > { %v698_v28 = vadd.f32 %v697_v27, %v696_v26  ;;  %v3155_v26 = vrot.slane %v3096_v58, %v958_v6 }
 0x235   : > { %699 = vadd.xlane.f32.xlu0 %v698_v28  ;;  %v769_v28 = vld [vmem:[%s3434_s4] sm:$0xff] }
 0x2be   : > { %v700_v29 = vpop.xlane.xlu0 %699 }
 0x2bf   : > { %v701_v30 = vmul.f32 0.001953125, %v700_v29 }
 0x2c1   : > { %v702_v31 = vadd.f32 1e-05, %v701_v30  ;;  %v3165_v30 = vrot.slane %v3091_v57, %v1242_v63 }
 0x2c3   : > { %2871 = vrsqrt.f32 %v702_v31 }
 0x2d0   : > { %v2872_v33 = vpop.eup %2871 }
 0x2d1   : > { %v711_v34 = vrot.slane %v2872_v33, %v614_v14  ;;  %v3127_v14 = vrot.slane %v3096_v58, %v1059_v62 }
 0x2d3   : > { %v713_v36 = vmul.f32 %v711_v34, %v617_v18  ;;  %v1343_v18 = vsub.s32 6, %v3022_v13  ;;  %v1444_v34 = vsub.s32 7, %v3022_v13  ;;  %v2791_v13 = vld [vmem:[%s3434_s4 + $0x10] sm:$0xff] }
 0x2d5   : > { %v726_v38 = vmul.f32 %v724_v37, %v713_v36  ;;  %v3169_v33 = vrot.slane %v3096_v58, %v1343_v18  ;;  %v3213_v53 = vrot.slane %v3096_v58, %v1444_v34 }
 0x2d7   : > { %v739_v40 = vadd.f32 %v737_v39, %v726_v38 }
 0x2d9   : > { %v2783_v41 = vmul.f32 -1.442695, %v739_v40 }
 0x2db   : > { %2873 = vpow2.f32 %v2783_v41 }
 0x2e8   : > { %v2874_v42 = vpop.eup %2873 }
 0x2e9   : > { %v743_v43 = vadd.f32 1.0, %v2874_v42  ;;  %v2795_v42 = vld [vmem:[%s3434_s4 + $0x18] sm:$0xff] }
 0x2eb   : > { %2875 = vrcp.f32 %v743_v43 }
 0x2f8   : > { %v2876_v44 = vpop.eup %2875 }
 0x2f9   : > { %v3038_v45 = vmul.f32 %v2876_v44, %v739_v40 }
 0x2fb   : > { %750 = vrot.lane.b32.xlu1 %v3038_v45, %s2898_s30  ;;  %770 = vrot.lane.b32.xlu0 %v3038_v45, %s2899_s16  ;;  %v3046_v46 = vcombine.high %v3038_v45, %v3038_v45 }
 0x2ff   : > { %949 = vrot.lane.b32.xlu1 %v3038_v45, %s2900_s17  ;;  %1052 = vrot.lane.b32.xlu0 %v3046_v46, %s2901_s21 }
 0x303   : > { %1050 = vrot.lane.b32.xlu1 %v3038_v45, %s2901_s21  ;;  %1235 = vrot.lane.b32.xlu0 %v3046_v46, %s3446_s22 }
 0x307   : > { %1233 = vrot.lane.b32.xlu1 %v3038_v45, %s3446_s22  ;;  %1336 = vrot.lane.b32.xlu0 %v3046_v46, %s2903_s23 }
 0x30b   : > { %1437 = vrot.lane.b32.xlu0 %v3046_v46, %s3450_s24  ;;  %772 = vrot.lane.b32.xlu1 %v3046_v46, %s2899_s16 }
 0x30f   : > { %1538 = vrot.lane.b32.xlu0 %v3046_v46, %s3448_s25  ;;  %752 = vrot.lane.b32.xlu1 %v3046_v46, %s2898_s30 }
 0x313   : > { %951 = vrot.lane.b32.xlu1 %v3046_v46, %s2900_s17  ;;  %1648 = vperm.xlu0 %2869, %v1645_v47   ;;  %v3198_v47 = vrot.slane %v3091_v57, %v1343_v18  ;;  %v2817_v18 = vld [vmem:[%s3434_s4 + $0x40] sm:$0xff] }
 0x317   : > { %1334 = vrot.lane.b32.xlu1 %v3038_v45, %s2903_s23 }
 0x31b   : > { %1435 = vrot.lane.b32.xlu1 %v3038_v45, %s3450_s24  ;;  %s3452_s24 = smov 127  }
 0x31f   : > { %1536 = vrot.lane.b32.xlu1 %v3038_v45, %s3448_s25  ;;  %s3453_s25 = smov 112  }
 0x323   : > { %1640 = vperm.xlu1 %2868, %v1637_v48  }
 0x36d   : > { %v751_v49 = vpop.permute.xlu1 %750  ;;  %v771_v51 = vpop.permute.xlu0 %770 }
 0x371   : > { %v950_v50 = vpop.permute.xlu1 %949  ;;  %v1053_v54 = vpop.permute.xlu0 %1052 }
 0x375   : > { %v1051_v52 = vpop.permute.xlu1 %1050  ;;  %v1236_v7 = vpop.permute.xlu0 %1235 }
 0x376   : > { %v1055_v19 = vsel %vm1054_vm3, %v1051_v52, %v1053_v54  ;;  %v1056_v23 = vsel %vm1054_vm3, %v1053_v54, %v1051_v52  ;;  %v2799_v54 = vld [vmem:[%s3434_s4 + $0x20] sm:$0xff] }
 0x377   : > { %v1066_v29 = vmul.f32 %v3127_v14, %v1055_v19  ;;  %v1065_v35 = vmul.f32 %v3124_v12, %v1056_v23 }
 0x379   : > { %v1234_v56 = vpop.permute.xlu1 %1233  ;;  %v1337_v31 = vpop.permute.xlu0 %1336 }
 0x37a   : > { %v1239_v27 = vsel %vm1237_vm5, %v1236_v7, %v1234_v56  ;;  %v1238_v36 = vsel %vm1237_vm5, %v1234_v56, %v1236_v7  ;;  %v2803_v56 = vld [vmem:[%s3434_s4 + $0x28] sm:$0xff] }
 0x37b   : > { %v1249_v39 = vmul.f32 %v3134_v16, %v1239_v27  ;;  %v1248_v44 = vmul.f32 %v3165_v30, %v1238_v36 }
 0x37d   : > { %v773_v3 = vpop.permute.xlu1 %772 }
 0x37e   : > { %v775_v4 = vsel %vm774_vm2, %v771_v51, %v773_v3  ;;  %v776_v5 = vsel %vm774_vm2, %v773_v3, %v771_v51  ;;  %v3248_v3 = vld [vmem:[%s3442_s12 + $0x18] ss:$0 sm:$0xff] }
 0x37f   : > { %v785_v8 = vmul.f32 %v3100_v59, %v776_v5  ;;  %v786_v9 = vmul.f32 %v3103_v60, %v775_v4  ;;  %v2807_v4 = vld [vmem:[%s3434_s4 + $0x30] sm:$0xff]  ;;  %v2811_v5 = vld [vmem:[%s3434_s4 + $0x38] sm:$0xff] }
 0x381   : > { %2785 = vmatprep.subr.msk.mxu0 %vm526_vm0, %v786_v9  ;;  %v753_v17 = vpop.permute.xlu1 %752 }
 0x382   : > { %v757_v20 = vsel %vm756_vm4, %v751_v49, %v753_v17  ;;  %v758_v21 = vsel %vm756_vm4, %v753_v17, %v751_v49  ;;  %2786 = vmatpush1.msk.msra.mxu0 %vm526_vm0, %v785_v8  ;;  %v3204_v49 = vrot.slane %v3091_v57, %v1444_v34 }
 0x383   : > { %v767_v24 = vmul.f32 %v3118_v10, %v758_v21  ;;  %v768_v25 = vmul.f32 %v3121_v11, %v757_v20  ;;  %2787 = vmatmul.mubr.msk.f32.vlgmr.msra.gmra.mxu0 %vm522_vm1, %v2784_v15 }
 0x384   : > { %1041 = vmatprep.mubr.f32.mxu0 %v2895_v0 }
 0x385   : > { %2788 = vmatprep.subr.msk.mxu1 %vm526_vm0, %v768_v25  ;;  %v952_v32 = vpop.permute.xlu1 %951 }
 0x386   : > { %v954_v37 = vsel %vm953_vm6, %v950_v50, %v952_v32  ;;  %v955_v38 = vsel %vm953_vm6, %v952_v32, %v950_v50  ;;  %2789 = vmatpush1.msk.msra.mxu1 %vm526_vm0, %v767_v24  ;;  %v1438_v50 = vpop.permute.xlu0 %1437 }
 0x387   : > { %v964_v40 = vmul.f32 %v3147_v22, %v955_v38  ;;  %v965_v41 = vmul.f32 %v3155_v26, %v954_v37  ;;  %2790 = vmatmul.mubr.msk.f32.vlgmr.msra.gmra.mxu1 %vm522_vm1, %v769_v28  ;;  %2796 = vmatprep.subr.msk.mxu1 %vm526_vm0, %v1066_v29 }
 0x388   : > { %2797 = vmatpush1.msk.msra.mxu1 %vm526_vm0, %v1065_v35  ;;  %1142 = vmatprep.mubr.f32.mxu1 %v2895_v0 }
 0x389   : > { %2792 = vmatprep.subr.msk.mxu0 %vm526_vm0, %v965_v41  ;;  %2804 = vmatprep.subr.msk.mxu1 %vm526_vm0, %v1249_v39  ;;  %v1335_v43 = vpop.permute.xlu1 %1334 }
 0x38a   : > { %v1340_v48 = vsel %vm1338_vm7, %v1337_v31, %v1335_v43  ;;  %2793 = vmatpush1.msk.msra.mxu0 %vm526_vm0, %v964_v40  ;;  %v1339_v51 = vsel %vm1338_vm7, %v1335_v43, %v1337_v31  ;;  %v1539_v6 = vpop.permute.xlu0 %1538 }
 0x38b   : > { %v1350_v52 = vmul.f32 %v3169_v33, %v1340_v48  ;;  %2794 = vmatmul.mubr.msk.f32.vlgmr.msra.gmra.mxu0 %vm522_vm1, %v2791_v13  ;;  %2798 = vmatmul.mubr.msk.f32.vlgmr.msra.gmra.mxu1 %vm522_vm1, %v2795_v42  ;;  %v1349_v58 = vmul.f32 %v3198_v47, %v1339_v51 }
 0x38c   : > { %2800 = vmatprep.subr.msk.mxu0 %vm526_vm0, %v3046_v46  ;;  %2805 = vmatpush1.msk.msra.mxu1 %vm526_vm0, %v1248_v44 }
 0x38d   : > { %2801 = vmatpush1.msk.msra.mxu0 %vm526_vm0, %v3038_v45  ;;  %v1436_v57 = vpop.permute.xlu1 %1435  ;;  %1224 = vmatprep.mubr.f32.mxu0 %v2895_v0  ;;  %v3241_v45 = vld [vmem:[%s3442_s12 + $0x10] ss:$0 sm:$0xff] }
 0x38e   : > { %2808 = vmatprep.subr.msk.mxu0 %vm526_vm0, %v1350_v52  ;;  %v1440_v46 = vsel %vm1439_vm8, %v1436_v57, %v1438_v50  ;;  %v1441_v61 = vsel %vm1439_vm8, %v1438_v50, %v1436_v57  ;;  %1325 = vmatprep.mubr.f32.mxu1 %v2895_v0 }
 0x38f   : > { %v1450_v62 = vmul.f32 %v3204_v49, %v1440_v46  ;;  %v1451_v63 = vmul.f32 %v3213_v53, %v1441_v61  ;;  %2802 = vmatmul.mubr.msk.f32.vlgmr.msra.gmra.mxu0 %vm522_vm1, %v2799_v54  ;;  %2806 = vmatmul.mubr.msk.f32.vlgmr.msra.gmra.mxu1 %vm522_vm1, %v2803_v56 }
 0x390   : > { %2809 = vmatpush1.msk.msra.mxu0 %vm526_vm0, %v1349_v58  ;;  %1426 = vmatprep.mubr.f32.mxu0 %v2895_v0 }
 0x391   : > { %2812 = vmatprep.subr.msk.mxu1 %vm526_vm0, %v1451_v63  ;;  %v1537_v7 = vpop.permute.xlu1 %1536  ;;  %1527 = vmatprep.mubr.f32.mxu1 %v2895_v0 }
 0x392   : > { %v1541_v8 = vsel %vm1540_vm9, %v1537_v7, %v1539_v6  ;;  %v1542_v9 = vsel %vm1540_vm9, %v1539_v6, %v1537_v7  ;;  %2813 = vmatpush1.msk.msra.mxu1 %vm526_vm0, %v1450_v62  ;;  %v1649_v6 = vpop.permute.xlu0 %1648 }
 0x393   : > { %v1551_v15 = vmul.f32 %v3241_v45, %v1541_v8  ;;  %v1552_v17 = vmul.f32 %v3248_v3, %v1542_v9  ;;  %2810 = vmatmul.mubr.msk.f32.vlgmr.msra.gmra.mxu0 %vm522_vm1, %v2807_v4  ;;  %2814 = vmatmul.mubr.msk.f32.vlgmr.msra.gmra.mxu1 %vm522_vm1, %v2811_v5  ;;  %v1655_v9 = vld [vmem:[%s3441_s11] sm:$0xff] }
 0x394   : > { %1628 = vmatprep.mubr.f32.mxu0 %v2895_v0  ;;  %1724 = vmatprep.mubr.f32.mxu1 %v2895_v0 }
 0x395   : > { %2818 = vmatprep.subr.msk.mxu0 %vm526_vm0, %v1552_v17 }
 0x396   : > { %2819 = vmatpush1.msk.msra.mxu0 %vm526_vm0, %v1551_v15 }
 0x397   : > { %2820 = vmatmul.mubr.msk.f32.vlgmr.msra.gmra.mxu0 %vm522_vm1, %v2817_v18 }
 0x398   : > { %1803 = vmatprep.mubr.f32.mxu0 %v2895_v0 }
 0x39e   : > { %v1641_v62 = vpop.permute.xlu1 %1640 }
 0x443   : > { %v864_v19 = vpop.f32.mrf.mxu0 }
 0x445   : > { %v866_v21 = vpop.f32.mrf.mxu0 }
 0x447   : > { %v944_v20 = vpop.f32.mrf.mxu1 }
 0x448   : > { %v945_v24 = vadd.f32 %v944_v20, %v864_v19  ;;  %v1653_v19 = vld [vmem:[%s3436_s6] sm:$0xff] }
 0x449   : > { %v946_v23 = vpop.f32.mrf.mxu1 }
 0x44a   : > { %v947_v28 = vadd.f32 %v946_v23, %v866_v21 }
 0x44b   : > { %v1043_v25 = vpop.f32.mrf.mxu0  ;;  %v1144_v27 = vpop.f32.mrf.mxu1 }
 0x44c   : > { %v1048_v29 = vadd.f32 %v1043_v25, %v945_v24 }
 0x44d   : > { %v1045_v31 = vpop.f32.mrf.mxu0  ;;  %v1146_v32 = vpop.f32.mrf.mxu1 }
 0x44e   : > { %v1149_v34 = vadd.f32 %v1144_v27, %v1048_v29  ;;  %v1049_v35 = vadd.f32 %v1045_v31, %v947_v28 }
 0x44f   : > { %v1226_v36 = vpop.f32.mrf.mxu0  ;;  %v1327_v37 = vpop.f32.mrf.mxu1 }
 0x450   : > { %v1150_v38 = vadd.f32 %v1146_v32, %v1049_v35  ;;  %v1231_v39 = vadd.f32 %v1226_v36, %v1149_v34  ;;  %v1654_v32 = vld [vmem:[%s3437_s7] sm:$0xff] }
 0x451   : > { %v1228_v40 = vpop.f32.mrf.mxu0  ;;  %v1329_v41 = vpop.f32.mrf.mxu1 }
 0x452   : > { %v1332_v13 = vadd.f32 %v1327_v37, %v1231_v39  ;;  %v1232_v42 = vadd.f32 %v1228_v40, %v1150_v38 }
 0x453   : > { %v1428_v43 = vpop.f32.mrf.mxu0  ;;  %v1529_v44 = vpop.f32.mrf.mxu1 }
 0x454   : > { %v1333_v48 = vadd.f32 %v1329_v41, %v1232_v42  ;;  %v1433_v50 = vadd.f32 %v1428_v43, %v1332_v13 }
 0x455   : > { %v1430_v51 = vpop.f32.mrf.mxu0  ;;  %v1531_v56 = vpop.f32.mrf.mxu1 }
 0x456   : > { %v1534_v52 = vadd.f32 %v1529_v44, %v1433_v50  ;;  %v1434_v54 = vadd.f32 %v1430_v51, %v1333_v48 }
 0x457   : > { %v1630_v57 = vpop.f32.mrf.mxu0 }
 0x458   : > { %v1535_v58 = vadd.f32 %v1531_v56, %v1434_v54  ;;  %v1635_v46 = vadd.f32 %v1630_v57, %v1534_v52 }
 0x459   : > { %v1632_v61 = vpop.f32.mrf.mxu0 }
 0x45a   : > { %v1636_v63 = vadd.f32 %v1632_v61, %v1535_v58  ;;  %v1643_v4 = vadd.f32 %v1641_v62, %v1635_v46 }
 0x45c   : > { %v1644_v5 = vadd.f32 %v1641_v62, %v1636_v63  ;;  %v1651_v8 = vadd.f32 %v1649_v6, %v1643_v4  ;;  %v2607_v62 = vld [vmem:[%s3439_s9] sm:$0xff] }
 0x45d   : > { %v2616_v63 = vld [vmem:[%s3444_s14] sm:$0xff] }
 0x45e   : > { %v1652_v7 = vadd.f32 %v1649_v6, %v1644_v5 }
 0x460   : > { %1690 = vmatprep.subr.mxu1 %v1652_v7 }
 0x461   : > { %1691 = vmatpush1.msra.mxu1 %v1651_v8 }
 0x462   : > { %2821 = vmatmul.mubr.msk.f32.vlgmr.msra.gmra.mxu1 %vm1656_vm10, %v1655_v9 }
 0x463   : > { %1932 = vmatprep.mubr.f32.mxu1 %v2895_v0 }
 0x522   : > { %v1726_v15 = vpop.f32.mrf.mxu1 }
 0x524   : > { %v1728_v17 = vpop.f32.mrf.mxu1 }
 0x525   : > { %v1731_v18 = vadd.f32 %v1728_v17, %v1726_v15 }
 0x527   : > { %1732 = vadd.xlane.f32.xlu1 %v1731_v18  ;;  %v2825_v18 = vld [vmem:[%s3438_s8 + $0x8] sm:$0xff] }
 0x538   : > { %1820 = vperm.xlu1 %2868, %v1653_v19  }
 0x5b0   : > { %v1733_v20 = vpop.xlane.xlu1 %1732 }
 0x5b1   : > { %v1734_v21 = vmul.f32 0.0009765625, %v1733_v20 }
 0x5b3   : > { %v1735_v23 = vsub.f32 %v1651_v8, %v1734_v21  ;;  %v1736_v24 = vsub.f32 %v1652_v7, %v1734_v21 }
 0x5b4   : > { %v1821_v40 = vpop.permute.xlu1 %1820 }
 0x5b5   : > { %v1737_v25 = vmul.f32 %v1735_v23, %v1735_v23  ;;  %v1738_v27 = vmul.f32 %v1736_v24, %v1736_v24 }
 0x5b7   : > { %1769 = vmatprep.subr.mxu0 %v1738_v27 }
 0x5b8   : > { %1770 = vmatpush1.msra.mxu0 %v1737_v25 }
 0x5b9   : > { %2822 = vmatmul.mubr.msk.f32.vlgmr.msra.gmra.mxu0 %vm1656_vm10, %v1655_v9 }
 0x5ba   : > { %2006 = vmatprep.mubr.f32.mxu0 %v2895_v0 }
 0x679   : > { %v1805_v28 = vpop.f32.mrf.mxu0 }
 0x67b   : > { %v1807_v29 = vpop.f32.mrf.mxu0 }
 0x67c   : > { %v1810_v31 = vadd.f32 %v1807_v29, %v1805_v28 }
 0x67e   : > { %1811 = vadd.xlane.f32.xlu0 %v1810_v31  ;;  %v2828_v31 = vld [vmem:[%s3438_s8 + $0x10] sm:$0xff] }
 0x694   : > { %1827 = vperm.xlu0 %2869, %v1654_v32  }
 0x707   : > { %v1812_v34 = vpop.xlane.xlu0 %1811 }
 0x708   : > { %v1813_v35 = vmul.f32 0.0009765625, %v1812_v34 }
 0x70a   : > { %v1814_v36 = vadd.f32 1e-05, %v1813_v35 }
 0x70c   : > { %2877 = vrsqrt.f32 %v1814_v36  ;;  %v2830_v36 = vld [vmem:[%s3438_s8 + $0x18] sm:$0xff] }
 0x70f   : > { %v1828_v42 = vpop.permute.xlu0 %1827 }
 0x719   : > { %v2878_v37 = vpop.eup %2877 }
 0x71a   : > { %v1816_v38 = vmul.f32 %v2878_v37, %v1735_v23  ;;  %v1817_v39 = vmul.f32 %v2878_v37, %v1736_v24  ;;  %v2832_v37 = vld [vmem:[%s3438_s8 + $0x20] sm:$0xff] }
 0x71c   : > { %v1823_v41 = vmul.f32 %v1821_v40, %v1816_v38  ;;  %v1824_v13 = vmul.f32 %v1821_v40, %v1817_v39 }
 0x71e   : > { %v1830_v43 = vadd.f32 %v1828_v42, %v1823_v41  ;;  %v1831_v44 = vadd.f32 %v1828_v42, %v1824_v13  ;;  %v2834_v13 = vld [vmem:[%s3438_s8 + $0x28] sm:$0xff] }
 0x720   : > { %v2823_v48 = vmul.f32 -1.442695, %v1830_v43  ;;  %v2824_v50 = vmul.f32 -1.442695, %v1831_v44 }
 0x722   : > { %2879 = vpow2.f32 %v2823_v48 }
 0x723   : > { %2881 = vpow2.f32 %v2824_v50  ;;  %v2836_v50 = vld [vmem:[%s3438_s8 + $0x30] sm:$0xff] }
 0x72f   : > { %v2880_v51 = vpop.eup %2879 }
 0x730   : > { %v2882_v52 = vpop.eup %2881  ;;  %v1838_v54 = vadd.f32 1.0, %v2880_v51 }
 0x731   : > { %v1839_v56 = vadd.f32 1.0, %v2882_v52 }
 0x732   : > { %2883 = vrcp.f32 %v1838_v54 }
 0x733   : > { %2885 = vrcp.f32 %v1839_v56  ;;  %v2838_v56 = vld [vmem:[%s3438_s8 + $0x38] sm:$0xff] }
 0x73f   : > { %v2884_v57 = vpop.eup %2883 }
 0x740   : > { %v3290_v58 = vmul.f32 %v2884_v57, %v1830_v43  ;;  %v2886_v46 = vpop.eup %2885 }
 0x741   : > { %v1845_v61 = vmul.f32 %v2886_v46, %v1831_v44 }
 0x742   : > { %1846 = vrot.lane.b32.xlu0 %v3290_v58, %s2898_s30  ;;  %1855 = vrot.lane.b32.xlu1 %v3290_v58, %s2899_s16 }
 0x746   : > { %2013 = vrot.lane.b32.xlu0 %v3290_v58, %s2900_s17  ;;  %1857 = vrot.lane.b32.xlu1 %v1845_v61, %s2899_s16  ;;  %s3454_s16 = smov 111  }
 0x74a   : > { %2099 = vrot.lane.b32.xlu0 %v3290_v58, %s2901_s21  ;;  %1848 = vrot.lane.b32.xlu1 %v1845_v61, %s2898_s30 }
 0x74e   : > { %2263 = vrot.lane.b32.xlu0 %v3290_v58, %s3452_s24  ;;  %2015 = vrot.lane.b32.xlu1 %v1845_v61, %s2900_s17 }
 0x752   : > { %2349 = vrot.lane.b32.xlu0 %v3290_v58, %s2903_s23  ;;  %2101 = vrot.lane.b32.xlu1 %v1845_v61, %s2901_s21 }
 0x756   : > { %2435 = vrot.lane.b32.xlu0 %v3290_v58, %s3453_s25  ;;  %2265 = vrot.lane.b32.xlu1 %v1845_v61, %s3452_s24 }
 0x75a   : > { %2521 = vrot.lane.b32.xlu0 %v3290_v58, %s3454_s16  ;;  %2351 = vrot.lane.b32.xlu1 %v1845_v61, %s2903_s23 }
 0x75e   : > { %2610 = vperm.xlu0 %2869, %v2607_v62   ;;  %2437 = vrot.lane.b32.xlu1 %v1845_v61, %s3453_s25  ;;  %s2848_s25 = sshll.u32 %s3456_s19, 4 }
 0x75f   : > { %s511_s28 = scalar_lea.vmem %s3445_s15, %s2848_s25 }
 0x762   : > { %2523 = vrot.lane.b32.xlu1 %v1845_v61, %s3454_s16 }
 0x766   : > { %2619 = vperm.xlu1 %2868, %v2616_v63  }
 0x7b4   : > { %v1847_v4 = vpop.permute.xlu0 %1846  ;;  %v1856_v5 = vpop.permute.xlu1 %1855 }
 0x7b8   : > { %v2014_v6 = vpop.permute.xlu0 %2013  ;;  %v1858_v7 = vpop.permute.xlu1 %1857 }
 0x7b9   : > { %v1859_v8 = vsel %vm774_vm2, %v1856_v5, %v1858_v7  ;;  %v1860_v9 = vsel %vm774_vm2, %v1858_v7, %v1856_v5 }
 0x7ba   : > { %v1861_v15 = vmul.f32 %v1860_v9, %v3100_v59  ;;  %v1862_v17 = vmul.f32 %v1859_v8, %v3103_v60  ;;  %v1854_v60 = vld [vmem:[%s3438_s8] sm:$0xff] }
 0x7bc   : > { %v2100_v19 = vpop.permute.xlu0 %2099  ;;  %1898 = vmatprep.subr.mxu1 %v1862_v17  ;;  %v1849_v20 = vpop.permute.xlu1 %1848 }
 0x7bd   : > { %v1850_v21 = vsel %vm756_vm4, %v1847_v4, %v1849_v20  ;;  %v1851_v23 = vsel %vm756_vm4, %v1849_v20, %v1847_v4  ;;  %1899 = vmatpush1.msra.mxu1 %v1861_v15 }
 0x7be   : > { %v1852_v24 = vmul.f32 %v1851_v23, %v3118_v10  ;;  %v1853_v59 = vmul.f32 %v1850_v21, %v3121_v11  ;;  %2826 = vmatmul.mubr.msk.f32.vlgmr.msra.gmra.mxu1 %vm1656_vm10, %v2825_v18 }
 0x7bf   : > { %2090 = vmatprep.mubr.f32.mxu1 %v2895_v0 }
 0x7c0   : > { %1972 = vmatprep.subr.mxu0 %v1853_v59  ;;  %v2016_v25 = vpop.permute.xlu1 %2015  ;;  %v2264_v10 = vpop.permute.xlu0 %2263 }
 0x7c1   : > { %v2017_v27 = vsel %vm953_vm6, %v2014_v6, %v2016_v25  ;;  %v2018_v28 = vsel %vm953_vm6, %v2016_v25, %v2014_v6  ;;  %1973 = vmatpush1.msra.mxu0 %v1852_v24 }
 0x7c2   : > { %v2019_v11 = vmul.f32 %v2018_v28, %v3147_v22  ;;  %v2020_v29 = vmul.f32 %v2017_v27, %v3155_v26  ;;  %2827 = vmatmul.mubr.msk.f32.vlgmr.msra.gmra.mxu0 %vm1656_vm10, %v1854_v60 }
 0x7c3   : > { %2176 = vmatprep.mubr.f32.mxu0 %v2895_v0 }
 0x7c4   : > { %2056 = vmatprep.subr.mxu1 %v2020_v29  ;;  %v2102_v32 = vpop.permute.xlu1 %2101  ;;  %v2350_v38 = vpop.permute.xlu0 %2349 }
 0x7c5   : > { %v2103_v34 = vsel %vm1054_vm3, %v2100_v19, %v2102_v32  ;;  %v2104_v35 = vsel %vm1054_vm3, %v2102_v32, %v2100_v19  ;;  %2057 = vmatpush1.msra.mxu1 %v2019_v11 }
 0x7c6   : > { %v2105_v22 = vmul.f32 %v2104_v35, %v3124_v12  ;;  %v2106_v26 = vmul.f32 %v2103_v34, %v3127_v14  ;;  %2220 = vmatprep.subr.mxu1 %v1845_v61  ;;  %2829 = vmatmul.mubr.msk.f32.vlgmr.msra.gmra.mxu1 %vm1656_vm10, %v2828_v31 }
 0x7c7   : > { %2221 = vmatpush1.msra.mxu1 %v3290_v58  ;;  %2254 = vmatprep.mubr.f32.mxu1 %v2895_v0 }
 0x7c8   : > { %2142 = vmatprep.subr.mxu0 %v2106_v26  ;;  %v2266_v12 = vpop.permute.xlu1 %2265 }
 0x7c9   : > { %v2267_v14 = vsel %vm1237_vm5, %v2264_v10, %v2266_v12  ;;  %v2268_v39 = vsel %vm1237_vm5, %v2266_v12, %v2264_v10  ;;  %2143 = vmatpush1.msra.mxu0 %v2105_v22 }
 0x7ca   : > { %v2269_v40 = vmul.f32 %v2267_v14, %v3165_v30  ;;  %v2270_v41 = vmul.f32 %v2268_v39, %v3134_v16  ;;  %2831 = vmatmul.mubr.msk.f32.vlgmr.msra.gmra.mxu0 %vm1656_vm10, %v2830_v36  ;;  %2833 = vmatmul.mubr.msk.f32.vlgmr.msra.gmra.mxu1 %vm1656_vm10, %v2832_v37  ;;  %v2436_v30 = vpop.permute.xlu0 %2435 }
 0x7cb   : > { %2340 = vmatprep.mubr.f32.mxu0 %v2895_v0  ;;  %2426 = vmatprep.mubr.f32.mxu1 %v2895_v0 }
 0x7cc   : > { %2306 = vmatprep.subr.mxu0 %v2270_v41  ;;  %v2352_v42 = vpop.permute.xlu1 %2351 }
 0x7cd   : > { %v2353_v43 = vsel %vm1338_vm7, %v2350_v38, %v2352_v42  ;;  %v2354_v16 = vsel %vm1338_vm7, %v2352_v42, %v2350_v38  ;;  %2307 = vmatpush1.msra.mxu0 %v2269_v40 }
 0x7ce   : > { %v2355_v44 = vmul.f32 %v2353_v43, %v3198_v47  ;;  %v2356_v48 = vmul.f32 %v2354_v16, %v3169_v33  ;;  %2835 = vmatmul.mubr.msk.f32.vlgmr.msra.gmra.mxu0 %vm1656_vm10, %v2834_v13  ;;  %v2522_v57 = vpop.permute.xlu0 %2521 }
 0x7cf   : > { %2512 = vmatprep.mubr.f32.mxu0 %v2895_v0 }
 0x7d0   : > { %2392 = vmatprep.subr.mxu1 %v2356_v48  ;;  %v2438_v51 = vpop.permute.xlu1 %2437 }
 0x7d1   : > { %v2439_v52 = vsel %vm1439_vm8, %v2436_v30, %v2438_v51  ;;  %v2440_v54 = vsel %vm1439_vm8, %v2438_v51, %v2436_v30  ;;  %2393 = vmatpush1.msra.mxu1 %v2355_v44 }
 0x7d2   : > { %v2441_v47 = vmul.f32 %v2439_v52, %v3204_v49  ;;  %v2442_v33 = vmul.f32 %v2440_v54, %v3213_v53  ;;  %2837 = vmatmul.mubr.msk.f32.vlgmr.msra.gmra.mxu1 %vm1656_vm10, %v2836_v50 }
 0x7d3   : > { %2598 = vmatprep.mubr.f32.mxu1 %v2895_v0 }
 0x7d4   : > { %2478 = vmatprep.subr.mxu0 %v2442_v33  ;;  %v2524_v58 = vpop.permute.xlu1 %2523 }
 0x7d5   : > { %v2525_v46 = vsel %vm1540_vm9, %v2522_v57, %v2524_v58  ;;  %v2526_v61 = vsel %vm1540_vm9, %v2524_v58, %v2522_v57  ;;  %2479 = vmatpush1.msra.mxu0 %v2441_v47 }
 0x7d6   : > { %v2527_v49 = vmul.f32 %v3241_v45, %v2525_v46  ;;  %v2528_v53 = vmul.f32 %v3248_v3, %v2526_v61  ;;  %2839 = vmatmul.mubr.msk.f32.vlgmr.msra.gmra.mxu0 %vm1656_vm10, %v2838_v56  ;;  %2842 = vmatprep.subr.msk.mxu0 %vm526_vm0, %v3008_v2  ;;  %v2615_v45 = vld [vmem:[%s3443_s13] sm:$0xff] }
 0x7d7   : > { %2843 = vmatpush1.msk.msra.mxu0 %vm526_vm0, %v3004_v1  ;;  %2689 = vmatprep.mubr.f32.mxu0 %v2895_v0 }
 0x7d8   : > { %2564 = vmatprep.subr.mxu1 %v2528_v53 }
 0x7d9   : > { %2565 = vmatpush1.msra.mxu1 %v2527_v49  ;;  %v2611_v35 = vpop.permute.xlu0 %2610 }
 0x7da   : > { %2841 = vmatmul.mubr.msk.f32.vlgmr.msra.gmra.mxu1 %vm1656_vm10, %v2840_v55  ;;  %2844 = vmatmul.mubr.msk.f32.vlgmr.msra.gmra.mxu0 %vm522_vm1, %v2615_v45 }
 0x7e1   : > { %v2620_v22 = vpop.permute.xlu1 %2619 }
 0x87e   : > { %v1934_v2 = vpop.f32.mrf.mxu1 }
 0x880   : > { %v1936_v62 = vpop.f32.mrf.mxu1 }
 0x882   : > { %v2008_v3 = vpop.f32.mrf.mxu0 }
 0x883   : > { %v2009_v1 = vadd.f32 %v2008_v3, %v1934_v2 }
 0x884   : > { %v2010_v63 = vpop.f32.mrf.mxu0 }
 0x885   : > { %v2011_v0 = vadd.f32 %v2010_v63, %v1936_v62 }
 0x886   : > { %v2092_v4 = vpop.f32.mrf.mxu1 }
 0x887   : > { %v2097_v5 = vadd.f32 %v2092_v4, %v2009_v1 }
 0x888   : > { %v2094_v6 = vpop.f32.mrf.mxu1 }
 0x889   : > { %v2098_v7 = vadd.f32 %v2094_v6, %v2011_v0 }
 0x88a   : > { %v2178_v8 = vpop.f32.mrf.mxu0  ;;  %v2256_v9 = vpop.f32.mrf.mxu1 }
 0x88b   : > { %v2183_v15 = vadd.f32 %v2178_v8, %v2097_v5 }
 0x88c   : > { %v2180_v17 = vpop.f32.mrf.mxu0  ;;  %v2258_v21 = vpop.f32.mrf.mxu1 }
 0x88d   : > { %v2184_v18 = vadd.f32 %v2180_v17, %v2098_v7  ;;  %v2261_v19 = vadd.f32 %v2256_v9, %v2183_v15 }
 0x88e   : > { %v2342_v20 = vpop.f32.mrf.mxu0 }
 0x88f   : > { %v2347_v23 = vadd.f32 %v2342_v20, %v2261_v19  ;;  %v2262_v24 = vadd.f32 %v2258_v21, %v2184_v18 }
 0x890   : > { %v2344_v59 = vpop.f32.mrf.mxu0 }
 0x891   : > { %v2348_v25 = vadd.f32 %v2344_v59, %v2262_v24 }
 0x892   : > { %v2428_v60 = vpop.f32.mrf.mxu1 }
 0x893   : > { %v2433_v27 = vadd.f32 %v2428_v60, %v2347_v23 }
 0x894   : > { %v2430_v10 = vpop.f32.mrf.mxu1 }
 0x895   : > { %v2434_v31 = vadd.f32 %v2430_v10, %v2348_v25 }
 0x896   : > { %v2514_v28 = vpop.f32.mrf.mxu0 }
 0x897   : > { %v2519_v29 = vadd.f32 %v2514_v28, %v2433_v27 }
 0x898   : > { %v2516_v11 = vpop.f32.mrf.mxu0 }
 0x899   : > { %v2520_v26 = vadd.f32 %v2516_v11, %v2434_v31 }
 0x89a   : > { %v2600_v32 = vpop.f32.mrf.mxu1  ;;  %v2691_v34 = vpop.f32.mrf.mxu0 }
 0x89b   : > { %v2605_v36 = vadd.f32 %v2600_v32, %v2519_v29  ;;  %v2692_v14 = vadd.f32 %v2691_v34, %v2620_v22 }
 0x89c   : > { %v2602_v37 = vpop.f32.mrf.mxu1  ;;  %v2693_v38 = vpop.f32.mrf.mxu0 }
 0x89d   : > { %v2613_v12 = vadd.f32 %v2611_v35, %v2605_v36  ;;  %v2606_v39 = vadd.f32 %v2602_v37, %v2520_v26  ;;  %v2694_v13 = vadd.f32 %v2693_v38, %v2620_v22 }
 0x89f   : > { %v2696_v40 = vadd.f32 %v2692_v14, %v2613_v12  ;;  %v2614_v41 = vadd.f32 %v2611_v35, %v2606_v39 }
 0x8a1   : > { %2698 = vst [vmem:[%s511_s28] sm:$0xff] %v2696_v40  ;;  %v2697_v42 = vadd.f32 %v2694_v13, %v2614_v41 }
 0x8a3   : > { %2699 = vst [vmem:[%s511_s28 + $0x8] sm:$0xff] %v2697_v42 }
 0x8a4 PF: > { %s25_s18 = sadd.s32 1, %s2893_s18  }
 0x8a5   : > { %p22_p4 = scmp.ge.s32.totalorder %s25_s18, 4  }
 0x8a7   :  { %24 = sbr.rel (!%p22_p4) target bundleno = 1 (0x1), region = 129 }

// kernel: resnet_down_apply.3
= control target key start
LH: loop header
LB: loop body
LE: loop exit
PB: predicated region body
PF: predicated region fallthrough
CT: control target
= control target key end

     0   :  { %s3438_s24 = smov 0   ;;  %s4006_s0 = inlined_call_operand.vmem [shape: f32[2,8,256], index: 0, kind: input, shape index: {}]   ;;  %s4007_s1 = inlined_call_operand.vmem [shape: f32[2,8,1], index: 1, kind: input, shape index: {}]   ;;  %s4008_s2 = inlined_call_operand.vmem [shape: f32[8,1], index: 2, kind: input, shape index: {}]   ;;  %s4009_s3 = inlined_call_operand.vmem [shape: f32[8,1], index: 3, kind: input, shape index: {}]   ;;  %s4010_s4 = inlined_call_operand.vmem [shape: f32[9,8,8], index: 4, kind: input, shape index: {}]   ;;  %s4011_s5 = inlined_call_operand.vmem [shape: f32[8,1], index: 5, kind: input, shape index: {}]   ;;  %s4012_s6 = inlined_call_operand.vmem [shape: f32[8,1], index: 6, kind: input, shape index: {}]   ;;  %s4013_s7 = inlined_call_operand.vmem [shape: f32[8,1], index: 7, kind: input, shape index: {}]   ;;  %s4014_s8 = inlined_call_operand.vmem [shape: f32[9,8,8], index: 8, kind: input, shape index: {}]   ;;  %s4015_s9 = inlined_call_operand.vmem [shape: f32[8,1], index: 9, kind: input, shape index: {}]   ;;  %s4016_s10 = inlined_call_operand.vmem [shape: f32[8,8], index: 10, kind: input, shape index: {}, may-alias: {10,11}]   ;;  %s4017_s11 = inlined_call_operand.vmem [shape: f32[8,8], index: 11, kind: input, shape index: {}, may-alias: {10,11}]   ;;  %s4018_s12 = inlined_call_operand.vmem [shape: f32[9,256], index: 12, kind: input, shape index: {}]   ;;  %s4019_s13 = inlined_call_operand.vmem [shape: f32[4,8,8], index: 13, kind: input, shape index: {}]   ;;  %s4020_s14 = inlined_call_operand.vmem [shape: f32[8,1], index: 14, kind: input, shape index: {}]   ;;  %s4021_s15 = inlined_call_operand.vmem [shape: f32[10,256], index: 15, kind: input, shape index: {}]   ;;  %s4022_s16 = inlined_call_operand.vmem [shape: f32[2,8,256], index: 16, kind: output, shape index: {0}]   ;;  %s4023_s17 = inlined_call_operand.vmem [shape: f32[2,8,64], index: 17, kind: output, shape index: {1}]  }
   0x1   :  { %4033 = sst [smem:[#allocation2_spill]] %s4006_s0 }
   0x2   :  { %4034 = sst [smem:[#allocation3_spill]] %s4007_s1 }
   0x3 LB: > { %s3214_s25 = sadd.s32 4294967295, %s3331_s24   ;;  %p3218_p0 = scmp.ge.s32.totalorder %s3331_s24, 1  ;;  %s3331_s24 = sphi %s3438_s24, %s28_s24  }
   0x4   : > { %p499_p1 = scmp.lt.s32.totalorder %s3331_s24, 3 }
   0x6   : > { %p500_p2 = pnand %p3218_p0, %p499_p1 }
   0x7   : > { %p559_p3 = scmp.lt.s32.totalorder (!%p500_p2), %s3214_s25, 1  ;;  %s4035_s29 = sld [smem:[#allocation2_spill]] (!%p500_p2) }
   0x8   : > { %503 = sbr.rel (%p500_p2) target bundleno = 3700 (0xe74), region = 84  ;;  %s3335_s22 = smov (!%p500_p2), 16  }
   0x9   : > { %s4027_s23 = smov (!%p500_p2), 1   ;;  %s3337_s27 = smov (!%p500_p2), 17  }
   0xa   : > { %s3338_s28 = smov (!%p500_p2), 127   ;;  %s4031_s30 = smov (!%p500_p2), 112  }
   0xb   : > { %s4029_s18 = smov (!%p500_p2), 111   ;;  %s4036_s21 = sld [smem:[#allocation3_spill]] (!%p500_p2) }
   0xc   : > { %s4039_s1 = smov (!%p500_p2), 112   ;;  %s4040_s20 = smov (!%p500_p2), 111  }
   0xd   : > { %v3333_v0 = vmov 0.0   ;;  %s4043_s25 = smov (!%p559_p3, %s3214_s25), 1  ;;  %v585_v3 = vld [vmem:[%s4016_s10] sm:$0xff]  ;;  %vm586_vm0 = vcmask 64512   ;;  %v3334_v14 = vmov 0   ;;  %v780_v43 = vlaneseq  ;;  %v3539_v48 = vld [vmem:[%s4018_s12 + $0x8] sm:$0xff] }
   0xe   : > { %654 = vmatprep.mubr.f32.mxu0 %v3333_v0  ;;  %733 = vmatprep.mubr.f32.mxu1 %v3333_v0  ;;  %s4024_s26 = sshll.u32 %s4043_s25, 4  ;;  %v583_v13 = vld [vmem:[%s4008_s2] sm:$0xff]  ;;  %s3221_s19 = sshll.u32 %s4043_s25, 3  ;;  %v3229_v58 = vld [vmem:[%s4010_s4 + $0x8] sm:$0xff] }
   0xf   : > { %s563_s0 = scalar_lea.vmem %s4035_s29, %s4024_s26  ;;  %3303 = vset.pattern.permute.xlu1 %v3334_v14  ;;  %3304 = vset.pattern.permute.xlu0 %v3334_v14  ;;  %v584_v15 = vld [vmem:[%s4009_s3] sm:$0xff]  ;;  %s3339_s29 = smov 113   ;;  %v3524_v44 = vshrl.u32 %v780_v43, 7  ;;  %v3526_v45 = vand.u32 127, %v780_v43  ;;  %v3238_v43 = vld [vmem:[%s4010_s4 + $0x28] sm:$0xff] }
  0x10   : > { %v3456_v1 = vld [vmem:[%s563_s0 + $0x8] sm:$0xff]  ;;  %v3458_v2 = vld [vmem:[%s563_s0] sm:$0xff]  ;;  %750 = vperm.xlu1 %3303, %v583_v13   ;;  %s4025_s0 = smov 15  }
  0x11   : > { %620 = vmatprep.subr.mxu0 %v3456_v1  ;;  %s567_s26 = scalar_lea.vmem %s4036_s21, %s3221_s19  ;;  %v1611_v41 = vld [vmem:[%s4011_s5] sm:$0xff]  ;;  %v3529_v46 = vsub.s32 1, %v3524_v44  ;;  %vm800_vm1 = vcmp.lt.s32.totalorder %v3526_v45, 16  ;;  %v3557_v57 = vsub.s32 0, %v3524_v44  ;;  %vm782_vm2 = vcmp.lt.s32.totalorder %v3526_v45, 17  ;;  %s4038_s21 = smov 1  }
  0x12   : > { %621 = vmatpush1.msra.mxu0 %v3458_v2  ;;  %v1619_v42 = vld [vmem:[%s567_s26] sm:$0xff]  ;;  %vm967_vm3 = vcmp.lt.s32.totalorder %v3526_v45, 15  ;;  %vm1062_vm4 = vcmp.lt.s32.totalorder %v3526_v45, 1  ;;  %vm1235_vm5 = vcmp.lt.s32.totalorder %v3526_v45, 127  ;;  %vm1330_vm6 = vcmp.lt.s32.totalorder %v3526_v45, 113  ;;  %s3346_s26 = smov 96  }
  0x13   : > { %3225 = vmatmul.mubr.msk.f32.vlgmr.msra.gmra.mxu0 %vm586_vm0, %v585_v3  ;;  %v3534_v47 = vld [vmem:[%s4018_s12] sm:$0xff]  ;;  %v3548_v50 = vrot.slane %v3539_v48, %v3529_v46  ;;  %v3569_v61 = vrot.slane %v3539_v48, %v3557_v57  ;;  %vm1425_vm7 = vcmp.lt.s32.totalorder %v3526_v45, 112  ;;  %vm1520_vm8 = vcmp.lt.s32.totalorder %v3526_v45, 111 }
  0x14   : > { %882 = vmatprep.mubr.f32.mxu0 %v3333_v0  ;;  %757 = vperm.xlu1 %3303, %v584_v15   ;;  %v3544_v49 = vrot.slane %v3534_v47, %v3529_v46  ;;  %v3565_v60 = vrot.slane %v3534_v47, %v3557_v57  ;;  %vm2948_vm13 = vcmp.lt.s32.totalorder %v3526_v45, 126 }
  0x8b   : > { %v751_v22 = vpop.permute.xlu1 %750 }
  0x8f   : > { %v758_v28 = vpop.permute.xlu1 %757 }
  0xd3   : > { %v656_v4 = vpop.f32.mrf.mxu0 }
  0xd5   : > { %v658_v5 = vpop.f32.mrf.mxu0 }
  0xd6   : > { %v661_v6 = vadd.f32 %v658_v5, %v656_v4 }
  0xd8   : > { %662 = vadd.xlane.f32.xlu0 %v661_v6  ;;  %v3580_v6 = vsub.s32 2, %v3524_v44 }
 0x161   : > { %v663_v7 = vpop.xlane.xlu0 %662 }
 0x162   : > { %v664_v8 = vmul.f32 0.0009765625, %v663_v7  ;;  %v795_v7 = vld [vmem:[%s4010_s4] sm:$0xff] }
 0x164   : > { %v665_v9 = vsub.f32 %v3458_v2, %v664_v8  ;;  %v666_v10 = vsub.f32 %v3456_v1, %v664_v8 }
 0x166   : > { %v668_v11 = vmul.f32 %v666_v10, %v666_v10  ;;  %v667_v12 = vmul.f32 %v665_v9, %v665_v9 }
 0x168   : > { %699 = vmatprep.subr.mxu1 %v668_v11  ;;  %v3592_v11 = vrot.slane %v3539_v48, %v3580_v6 }
 0x169   : > { %700 = vmatpush1.msra.mxu1 %v667_v12  ;;  %v3595_v12 = vsub.s32 3, %v3524_v44 }
 0x16a   : > { %3226 = vmatmul.mubr.msk.f32.vlgmr.msra.gmra.mxu1 %vm586_vm0, %v585_v3 }
 0x16b   : > { %956 = vmatprep.mubr.f32.mxu1 %v3333_v0 }
 0x22a   : > { %v735_v16 = vpop.f32.mrf.mxu1 }
 0x22c   : > { %v737_v17 = vpop.f32.mrf.mxu1 }
 0x22d   : > { %v740_v18 = vadd.f32 %v737_v17, %v735_v16  ;;  %v3605_v17 = vsub.s32 5, %v3524_v44 }
 0x22f   : > { %741 = vadd.xlane.f32.xlu0 %v740_v18 }
 0x2b8   : > { %v742_v19 = vpop.xlane.xlu0 %741 }
 0x2b9   : > { %v743_v20 = vmul.f32 0.0009765625, %v742_v19 }
 0x2bb   : > { %v744_v21 = vadd.f32 1e-05, %v743_v20 }
 0x2bd   : > { %3305 = vrsqrt.f32 %v744_v21  ;;  %v3611_v21 = vrot.slane %v3534_v47, %v3595_v12 }
 0x2ca   : > { %v3306_v23 = vpop.eup %3305 }
 0x2cb   : > { %v746_v24 = vmul.f32 %v3306_v23, %v665_v9  ;;  %v747_v25 = vmul.f32 %v3306_v23, %v666_v10  ;;  %v3588_v10 = vrot.slane %v3534_v47, %v3580_v6  ;;  %v3232_v23 = vld [vmem:[%s4010_s4 + $0x10] sm:$0xff] }
 0x2cd   : > { %v753_v26 = vmul.f32 %v751_v22, %v746_v24  ;;  %v754_v27 = vmul.f32 %v751_v22, %v747_v25  ;;  %v3615_v22 = vrot.slane %v3539_v48, %v3595_v12 }
 0x2cf   : > { %v760_v29 = vadd.f32 %v758_v28, %v753_v26  ;;  %v761_v30 = vadd.f32 %v758_v28, %v754_v27  ;;  %v3626_v27 = vrot.slane %v3534_v47, %v3605_v17  ;;  %v3629_v28 = vsub.s32 6, %v3524_v44 }
 0x2d1   : > { %v3227_v31 = vmul.f32 -1.442695, %v760_v29  ;;  %v3228_v32 = vmul.f32 -1.442695, %v761_v30 }
 0x2d3   : > { %3307 = vpow2.f32 %v3227_v31  ;;  %v3638_v31 = vrot.slane %v3539_v48, %v3605_v17 }
 0x2d4   : > { %3309 = vpow2.f32 %v3228_v32  ;;  %v3234_v32 = vld [vmem:[%s4010_s4 + $0x18] sm:$0xff] }
 0x2e0   : > { %v3308_v33 = vpop.eup %3307 }
 0x2e1   : > { %v3310_v34 = vpop.eup %3309  ;;  %v768_v35 = vadd.f32 1.0, %v3308_v33  ;;  %v3236_v33 = vld [vmem:[%s4010_s4 + $0x20] sm:$0xff] }
 0x2e2   : > { %v769_v36 = vadd.f32 1.0, %v3310_v34 }
 0x2e3   : > { %3311 = vrcp.f32 %v768_v35 }
 0x2e4   : > { %3313 = vrcp.f32 %v769_v36 }
 0x2f0   : > { %v3312_v37 = vpop.eup %3311 }
 0x2f1   : > { %v3314_v38 = vpop.eup %3313  ;;  %v3479_v39 = vmul.f32 %v3312_v37, %v760_v29 }
 0x2f2   : > { %v3481_v40 = vmul.f32 %v3314_v38, %v761_v30  ;;  %v3655_v38 = vrot.slane %v3534_v47, %v3629_v28 }
 0x2f3   : > { %796 = vrot.lane.b32.xlu0 %v3479_v39, %s3335_s22 }
 0x2f4   : > { %798 = vrot.lane.b32.xlu1 %v3481_v40, %s3335_s22 }
 0x2f7   : > { %1060 = vrot.lane.b32.xlu0 %v3481_v40, %s4027_s23 }
 0x2f8   : > { %776 = vrot.lane.b32.xlu1 %v3479_v39, %s3337_s27 }
 0x2fb   : > { %1233 = vrot.lane.b32.xlu0 %v3481_v40, %s3338_s28 }
 0x2fc   : > { %778 = vrot.lane.b32.xlu1 %v3481_v40, %s3337_s27 }
 0x2ff   : > { %1328 = vrot.lane.b32.xlu0 %v3481_v40, %s3339_s29 }
 0x300   : > { %963 = vrot.lane.b32.xlu1 %v3479_v39, %s4025_s0 }
 0x303   : > { %1423 = vrot.lane.b32.xlu0 %v3481_v40, %s4031_s30 }
 0x304   : > { %965 = vrot.lane.b32.xlu1 %v3481_v40, %s4025_s0 }
 0x307   : > { %1518 = vrot.lane.b32.xlu0 %v3481_v40, %s4029_s18 }
 0x308   : > { %1058 = vrot.lane.b32.xlu1 %v3479_v39, %s4027_s23 }
 0x30b   : > { %1622 = vperm.xlu0 %3304, %v1619_v42   ;;  %v3666_v42 = vsub.s32 7, %v3524_v44 }
 0x30c   : > { %1231 = vrot.lane.b32.xlu1 %v3479_v39, %s3338_s28 }
 0x310   : > { %1326 = vrot.lane.b32.xlu1 %v3479_v39, %s3339_s29 }
 0x314   : > { %1421 = vrot.lane.b32.xlu1 %v3479_v39, %s4031_s30 }
 0x318   : > { %1516 = vrot.lane.b32.xlu1 %v3479_v39, %s4029_s18  ;;  %s4037_s18 = smov 15  }
 0x31c   : > { %1614 = vperm.xlu1 %3303, %v1611_v41   ;;  %v3661_v41 = vrot.slane %v3539_v48, %v3629_v28 }
 0x365   : > { %v797_v51 = vpop.permute.xlu0 %796 }
 0x366   : > { %v799_v52 = vpop.permute.xlu1 %798 }
 0x367   : > { %v801_v53 = vsel %vm800_vm1, %v797_v51, %v799_v52  ;;  %v802_v54 = vsel %vm800_vm1, %v799_v52, %v797_v51 }
 0x368   : > { %v811_v55 = vmul.f32 %v3544_v49, %v802_v54  ;;  %v812_v56 = vmul.f32 %v3548_v50, %v801_v53 }
 0x369   : > { %v1061_v8 = vpop.permute.xlu0 %1060 }
 0x36a   : > { %v777_v59 = vpop.permute.xlu1 %776  ;;  %848 = vmatprep.subr.mxu0 %v812_v56 }
 0x36b   : > { %849 = vmatpush1.msra.mxu0 %v811_v55 }
 0x36c   : > { %3230 = vmatmul.mubr.msk.f32.vlgmr.msra.gmra.mxu0 %vm586_vm0, %v3229_v58  ;;  %v3682_v58 = vrot.slane %v3534_v47, %v3666_v42 }
 0x36d   : > { %1049 = vmatprep.mubr.f32.mxu0 %v3333_v0  ;;  %v1234_v18 = vpop.permute.xlu0 %1233 }
 0x36e   : > { %v779_v62 = vpop.permute.xlu1 %778 }
 0x36f   : > { %v783_v63 = vsel %vm782_vm2, %v777_v59, %v779_v62  ;;  %v784_v3 = vsel %vm782_vm2, %v779_v62, %v777_v59  ;;  %v3686_v59 = vrot.slane %v3539_v48, %v3666_v42  ;;  %v3240_v62 = vld [vmem:[%s4010_s4 + $0x30] sm:$0xff] }
 0x370   : > { %v793_v4 = vmul.f32 %v3565_v60, %v784_v3  ;;  %v794_v5 = vmul.f32 %v3569_v61, %v783_v63 }
 0x371   : > { %v1329_v34 = vpop.permute.xlu0 %1328 }
 0x372   : > { %922 = vmatprep.subr.mxu1 %v794_v5  ;;  %v964_v9 = vpop.permute.xlu1 %963  ;;  %v3704_v5 = vld [vmem:[%s4018_s12 + $0x10] ss:$0 sm:$0xff] }
 0x373   : > { %923 = vmatpush1.msra.mxu1 %v793_v4 }
 0x374   : > { %3231 = vmatmul.mubr.msk.f32.vlgmr.msra.gmra.mxu1 %vm586_vm0, %v795_v7  ;;  %v3709_v7 = vld [vmem:[%s4018_s12 + $0x18] ss:$0 sm:$0xff] }
 0x375   : > { %1144 = vmatprep.mubr.f32.mxu1 %v3333_v0  ;;  %v1424_v54 = vpop.permute.xlu0 %1423 }
 0x376   : > { %v966_v13 = vpop.permute.xlu1 %965 }
 0x377   : > { %v968_v15 = vsel %vm967_vm3, %v964_v9, %v966_v13  ;;  %v969_v16 = vsel %vm967_vm3, %v966_v13, %v964_v9 }
 0x378   : > { %v978_v19 = vmul.f32 %v3588_v10, %v969_v16  ;;  %v979_v20 = vmul.f32 %v3592_v11, %v968_v15 }
 0x379   : > { %v1519_v9 = vpop.permute.xlu0 %1518 }
 0x37a   : > { %v1059_v24 = vpop.permute.xlu1 %1058  ;;  %1015 = vmatprep.subr.mxu0 %v979_v20  ;;  %v3246_v20 = vld [vmem:[%s4010_s4 + $0x40] sm:$0xff] }
 0x37b   : > { %v1063_v25 = vsel %vm1062_vm4, %v1059_v24, %v1061_v8  ;;  %v1064_v26 = vsel %vm1062_vm4, %v1061_v8, %v1059_v24  ;;  %1016 = vmatpush1.msra.mxu0 %v978_v19  ;;  %v3242_v8 = vld [vmem:[%s4010_s4 + $0x38] sm:$0xff] }
 0x37c   : > { %v1073_v29 = vmul.f32 %v3611_v21, %v1064_v26  ;;  %v1074_v30 = vmul.f32 %v3615_v22, %v1063_v25  ;;  %1188 = vmatprep.subr.mxu0 %v3481_v40  ;;  %3233 = vmatmul.mubr.msk.f32.vlgmr.msra.gmra.mxu0 %vm586_vm0, %v3232_v23 }
 0x37d   : > { %1189 = vmatpush1.msra.mxu0 %v3479_v39  ;;  %1222 = vmatprep.mubr.f32.mxu0 %v3333_v0 }
 0x37e   : > { %v1232_v35 = vpop.permute.xlu1 %1231  ;;  %1110 = vmatprep.subr.mxu1 %v1074_v30 }
 0x37f   : > { %v1236_v36 = vsel %vm1235_vm5, %v1232_v35, %v1234_v18  ;;  %v1237_v37 = vsel %vm1235_vm5, %v1234_v18, %v1232_v35  ;;  %1111 = vmatpush1.msra.mxu1 %v1073_v29 }
 0x380   : > { %v1246_v39 = vmul.f32 %v3626_v27, %v1236_v36  ;;  %v1247_v40 = vmul.f32 %v3638_v31, %v1237_v37  ;;  %3235 = vmatmul.mubr.msk.f32.vlgmr.msra.gmra.mxu1 %vm586_vm0, %v3234_v32  ;;  %3237 = vmatmul.mubr.msk.f32.vlgmr.msra.gmra.mxu0 %vm586_vm0, %v3236_v33 }
 0x381   : > { %1317 = vmatprep.mubr.f32.mxu1 %v3333_v0  ;;  %1412 = vmatprep.mubr.f32.mxu0 %v3333_v0 }
 0x382   : > { %v1327_v51 = vpop.permute.xlu1 %1326  ;;  %1283 = vmatprep.subr.mxu1 %v1247_v40 }
 0x383   : > { %v1331_v52 = vsel %vm1330_vm6, %v1327_v51, %v1329_v34  ;;  %v1332_v53 = vsel %vm1330_vm6, %v1329_v34, %v1327_v51  ;;  %1284 = vmatpush1.msra.mxu1 %v1246_v39 }
 0x384   : > { %v1341_v55 = vmul.f32 %v3655_v38, %v1331_v52  ;;  %v1342_v56 = vmul.f32 %v3661_v41, %v1332_v53  ;;  %3239 = vmatmul.mubr.msk.f32.vlgmr.msra.gmra.mxu1 %vm586_vm0, %v3238_v43 }
 0x385   : > { %1507 = vmatprep.mubr.f32.mxu1 %v3333_v0 }
 0x386   : > { %v1422_v63 = vpop.permute.xlu1 %1421  ;;  %1378 = vmatprep.subr.mxu0 %v1342_v56 }
 0x387   : > { %v1426_v3 = vsel %vm1425_vm7, %v1422_v63, %v1424_v54  ;;  %v1427_v47 = vsel %vm1425_vm7, %v1424_v54, %v1422_v63  ;;  %1379 = vmatpush1.msra.mxu0 %v1341_v55 }
 0x388   : > { %v1436_v48 = vmul.f32 %v3682_v58, %v1426_v3  ;;  %v1437_v4 = vmul.f32 %v3686_v59, %v1427_v47  ;;  %3241 = vmatmul.mubr.msk.f32.vlgmr.msra.gmra.mxu0 %vm586_vm0, %v3240_v62 }
 0x389   : > { %1602 = vmatprep.mubr.f32.mxu0 %v3333_v0 }
 0x38a   : > { %v1517_v13 = vpop.permute.xlu1 %1516  ;;  %1473 = vmatprep.subr.mxu1 %v1437_v4 }
 0x38b   : > { %v1521_v15 = vsel %vm1520_vm8, %v1517_v13, %v1519_v9  ;;  %v1522_v16 = vsel %vm1520_vm8, %v1519_v9, %v1517_v13  ;;  %1474 = vmatpush1.msra.mxu1 %v1436_v48 }
 0x38c   : > { %v1531_v18 = vmul.f32 %v3704_v5, %v1521_v15  ;;  %v1532_v19 = vmul.f32 %v3709_v7, %v1522_v16  ;;  %3243 = vmatmul.mubr.msk.f32.vlgmr.msra.gmra.mxu1 %vm586_vm0, %v3242_v8 }
 0x38d   : > { %1697 = vmatprep.mubr.f32.mxu1 %v3333_v0 }
 0x38e   : > { %1568 = vmatprep.subr.mxu0 %v1532_v19 }
 0x38f   : > { %1569 = vmatpush1.msra.mxu0 %v1531_v18 }
 0x390   : > { %3247 = vmatmul.mubr.msk.f32.vlgmr.msra.gmra.mxu0 %vm586_vm0, %v3246_v20 }
 0x391   : > { %1776 = vmatprep.mubr.f32.mxu0 %v3333_v0 }
 0x397   : > { %v1615_v19 = vpop.permute.xlu1 %1614 }
 0x42c   : > { %v884_v23 = vpop.f32.mrf.mxu0 }
 0x42e   : > { %v886_v25 = vpop.f32.mrf.mxu0 }
 0x434   : > { %v958_v24 = vpop.f32.mrf.mxu1 }
 0x435   : > { %v959_v29 = vadd.f32 %v958_v24, %v884_v23 }
 0x436   : > { %v960_v26 = vpop.f32.mrf.mxu1 }
 0x437   : > { %v961_v30 = vadd.f32 %v960_v26, %v886_v25  ;;  %v1623_v25 = vpop.permute.xlu0 %1622 }
 0x43c   : > { %v1051_v32 = vpop.f32.mrf.mxu0 }
 0x43d   : > { %v1056_v33 = vadd.f32 %v1051_v32, %v959_v29 }
 0x43e   : > { %v1053_v34 = vpop.f32.mrf.mxu0 }
 0x43f   : > { %v1057_v35 = vadd.f32 %v1053_v34, %v961_v30  ;;  %v1629_v30 = vld [vmem:[%s4017_s11] sm:$0xff] }
 0x440   : > { %v1146_v36 = vpop.f32.mrf.mxu1  ;;  %v1224_v37 = vpop.f32.mrf.mxu0 }
 0x441   : > { %v1151_v39 = vadd.f32 %v1146_v36, %v1056_v33 }
 0x442   : > { %v1148_v40 = vpop.f32.mrf.mxu1  ;;  %v1226_v52 = vpop.f32.mrf.mxu0 }
 0x443   : > { %v1152_v43 = vadd.f32 %v1148_v40, %v1057_v35  ;;  %v1229_v51 = vadd.f32 %v1224_v37, %v1151_v39  ;;  %v1627_v35 = vld [vmem:[%s4012_s6] sm:$0xff] }
 0x444   : > { %v1319_v53 = vpop.f32.mrf.mxu1 }
 0x445   : > { %v1230_v54 = vadd.f32 %v1226_v52, %v1152_v43  ;;  %v1324_v55 = vadd.f32 %v1319_v53, %v1229_v51 }
 0x446   : > { %v1321_v56 = vpop.f32.mrf.mxu1 }
 0x447   : > { %v1325_v63 = vadd.f32 %v1321_v56, %v1230_v54 }
 0x448   : > { %v1414_v62 = vpop.f32.mrf.mxu0 }
 0x449   : > { %v1419_v3 = vadd.f32 %v1414_v62, %v1324_v55  ;;  %v1628_v55 = vld [vmem:[%s4013_s7] sm:$0xff] }
 0x44a   : > { %v1416_v47 = vpop.f32.mrf.mxu0 }
 0x44b   : > { %v1420_v8 = vadd.f32 %v1416_v47, %v1325_v63 }
 0x44c   : > { %v1509_v48 = vpop.f32.mrf.mxu1 }
 0x44d   : > { %v1514_v9 = vadd.f32 %v1509_v48, %v1419_v3 }
 0x44e   : > { %v1511_v4 = vpop.f32.mrf.mxu1 }
 0x44f   : > { %v1515_v15 = vadd.f32 %v1511_v4, %v1420_v8 }
 0x450   : > { %v1604_v13 = vpop.f32.mrf.mxu0 }
 0x451   : > { %v1609_v16 = vadd.f32 %v1604_v13, %v1514_v9 }
 0x452   : > { %v1606_v18 = vpop.f32.mrf.mxu0 }
 0x453   : > { %v1610_v20 = vadd.f32 %v1606_v18, %v1515_v15  ;;  %v1617_v23 = vadd.f32 %v1615_v19, %v1609_v16 }
 0x455   : > { %v1618_v24 = vadd.f32 %v1615_v19, %v1610_v20  ;;  %v1625_v29 = vadd.f32 %v1623_v25, %v1617_v23 }
 0x457   : > { %v1626_v26 = vadd.f32 %v1623_v25, %v1618_v24 }
 0x459   : > { %1663 = vmatprep.subr.mxu1 %v1626_v26 }
 0x45a   : > { %1664 = vmatpush1.msra.mxu1 %v1625_v29 }
 0x45b   : > { %3248 = vmatmul.mubr.msk.f32.vlgmr.msra.gmra.mxu1 %vm586_vm0, %v1629_v30 }
 0x45c   : > { %1905 = vmatprep.mubr.f32.mxu1 %v3333_v0 }
 0x51b   : > { %v1699_v32 = vpop.f32.mrf.mxu1 }
 0x51d   : > { %v1701_v33 = vpop.f32.mrf.mxu1 }
 0x51e   : > { %v1704_v34 = vadd.f32 %v1701_v33, %v1699_v32  ;;  %v2580_v33 = vld [vmem:[%s4015_s9] sm:$0xff] }
 0x520   : > { %1705 = vadd.xlane.f32.xlu1 %v1704_v34 }
 0x531   : > { %1793 = vperm.xlu1 %3303, %v1627_v35  }
 0x5a9   : > { %v1706_v36 = vpop.xlane.xlu1 %1705 }
 0x5aa   : > { %v1707_v37 = vmul.f32 0.0009765625, %v1706_v36 }
 0x5ac   : > { %v1708_v39 = vsub.f32 %v1625_v29, %v1707_v37  ;;  %v1709_v40 = vsub.f32 %v1626_v26, %v1707_v37 }
 0x5ad   : > { %v1794_v4 = vpop.permute.xlu1 %1793 }
 0x5ae   : > { %v1710_v43 = vmul.f32 %v1708_v39, %v1708_v39  ;;  %v1711_v51 = vmul.f32 %v1709_v40, %v1709_v40 }
 0x5b0   : > { %1742 = vmatprep.subr.mxu0 %v1711_v51 }
 0x5b1   : > { %1743 = vmatpush1.msra.mxu0 %v1710_v43 }
 0x5b2   : > { %3249 = vmatmul.mubr.msk.f32.vlgmr.msra.gmra.mxu0 %vm586_vm0, %v1629_v30 }
 0x5b3   : > { %1979 = vmatprep.mubr.f32.mxu0 %v3333_v0 }
 0x672   : > { %v1778_v52 = vpop.f32.mrf.mxu0 }
 0x674   : > { %v1780_v53 = vpop.f32.mrf.mxu0 }
 0x675   : > { %v1783_v54 = vadd.f32 %v1780_v53, %v1778_v52  ;;  %v3252_v52 = vld [vmem:[%s4014_s8 + $0x8] sm:$0xff] }
 0x677   : > { %1784 = vadd.xlane.f32.xlu0 %v1783_v54 }
 0x68d   : > { %1800 = vperm.xlu0 %3304, %v1628_v55  }
 0x700   : > { %v1785_v56 = vpop.xlane.xlu0 %1784 }
 0x701   : > { %v1786_v62 = vmul.f32 0.0009765625, %v1785_v56 }
 0x703   : > { %v1787_v63 = vadd.f32 1e-05, %v1786_v62 }
 0x705   : > { %3315 = vrsqrt.f32 %v1787_v63 }
 0x708   : > { %v1801_v13 = vpop.permute.xlu0 %1800 }
 0x712   : > { %v3316_v3 = vpop.eup %3315 }
 0x713   : > { %v1789_v47 = vmul.f32 %v3316_v3, %v1708_v39  ;;  %v1790_v48 = vmul.f32 %v3316_v3, %v1709_v40 }
 0x715   : > { %v1796_v8 = vmul.f32 %v1794_v4, %v1789_v47  ;;  %v1797_v9 = vmul.f32 %v1794_v4, %v1790_v48  ;;  %v3255_v4 = vld [vmem:[%s4014_s8 + $0x10] sm:$0xff] }
 0x717   : > { %v1803_v15 = vadd.f32 %v1801_v13, %v1796_v8  ;;  %v1804_v16 = vadd.f32 %v1801_v13, %v1797_v9 }
 0x719   : > { %v3250_v18 = vmul.f32 -1.442695, %v1803_v15  ;;  %v3251_v19 = vmul.f32 -1.442695, %v1804_v16 }
 0x71b   : > { %3317 = vpow2.f32 %v3250_v18 }
 0x71c   : > { %3319 = vpow2.f32 %v3251_v19 }
 0x728   : > { %v3318_v20 = vpop.eup %3317 }
 0x729   : > { %v3320_v23 = vpop.eup %3319  ;;  %v1811_v24 = vadd.f32 1.0, %v3318_v20 }
 0x72a   : > { %v1812_v25 = vadd.f32 1.0, %v3320_v23 }
 0x72b   : > { %3321 = vrcp.f32 %v1811_v24  ;;  %v3261_v24 = vld [vmem:[%s4014_s8 + $0x28] sm:$0xff] }
 0x72c   : > { %3323 = vrcp.f32 %v1812_v25 }
 0x738   : > { %v3322_v26 = vpop.eup %3321 }
 0x739   : > { %v1817_v29 = vmul.f32 %v3322_v26, %v1803_v15  ;;  %v3324_v30 = vpop.eup %3323  ;;  %v3257_v15 = vld [vmem:[%s4014_s8 + $0x18] sm:$0xff] }
 0x73a   : > { %v1818_v32 = vmul.f32 %v3324_v30, %v1804_v16  ;;  %v3259_v16 = vld [vmem:[%s4014_s8 + $0x20] sm:$0xff] }
 0x73b   : > { %1819 = vrot.lane.b32.xlu0 %v1817_v29, %s3337_s27  ;;  %1828 = vrot.lane.b32.xlu1 %v1817_v29, %s3335_s22 }
 0x73f   : > { %1986 = vrot.lane.b32.xlu0 %v1817_v29, %s4037_s18  ;;  %1830 = vrot.lane.b32.xlu1 %v1818_v32, %s3335_s22  ;;  %s3345_s22 = smov 120  }
 0x743   : > { %2072 = vrot.lane.b32.xlu0 %v1817_v29, %s4038_s21  ;;  %1821 = vrot.lane.b32.xlu1 %v1818_v32, %s3337_s27  ;;  %s4041_s27 = sshll.u32 %s4043_s25, 4 }
 0x744   : > { %s572_s0 = scalar_lea.vmem %s4022_s16, %s4041_s27  ;;  %s3347_s27 = smov 64  }
 0x747   : > { %2236 = vrot.lane.b32.xlu0 %v1817_v29, %s3338_s28  ;;  %1988 = vrot.lane.b32.xlu1 %v1818_v32, %s4037_s18 }
 0x74b   : > { %2322 = vrot.lane.b32.xlu0 %v1817_v29, %s3339_s29  ;;  %2074 = vrot.lane.b32.xlu1 %v1818_v32, %s4038_s21  ;;  %s3344_s21 = smov 124  }
 0x74f   : > { %2408 = vrot.lane.b32.xlu0 %v1817_v29, %s4039_s1  ;;  %2238 = vrot.lane.b32.xlu1 %v1818_v32, %s3338_s28 }
 0x753   : > { %2494 = vrot.lane.b32.xlu0 %v1817_v29, %s4040_s20  ;;  %2324 = vrot.lane.b32.xlu1 %v1818_v32, %s3339_s29 }
 0x757   : > { %2583 = vperm.xlu0 %3304, %v2580_v33   ;;  %2410 = vrot.lane.b32.xlu1 %v1818_v32, %s4039_s1 }
 0x75b   : > { %2496 = vrot.lane.b32.xlu1 %v1818_v32, %s4040_s20 }
 0x7ad   : > { %v1820_v34 = vpop.permute.xlu0 %1819  ;;  %v1829_v35 = vpop.permute.xlu1 %1828 }
 0x7b1   : > { %v1987_v36 = vpop.permute.xlu0 %1986  ;;  %v1831_v37 = vpop.permute.xlu1 %1830 }
 0x7b2   : > { %v1832_v39 = vsel %vm800_vm1, %v1829_v35, %v1831_v37  ;;  %v1833_v40 = vsel %vm800_vm1, %v1831_v37, %v1829_v35 }
 0x7b3   : > { %v1834_v43 = vmul.f32 %v1833_v40, %v3544_v49  ;;  %v1835_v51 = vmul.f32 %v1832_v39, %v3548_v50  ;;  %v1827_v50 = vld [vmem:[%s4014_s8] sm:$0xff] }
 0x7b5   : > { %v2073_v53 = vpop.permute.xlu0 %2072  ;;  %1871 = vmatprep.subr.mxu1 %v1835_v51  ;;  %v1822_v54 = vpop.permute.xlu1 %1821  ;;  %v3267_v51 = vld [vmem:[%s4014_s8 + $0x40] sm:$0xff] }
 0x7b6   : > { %v1823_v55 = vsel %vm782_vm2, %v1820_v34, %v1822_v54  ;;  %v1824_v56 = vsel %vm782_vm2, %v1822_v54, %v1820_v34  ;;  %1872 = vmatpush1.msra.mxu1 %v1834_v43 }
 0x7b7   : > { %v1825_v62 = vmul.f32 %v1824_v56, %v3565_v60  ;;  %v1826_v49 = vmul.f32 %v1823_v55, %v3569_v61  ;;  %3253 = vmatmul.mubr.msk.f32.vlgmr.msra.gmra.mxu1 %vm586_vm0, %v3252_v52 }
 0x7b8   : > { %2063 = vmatprep.mubr.f32.mxu1 %v3333_v0 }
 0x7b9   : > { %1945 = vmatprep.subr.mxu0 %v1826_v49  ;;  %v1989_v63 = vpop.permute.xlu1 %1988  ;;  %v2237_v60 = vpop.permute.xlu0 %2236 }
 0x7ba   : > { %v1990_v3 = vsel %vm967_vm3, %v1987_v36, %v1989_v63  ;;  %v1991_v47 = vsel %vm967_vm3, %v1989_v63, %v1987_v36  ;;  %1946 = vmatpush1.msra.mxu0 %v1825_v62  ;;  %v3265_v36 = vld [vmem:[%s4014_s8 + $0x38] sm:$0xff]  ;;  %vm2986_vm3 = vcmp.lt.s32.totalorder %v3526_v45, 120 }
 0x7bb   : > { %v1992_v61 = vmul.f32 %v1991_v47, %v3588_v10  ;;  %v1993_v48 = vmul.f32 %v1990_v3, %v3592_v11  ;;  %3254 = vmatmul.mubr.msk.f32.vlgmr.msra.gmra.mxu0 %vm586_vm0, %v1827_v50 }
 0x7bc   : > { %2149 = vmatprep.mubr.f32.mxu0 %v3333_v0 }
 0x7bd   : > { %2029 = vmatprep.subr.mxu1 %v1993_v48  ;;  %v2075_v8 = vpop.permute.xlu1 %2074  ;;  %v2323_v18 = vpop.permute.xlu0 %2322 }
 0x7be   : > { %v2076_v9 = vsel %vm1062_vm4, %v2073_v53, %v2075_v8  ;;  %v2077_v13 = vsel %vm1062_vm4, %v2075_v8, %v2073_v53  ;;  %2030 = vmatpush1.msra.mxu1 %v1992_v61 }
 0x7bf   : > { %v2078_v10 = vmul.f32 %v2077_v13, %v3611_v21  ;;  %v2079_v11 = vmul.f32 %v2076_v9, %v3615_v22  ;;  %2193 = vmatprep.subr.mxu1 %v1818_v32  ;;  %3256 = vmatmul.mubr.msk.f32.vlgmr.msra.gmra.mxu1 %vm586_vm0, %v3255_v4  ;;  %v3263_v32 = vld [vmem:[%s4014_s8 + $0x30] sm:$0xff] }
 0x7c0   : > { %2194 = vmatpush1.msra.mxu1 %v1817_v29  ;;  %2227 = vmatprep.mubr.f32.mxu1 %v3333_v0 }
 0x7c1   : > { %2115 = vmatprep.subr.mxu0 %v2079_v11  ;;  %v2239_v19 = vpop.permute.xlu1 %2238 }
 0x7c2   : > { %v2240_v21 = vsel %vm1235_vm5, %v2237_v60, %v2239_v19  ;;  %v2241_v22 = vsel %vm1235_vm5, %v2239_v19, %v2237_v60  ;;  %2116 = vmatpush1.msra.mxu0 %v2078_v10 }
 0x7c3   : > { %v2242_v20 = vmul.f32 %v2240_v21, %v3626_v27  ;;  %v2243_v23 = vmul.f32 %v2241_v22, %v3638_v31  ;;  %3258 = vmatmul.mubr.msk.f32.vlgmr.msra.gmra.mxu0 %vm586_vm0, %v3257_v15  ;;  %3260 = vmatmul.mubr.msk.f32.vlgmr.msra.gmra.mxu1 %vm586_vm0, %v3259_v16  ;;  %v2409_v31 = vpop.permute.xlu0 %2408 }
 0x7c4   : > { %2313 = vmatprep.mubr.f32.mxu0 %v3333_v0  ;;  %2399 = vmatprep.mubr.f32.mxu1 %v3333_v0 }
 0x7c5   : > { %2279 = vmatprep.subr.mxu0 %v2243_v23  ;;  %v2325_v25 = vpop.permute.xlu1 %2324 }
 0x7c6   : > { %v2326_v26 = vsel %vm1330_vm6, %v2323_v18, %v2325_v25  ;;  %v2327_v27 = vsel %vm1330_vm6, %v2325_v25, %v2323_v18  ;;  %2280 = vmatpush1.msra.mxu0 %v2242_v20 }
 0x7c7   : > { %v2328_v29 = vmul.f32 %v2326_v26, %v3655_v38  ;;  %v2329_v30 = vmul.f32 %v2327_v27, %v3661_v41  ;;  %3262 = vmatmul.mubr.msk.f32.vlgmr.msra.gmra.mxu0 %vm586_vm0, %v3261_v24  ;;  %v2495_v37 = vpop.permute.xlu0 %2494 }
 0x7c8   : > { %2485 = vmatprep.mubr.f32.mxu0 %v3333_v0 }
 0x7c9   : > { %2365 = vmatprep.subr.mxu1 %v2329_v30  ;;  %v2411_v33 = vpop.permute.xlu1 %2410 }
 0x7ca   : > { %v2412_v34 = vsel %vm1425_vm7, %v2409_v31, %v2411_v33  ;;  %v2413_v35 = vsel %vm1425_vm7, %v2411_v33, %v2409_v31  ;;  %2366 = vmatpush1.msra.mxu1 %v2328_v29 }
 0x7cb   : > { %v2414_v38 = vmul.f32 %v2412_v34, %v3682_v58  ;;  %v2415_v41 = vmul.f32 %v2413_v35, %v3686_v59  ;;  %3264 = vmatmul.mubr.msk.f32.vlgmr.msra.gmra.mxu1 %vm586_vm0, %v3263_v32  ;;  %v3269_v34 = vld [vmem:[%s4019_s13 + $0x8] sm:$0xff]  ;;  %v2597_v35 = vld [vmem:[%s4019_s13] sm:$0xff] }
 0x7cc   : > { %2571 = vmatprep.mubr.f32.mxu1 %v3333_v0 }
 0x7cd   : > { %2451 = vmatprep.subr.mxu0 %v2415_v41  ;;  %v2497_v39 = vpop.permute.xlu1 %2496 }
 0x7ce   : > { %v2498_v40 = vsel %vm1520_vm8, %v2495_v37, %v2497_v39  ;;  %v2499_v43 = vsel %vm1520_vm8, %v2497_v39, %v2495_v37  ;;  %2452 = vmatpush1.msra.mxu0 %v2414_v38 }
 0x7cf   : > { %v2500_v58 = vmul.f32 %v3704_v5, %v2498_v40  ;;  %v2501_v59 = vmul.f32 %v3709_v7, %v2499_v43  ;;  %3266 = vmatmul.mubr.msk.f32.vlgmr.msra.gmra.mxu0 %vm586_vm0, %v3265_v36 }
 0x7d0   : > { %2667 = vmatprep.mubr.f32.mxu0 %v3333_v0 }
 0x7d1   : > { %2537 = vmatprep.subr.mxu1 %v2501_v59 }
 0x7d2   : > { %2538 = vmatpush1.msra.mxu1 %v2500_v58  ;;  %v2584_v26 = vpop.permute.xlu0 %2583 }
 0x7d3   : > { %3268 = vmatmul.mubr.msk.f32.vlgmr.msra.gmra.mxu1 %vm586_vm0, %v3267_v51 }
 0x7d4   : > { %2747 = vmatprep.mubr.f32.mxu1 %v3333_v0 }
 0x877   : > { %v1907_v52 = vpop.f32.mrf.mxu1 }
 0x879   : > { %v1909_v53 = vpop.f32.mrf.mxu1 }
 0x87b   : > { %v1981_v54 = vpop.f32.mrf.mxu0 }
 0x87c   : > { %v1982_v5 = vadd.f32 %v1981_v54, %v1907_v52 }
 0x87d   : > { %v1983_v55 = vpop.f32.mrf.mxu0 }
 0x87e   : > { %v1984_v7 = vadd.f32 %v1983_v55, %v1909_v53 }
 0x87f   : > { %v2065_v56 = vpop.f32.mrf.mxu1 }
 0x880   : > { %v2070_v62 = vadd.f32 %v2065_v56, %v1982_v5 }
 0x881   : > { %v2067_v49 = vpop.f32.mrf.mxu1 }
 0x882   : > { %v2071_v50 = vadd.f32 %v2067_v49, %v1984_v7 }
 0x883   : > { %v2151_v63 = vpop.f32.mrf.mxu0  ;;  %v2229_v3 = vpop.f32.mrf.mxu1 }
 0x884   : > { %v2156_v47 = vadd.f32 %v2151_v63, %v2070_v62 }
 0x885   : > { %v2153_v60 = vpop.f32.mrf.mxu0  ;;  %v2231_v4 = vpop.f32.mrf.mxu1 }
 0x886   : > { %v2157_v61 = vadd.f32 %v2153_v60, %v2071_v50  ;;  %v2234_v48 = vadd.f32 %v2229_v3, %v2156_v47 }
 0x887   : > { %v2315_v8 = vpop.f32.mrf.mxu0 }
 0x888   : > { %v2235_v9 = vadd.f32 %v2231_v4, %v2157_v61  ;;  %v2320_v13 = vadd.f32 %v2315_v8, %v2234_v48  ;;  %v2593_v48 = vld [vmem:[%s4021_s15] sm:$0xff]  ;;  %v2594_v4 = vld [vmem:[%s4021_s15 + $0x8] sm:$0xff] }
 0x889   : > { %v2317_v10 = vpop.f32.mrf.mxu0  ;;  %vm2928_vm9 = vcmp.gt.f32.partialorder %v2593_v48, 0.5  ;;  %vm2929_vm10 = vcmp.gt.f32.partialorder %v2594_v4, 0.5 }
 0x88a   : > { %v2321_v15 = vadd.f32 %v2317_v10, %v2235_v9  ;;  %v3905_v8 = vsel %vm2928_vm9, 1, %v3334_v14  ;;  %v3908_v9 = vsel %vm2929_vm10, 1, %v3334_v14  ;;  %vm3023_vm9 = vcmp.lt.s32.totalorder %v3526_v45, 96 }
 0x88b   : > { %v2401_v11 = vpop.f32.mrf.mxu1  ;;  %v2935_v10 = vrot.slane %v3905_v8, %v3557_v57 }
 0x88c   : > { %v2406_v16 = vadd.f32 %v2401_v11, %v2320_v13  ;;  %v2939_v13 = vrot.slane %v3908_v9, %v3557_v57 }
 0x88d   : > { %v2403_v18 = vpop.f32.mrf.mxu1  ;;  %vm2940_vm12 = vcmp.eq.s32.totalorder %v2935_v10, 1  ;;  %v3070_v10 = vrot.slane %v3908_v9, %v3666_v42 }
 0x88e   : > { %v2407_v22 = vadd.f32 %v2403_v18, %v2321_v15  ;;  %vm2941_vm11 = vcmp.eq.s32.totalorder %v2939_v13, 1 }
 0x88f   : > { %v2487_v19 = vpop.f32.mrf.mxu0 }
 0x890   : > { %v2492_v20 = vadd.f32 %v2487_v19, %v2406_v16 }
 0x891   : > { %v2489_v21 = vpop.f32.mrf.mxu0 }
 0x892   : > { %v2493_v24 = vadd.f32 %v2489_v21, %v2407_v22  ;;  %v2958_v22 = vrot.slane %v3908_v9, %v3529_v46 }
 0x893   : > { %v2573_v23 = vpop.f32.mrf.mxu1 }
 0x894   : > { %v2578_v25 = vadd.f32 %v2573_v23, %v2492_v20  ;;  %v2954_v20 = vrot.slane %v3905_v8, %v3529_v46  ;;  %vm2960_vm14 = vcmp.eq.s32.totalorder %v2958_v22, 1 }
 0x895   : > { %v2575_v27 = vpop.f32.mrf.mxu1 }
 0x896   : > { %v2586_v31 = vadd.f32 %v2584_v26, %v2578_v25  ;;  %v2579_v29 = vadd.f32 %v2575_v27, %v2493_v24  ;;  %vm2959_vm15 = vcmp.eq.s32.totalorder %v2954_v20, 1 }
 0x898   : > { %v2588_v30 = vadd.f32 %v2586_v31, %v3458_v2  ;;  %v2587_v32 = vadd.f32 %v2584_v26, %v2579_v29  ;;  %v3274_v2 = vld [vmem:[%s4019_s13 + $0x18] sm:$0xff]  ;;  %v2977_v29 = vrot.slane %v3908_v9, %v3580_v6 }
 0x89a   : > { %2590 = vst [vmem:[%s572_s0] sm:$0xff] %v2588_v30  ;;  %v2589_v33 = vadd.f32 %v2587_v32, %v3456_v1  ;;  %v3272_v1 = vld [vmem:[%s4019_s13 + $0x10] sm:$0xff]  ;;  %vm2979_vm1 = vcmp.eq.s32.totalorder %v2977_v29, 1 }
 0x89c   : > { %2591 = vst [vmem:[%s572_s0 + $0x8] sm:$0xff] %v2589_v33  ;;  %2633 = vmatprep.subr.mxu0 %v2589_v33  ;;  %2713 = vmatprep.subr.mxu1 %v2589_v33 }
 0x89d   : > { %2634 = vmatpush1.msra.mxu0 %v2588_v30  ;;  %2714 = vmatpush1.msra.mxu1 %v2588_v30 }
 0x89e   : > { %3270 = vmatmul.mubr.msk.f32.vlgmr.msra.gmra.mxu0 %vm586_vm0, %v3269_v34  ;;  %2789 = vmatprep.subr.mxu0 %v2589_v33 }
 0x89f   : > { %2873 = vmatprep.subr.mxu1 %v2589_v33  ;;  %3271 = vmatmul.mubr.msk.f32.vlgmr.msra.gmra.mxu1 %vm586_vm0, %v2597_v35 }
 0x8a0   : > { %2790 = vmatpush1.msra.mxu0 %v2588_v30  ;;  %2874 = vmatpush1.msra.mxu1 %v2588_v30  ;;  %v2973_v30 = vrot.slane %v3905_v8, %v3580_v6  ;;  %v2992_v6 = vrot.slane %v3905_v8, %v3595_v12 }
 0x8a1   : > { %2823 = vmatprep.mubr.f32.mxu0 %v3333_v0  ;;  %2907 = vmatprep.mubr.f32.mxu1 %v3333_v0 }
 0x8a2   : > { %3273 = vmatmul.mubr.msk.f32.vlgmr.msra.gmra.mxu0 %vm586_vm0, %v3272_v1  ;;  %vm2978_vm2 = vcmp.eq.s32.totalorder %v2973_v30, 1 }
 0x8a3   : > { %3275 = vmatmul.mubr.msk.f32.vlgmr.msra.gmra.mxu1 %vm586_vm0, %v3274_v2  ;;  %vm2967_vm0 = vcmp.lt.s32.totalorder %v3526_v45, 124 }
 0x95e   : > { %v2669_v38 = vpop.f32.mrf.mxu0 }
 0x95f   : > { %2674 = vrot.lane.b32.xlu1 %v2669_v38, %s3338_s28  ;;  %v2749_v41 = vpop.f32.mrf.mxu1  ;;  %v2996_v38 = vrot.slane %v3908_v9, %v3595_v12  ;;  %v3009_v12 = vsub.s32 4, %v3524_v44  ;;  %v3033_v44 = vrot.slane %v3908_v9, %v3605_v17 }
 0x960   : > { %v2671_v36 = vpop.f32.mrf.mxu0 }
 0x961   : > { %2676 = vrot.lane.b32.xlu0 %v2671_v36, %s3338_s28  ;;  %v2751_v37 = vpop.f32.mrf.mxu1  ;;  %vm2998_vm4 = vcmp.eq.s32.totalorder %v2996_v38, 1  ;;  %vm3035_vm10 = vcmp.eq.s32.totalorder %v3033_v44, 1 }
 0x962   : > { %v2825_v39 = vpop.f32.mrf.mxu0 }
 0x963   : > { %2830 = vrot.lane.b32.xlu1 %v2825_v39, %s4039_s1  ;;  %v2909_v43 = vpop.f32.mrf.mxu1 }
 0x964   : > { %v2827_v40 = vpop.f32.mrf.mxu0 }
 0x965   : > { %2832 = vrot.lane.b32.xlu0 %v2827_v40, %s4039_s1  ;;  %v2911_v0 = vpop.f32.mrf.mxu1 }
 0x967   : > { %2914 = vrot.lane.b32.xlu1 %v2909_v43, %s4040_s20 }
 0x969   : > { %2916 = vrot.lane.b32.xlu0 %v2911_v0, %s4040_s20  ;;  %v3014_v0 = vrot.slane %v3908_v9, %v3009_v12 }
 0x96b   : > { %vm3016_vm6 = vcmp.eq.s32.totalorder %v3014_v0, 1 }
 0x9d1   : > { %v2675_v58 = vpop.permute.xlu1 %2674 }
 0x9d3   : > { %v2677_v59 = vpop.permute.xlu0 %2676 }
 0x9d4   : > { %v2678_v52 = vsel %vm1235_vm5, %v2675_v58, %v2677_v59  ;;  %v2679_v53 = vsel %vm1235_vm5, %v2677_v59, %v2675_v58  ;;  %v3010_v58 = vrot.slane %v3905_v8, %v3009_v12 }
 0x9d5   : > { %v2831_v51 = vpop.permute.xlu1 %2830  ;;  %v2750_v7 = vadd.f32 %v2749_v41, %v2678_v52  ;;  %v2752_v56 = vadd.f32 %v2751_v37, %v2679_v53 }
 0x9d7   : > { %v2833_v54 = vpop.permute.xlu0 %2832 }
 0x9d8   : > { %v2834_v5 = vsel %vm1425_vm7, %v2831_v51, %v2833_v54  ;;  %v2835_v55 = vsel %vm1425_vm7, %v2833_v54, %v2831_v51 }
 0x9d9   : > { %v2836_v62 = vadd.f32 %v2834_v5, %v2750_v7  ;;  %v2837_v49 = vadd.f32 %v2835_v55, %v2752_v56  ;;  %v2915_v50 = vpop.permute.xlu1 %2914  ;;  %v3029_v55 = vrot.slane %v3905_v8, %v3605_v17  ;;  %v3052_v17 = vrot.slane %v3908_v9, %v3629_v28  ;;  %v2595_v9 = vld [vmem:[%s4021_s15 + $0x10] sm:$0x3] }
 0x9db   : > { %v2917_v63 = vpop.permute.xlu0 %2916 }
 0x9dc   : > { %v2918_v3 = vsel %vm1520_vm8, %v2915_v50, %v2917_v63  ;;  %v2919_v47 = vsel %vm1520_vm8, %v2917_v63, %v2915_v50  ;;  %vm3015_vm8 = vcmp.eq.s32.totalorder %v3010_v58, 1 }
 0x9dd   : > { %v2920_v60 = vadd.f32 %v2918_v3, %v2836_v62  ;;  %v2921_v61 = vadd.f32 %v2919_v47, %v2837_v49  ;;  %v3048_v3 = vrot.slane %v3905_v8, %v3629_v28  ;;  %v3066_v28 = vrot.slane %v3905_v8, %v3666_v42  ;;  %v2592_v42 = vld [vmem:[%s4020_s14] sm:$0xff]  ;;  %v2596_v8 = vld [vmem:[%s4021_s15 + $0x18] sm:$0x3] }
 0x9df   : > { %2924 = vrot.lane.b32.xlu0 %v2921_v61, %s3338_s28  ;;  %2922 = vrot.lane.b32.xlu1 %v2920_v60, %s3338_s28  ;;  %s3343_s28 = smov 126  }
 0xa51   : > { %v2925_v11 = vpop.permute.xlu0 %2924  ;;  %v2923_v15 = vpop.permute.xlu1 %2922 }
 0xa52   : > { %v2926_v16 = vsel %vm1235_vm5, %v2923_v15, %v2925_v11  ;;  %v2927_v18 = vsel %vm1235_vm5, %v2925_v11, %v2923_v15  ;;  %vm2997_vm5 = vcmp.eq.s32.totalorder %v2992_v6, 1 }
 0xa53   : > { %v2943_v19 = vsel %vm2941_vm11, %v2927_v18, %v2921_v61  ;;  %v2942_v21 = vsel %vm2940_vm12, %v2926_v16, %v2920_v60  ;;  %vm3034_vm11 = vcmp.eq.s32.totalorder %v3029_v55, 1  ;;  %vm3042_vm12 = vcmp.lt.s32.totalorder %v3526_v45, 64 }
 0xa54   : > { %2946 = vrot.lane.b32.xlu0 %v2943_v19, %s3343_s28  ;;  %2944 = vrot.lane.b32.xlu1 %v2942_v21, %s3343_s28 }
 0xac6   : > { %v2947_v23 = vpop.permute.xlu0 %2946  ;;  %v2945_v24 = vpop.permute.xlu1 %2944 }
 0xac7   : > { %v2949_v25 = vsel %vm2948_vm13, %v2945_v24, %v2947_v23  ;;  %v2950_v26 = vsel %vm2948_vm13, %v2947_v23, %v2945_v24  ;;  %vm3054_vm13 = vcmp.eq.s32.totalorder %v3052_v17, 1 }
 0xac8   : > { %v2962_v27 = vsel %vm2960_vm14, %v2950_v26, %v2943_v19  ;;  %v2961_v31 = vsel %vm2959_vm15, %v2949_v25, %v2942_v21  ;;  %vm3053_vm14 = vcmp.eq.s32.totalorder %v3048_v3, 1  ;;  %vm3072_vm15 = vcmp.eq.s32.totalorder %v3070_v10, 1 }
 0xac9   : > { %2965 = vrot.lane.b32.xlu0 %v2962_v27, %s3344_s21  ;;  %2963 = vrot.lane.b32.xlu1 %v2961_v31, %s3344_s21  ;;  %s576_s21 = scalar_lea.vmem %s4023_s17, %s3221_s19 }
 0xb3b   : > { %v2966_v32 = vpop.permute.xlu0 %2965  ;;  %v2964_v33 = vpop.permute.xlu1 %2963 }
 0xb3c   : > { %v2968_v34 = vsel %vm2967_vm0, %v2964_v33, %v2966_v32  ;;  %v2969_v35 = vsel %vm2967_vm0, %v2966_v32, %v2964_v33  ;;  %vm3071_vm0 = vcmp.eq.s32.totalorder %v3066_v28, 1 }
 0xb3d   : > { %v2981_v1 = vsel %vm2979_vm1, %v2969_v35, %v2962_v27  ;;  %v2980_v2 = vsel %vm2978_vm2, %v2968_v34, %v2961_v31  ;;  %vm3082_vm1 = vcmp.gt.f32.partialorder %v2596_v8, 0.5  ;;  %vm3081_vm2 = vcmp.gt.f32.partialorder %v2595_v9, 0.5 }
 0xb3e   : > { %2984 = vrot.lane.b32.xlu0 %v2981_v1, %s3345_s22  ;;  %2982 = vrot.lane.b32.xlu1 %v2980_v2, %s3345_s22  ;;  %v3084_v22 = vsel %vm3082_vm1, 1, %v3334_v14  ;;  %v3083_v20 = vsel %vm3081_vm2, 1, %v3334_v14 }
 0xb3f   : > { %v3092_v23 = vrot.slane %v3084_v22, %v3557_v57  ;;  %v3088_v24 = vrot.slane %v3083_v20, %v3557_v57  ;;  %v3105_v14 = vrot.slane %v3083_v20, %v3529_v46 }
 0xbb0   : > { %v2985_v41 = vpop.permute.xlu0 %2984  ;;  %v2983_v36 = vpop.permute.xlu1 %2982 }
 0xbb1   : > { %v2987_v37 = vsel %vm2986_vm3, %v2983_v36, %v2985_v41  ;;  %v2988_v39 = vsel %vm2986_vm3, %v2985_v41, %v2983_v36 }
 0xbb2   : > { %v3000_v40 = vsel %vm2998_vm4, %v2988_v39, %v2981_v1  ;;  %v2999_v43 = vsel %vm2997_vm5, %v2987_v37, %v2980_v2  ;;  %vm3093_vm4 = vcmp.eq.s32.totalorder %v3088_v24, 1  ;;  %vm3106_vm5 = vcmp.eq.s32.totalorder %v3105_v14, 1 }
 0xbb3   : > { %3003 = vrot.lane.b32.xlu0 %v3000_v40, %s4039_s1  ;;  %3001 = vrot.lane.b32.xlu1 %v2999_v43, %s4039_s1 }
 0xc25   : > { %v3004_v59 = vpop.permute.xlu0 %3003  ;;  %v3002_v51 = vpop.permute.xlu1 %3001 }
 0xc26   : > { %v3005_v52 = vsel %vm1425_vm7, %v3002_v51, %v3004_v59  ;;  %v3006_v53 = vsel %vm1425_vm7, %v3004_v59, %v3002_v51 }
 0xc27   : > { %v3018_v54 = vsel %vm3016_vm6, %v3006_v53, %v3000_v40  ;;  %v3017_v5 = vsel %vm3015_vm8, %v3005_v52, %v2999_v43 }
 0xc28   : > { %3021 = vrot.lane.b32.xlu0 %v3018_v54, %s3346_s26  ;;  %3019 = vrot.lane.b32.xlu1 %v3017_v5, %s3346_s26 }
 0xc9a   : > { %v3022_v7 = vpop.permute.xlu0 %3021  ;;  %v3020_v56 = vpop.permute.xlu1 %3019 }
 0xc9b   : > { %v3024_v62 = vsel %vm3023_vm9, %v3020_v56, %v3022_v7  ;;  %v3025_v49 = vsel %vm3023_vm9, %v3022_v7, %v3020_v56 }
 0xc9c   : > { %v3037_v50 = vsel %vm3035_vm10, %v3025_v49, %v3018_v54  ;;  %v3036_v63 = vsel %vm3034_vm11, %v3024_v62, %v3017_v5 }
 0xc9d   : > { %3040 = vrot.lane.b32.xlu0 %v3037_v50, %s3347_s27  ;;  %3038 = vrot.lane.b32.xlu1 %v3036_v63, %s3347_s27 }
 0xd0f   : > { %v3041_v47 = vpop.permute.xlu0 %3040  ;;  %v3039_v60 = vpop.permute.xlu1 %3038 }
 0xd10   : > { %v3043_v61 = vsel %vm3042_vm12, %v3039_v60, %v3041_v47  ;;  %v3044_v48 = vsel %vm3042_vm12, %v3041_v47, %v3039_v60 }
 0xd11   : > { %v3056_v4 = vsel %vm3054_vm13, %v3044_v48, %v3037_v50  ;;  %v3055_v13 = vsel %vm3053_vm14, %v3043_v61, %v3036_v63 }
 0xd12   : > { %3059 = vrot.lane.b32.xlu0 %v3056_v4, %s3345_s22  ;;  %3057 = vrot.lane.b32.xlu1 %v3055_v13, %s3345_s22 }
 0xd84   : > { %v3060_v11 = vpop.permute.xlu0 %3059  ;;  %v3058_v15 = vpop.permute.xlu1 %3057 }
 0xd85   : > { %v3061_v16 = vsel %vm2986_vm3, %v3058_v15, %v3060_v11  ;;  %v3062_v18 = vsel %vm2986_vm3, %v3060_v11, %v3058_v15  ;;  %vm3094_vm3 = vcmp.eq.s32.totalorder %v3092_v23, 1 }
 0xd86   : > { %v3074_v19 = vsel %vm3072_vm15, %v3062_v18, %v3056_v4  ;;  %v3073_v21 = vsel %vm3071_vm0, %v3061_v16, %v3055_v13 }
 0xd87   : > { %3077 = vrot.lane.b32.xlu0 %v3074_v19, %s4039_s1  ;;  %3075 = vrot.lane.b32.xlu1 %v3073_v21, %s4039_s1 }
 0xd8b   : > { %3110 = vperm.xlu1 %3303, %v2592_v42  }
 0xdf9   : > { %v3078_v25 = vpop.permute.xlu0 %3077  ;;  %v3076_v26 = vpop.permute.xlu1 %3075 }
 0xdfa   : > { %v3079_v27 = vsel %vm1425_vm7, %v3076_v26, %v3078_v25  ;;  %v3080_v31 = vsel %vm1425_vm7, %v3078_v25, %v3076_v26  ;;  %vm3114_vm7 = vcmask 523264  }
 0xdfb   : > { %v3096_v29 = vsel %vm3094_vm3, %v3080_v31, %v3074_v19  ;;  %v3095_v30 = vsel %vm3093_vm4, %v3079_v27, %v3073_v21 }
 0xdfc   : > { %3099 = vrot.lane.b32.xlu1 %v3096_v29, %s3346_s26  ;;  %3097 = vrot.lane.b32.xlu0 %v3095_v30, %s3346_s26 }
 0xe06   : > { %v3111_v57 = vpop.permute.xlu1 %3110 }
 0xe6e   : > { %v3098_v32 = vpop.permute.xlu0 %3097  ;;  %v3100_v33 = vpop.permute.xlu1 %3099 }
 0xe6f   : > { %v3101_v34 = vsel %vm3023_vm9, %v3098_v32, %v3100_v33 }
 0xe70   : > { %v3107_v35 = vsel %vm3106_vm5, %v3101_v34, %v3095_v30 }
 0xe71   : > { %v3113_v1 = vadd.f32 %v3111_v57, %v3107_v35 }
 0xe73   : > { %3115 = vst.msk [vmem:[%s576_s21] sm:$0xff] %vm3114_vm7, %v3113_v1 }
 0xe74 PF: > { %s28_s24 = sadd.s32 1, %s3331_s24  }
 0xe75   : > { %p25_p4 = scmp.ge.s32.totalorder %s28_s24, 4  }
 0xe77   :  { %27 = sbr.rel (!%p25_p4) target bundleno = 3 (0x3), region = 148 }

</bundles_post_ra>
